<compile_context>
chip_gen: v6e
topology: v6e:2x2x1
jax: 0.10.0
libtpu: 0.0.40
codegen_flags: <defaults>
</compile_context>

<pallas_src>
import functools
import math

import numpy as np

import jax
import jax.numpy as jnp
from jax.experimental import pallas as pl
from jax.experimental.pallas import tpu as pltpu

_LN_EPS = 1e-5
_NEG_INF = -1000000000.0          # matches PyTorch masked_fill(mask == 0, -1e9)


# ----------------------------------------------------------------------------
# VMEM budgeting (per-generation)
# ----------------------------------------------------------------------------

def _vmem_limit_bytes():
    """Scoped-VMEM limit ~3/4 of physical: 96 MiB on v5e/v6e (128 MiB), 48 MiB on v7x (64 MiB)."""
    try:
        cap = int(pltpu.get_tpu_info().vmem_capacity_bytes)
        return int(max(32 * 1024 * 1024, min((cap * 3) // 4, 100 * 1024 * 1024)))
    except Exception:  # info query unavailable -> conservative default safe on all gens
        return 32 * 1024 * 1024


_VMEM_LIMIT_BYTES = _vmem_limit_bytes()


def _compiler_params(n_grid_axes=1):
    return pltpu.CompilerParams(
        dimension_semantics=("parallel",) * n_grid_axes,
        vmem_limit_bytes=_VMEM_LIMIT_BYTES)


def _pick_tile(m, per_row_bytes, resident_bytes=0):
    """Largest row tile dividing m whose double-buffered blocks + residents fit the budget."""
    budget = int(_VMEM_LIMIT_BYTES * 0.75) - int(resident_bytes)
    tiles = [t for t in (1024, 512, 256, 128, 64, 32, 16, 8) if m % t == 0]
    if not tiles:
        return m
    for t in tiles:
        if 2 * t * per_row_bytes <= budget:   # x2: Pallas double-buffers each block
            return t
    return tiles[-1]


def _isz(dt):
    return np.dtype(dt).itemsize


# ----------------------------------------------------------------------------
# Pallas kernels
# ----------------------------------------------------------------------------

def _layernorm_f32(x, g, b, eps):
    """LayerNorm over the last dim; elementwise math kept in f32 (VPU)."""
    x = x.astype(jnp.float32)
    mean = jnp.mean(x, axis=-1, keepdims=True)
    var = jnp.mean(jnp.square(x - mean), axis=-1, keepdims=True)
    xn = (x - mean) * jax.lax.rsqrt(var + eps)
    return xn * g.astype(jnp.float32) + b.astype(jnp.float32)


def _ln_qkv_kernel(x_ref, g_ref, b_ref, w_ref, wb_ref, q_ref, k_ref, v_ref, *, eps):
    """q,k,v = split(LayerNorm(x) @ Wqkv + b); one fused MXU matmul, three bf16 outputs."""
    xn = _layernorm_f32(x_ref[...], g_ref[...], b_ref[...], eps)
    acc = jnp.dot(xn.astype(w_ref.dtype), w_ref[...],
                  preferred_element_type=jnp.float32)
    acc = acc + wb_ref[...].astype(jnp.float32)
    e = q_ref.shape[-1]
    q_ref[...] = acc[:, :e].astype(q_ref.dtype)
    k_ref[...] = acc[:, e:2 * e].astype(k_ref.dtype)
    v_ref[...] = acc[:, 2 * e:].astype(v_ref.dtype)


def _kv_kernel(x_ref, w_ref, wb_ref, k_ref, v_ref):
    """k,v = split(x @ Wkv + b); cross-attention memory projections (no LayerNorm)."""
    acc = jnp.dot(x_ref[...], w_ref[...], preferred_element_type=jnp.float32)
    acc = acc + wb_ref[...].astype(jnp.float32)
    e = k_ref.shape[-1]
    k_ref[...] = acc[:, :e].astype(k_ref.dtype)
    v_ref[...] = acc[:, e:].astype(v_ref.dtype)


def _ln_linear_kernel(x_ref, g_ref, b_ref, w_ref, wb_ref, o_ref, *, eps):
    """o = LayerNorm(x) @ w + b (LN fused into the matmul prologue)."""
    xn = _layernorm_f32(x_ref[...], g_ref[...], b_ref[...], eps)
    acc = jnp.dot(xn.astype(w_ref.dtype), w_ref[...],
                  preferred_element_type=jnp.float32)
    o_ref[...] = (acc + wb_ref[...].astype(jnp.float32)).astype(o_ref.dtype)


def _linear_residual_kernel(x_ref, w_ref, b_ref, res_ref, o_ref):
    """o = x @ w + b + residual (residual add fused into the projection)."""
    acc = jnp.dot(x_ref[...], w_ref[...], preferred_element_type=jnp.float32)
    acc = acc + b_ref[...].astype(jnp.float32) + res_ref[...].astype(jnp.float32)
    o_ref[...] = acc.astype(o_ref.dtype)


def _ffn_kernel(x_ref, g_ref, b_ref, w1_ref, b1_ref, w2_ref, b2_ref, o_ref, *, eps):
    """o = x + (ReLU(LayerNorm(x) @ w1 + b1) @ w2 + b2); hidden stays in VMEM."""
    x = x_ref[...].astype(jnp.float32)
    xn = _layernorm_f32(x, g_ref[...], b_ref[...], eps)
    h = jnp.dot(xn.astype(w1_ref.dtype), w1_ref[...],
                preferred_element_type=jnp.float32)
    h = jnp.maximum(h + b1_ref[...].astype(jnp.float32), 0.0)
    o = jnp.dot(h.astype(w2_ref.dtype), w2_ref[...],
                preferred_element_type=jnp.float32)
    o_ref[...] = (o + b2_ref[...].astype(jnp.float32) + x).astype(o_ref.dtype)


def _layernorm_kernel(x_ref, g_ref, b_ref, o_ref, *, eps):
    o_ref[...] = _layernorm_f32(x_ref[...], g_ref[...], b_ref[...], eps).astype(o_ref.dtype)


def _mha_kernel(q_ref, k_ref, v_ref, m_ref, o_ref, *, num_heads, scale):
    """One (batch, query-tile) step, all H heads; -1e9 bias generated in-kernel from the mask.

    q_ref: (1, tq, E)  k_ref/v_ref: (1, Tk, E)  m_ref: (1, mq, Tk) with mq in {1, tq}.
    Each head's (tq, Dh) result is written straight into its output lane slice.
    """
    q = q_ref[0]                                   # (tq, E) bf16
    k = k_ref[0]                                   # (Tk, E) bf16
    v = v_ref[0]                                   # (Tk, E) bf16
    keep = m_ref[0].astype(jnp.float32)            # (mq, Tk); nonzero = keep
    bias = jnp.where(keep == 0.0, _NEG_INF, 0.0)   # additive bias, broadcasts over rows
    dh = q.shape[-1] // num_heads
    contract = (((1,), (1,)), ((), ()))            # contract the Dh axes; no explicit k.T
    for h in range(num_heads):                     # static loop over heads
        sl = slice(h * dh, (h + 1) * dh)
        s = jax.lax.dot_general(q[:, sl], k[:, sl], contract,
                                preferred_element_type=jnp.float32)
        s = s * scale + bias
        s = s - jnp.max(s, axis=-1, keepdims=True)
        p = jnp.exp(s)
        p = p / jnp.sum(p, axis=-1, keepdims=True)  # exact division (softmax parity)
        o = jnp.dot(p.astype(v.dtype), v[:, sl], preferred_element_type=jnp.float32)
        o_ref[0, :, sl] = o.astype(o_ref.dtype)


# ----------------------------------------------------------------------------
# pallas_call wrappers (row-tiled, parallel grids, VMEM-budgeted tiles)
# ----------------------------------------------------------------------------

def pallas_ln_qkv(x, gamma, beta, w, b, out_dtype=jnp.bfloat16, eps=_LN_EPS):
    M, E = x.shape
    N = w.shape[1]                                  # 3E
    wbytes = E * N * _isz(w.dtype) + N * _isz(b.dtype)
    row_bytes = E * _isz(x.dtype) + N * _isz(out_dtype)
    tm = _pick_tile(M, row_bytes, resident_bytes=2 * wbytes)
    cost = pl.CostEstimate(
        flops=2 * M * E * N, transcendentals=M,
        bytes_accessed=int(M * E * _isz(x.dtype) + wbytes + M * N * _isz(out_dtype)))
    return pl.pallas_call(
        functools.partial(_ln_qkv_kernel, eps=eps),
        out_shape=tuple(jax.ShapeDtypeStruct((M, E), out_dtype) for _ in range(3)),
        grid=(M // tm,),
        in_specs=[
            pl.BlockSpec((tm, E), lambda i: (i, 0)),
            pl.BlockSpec((1, E), lambda i: (0, 0)),
            pl.BlockSpec((1, E), lambda i: (0, 0)),
            pl.BlockSpec((E, N), lambda i: (0, 0)),
            pl.BlockSpec((1, N), lambda i: (0, 0)),
        ],
        out_specs=tuple(pl.BlockSpec((tm, E), lambda i: (i, 0)) for _ in range(3)),
        compiler_params=_compiler_params(),
        cost_estimate=cost,
    )(x, gamma.reshape(1, E), beta.reshape(1, E), w, b.reshape(1, N))


def pallas_kv(x, w, b, out_dtype=jnp.bfloat16):
    M, E = x.shape
    N = w.shape[1]                                  # 2E
    wbytes = E * N * _isz(w.dtype) + N * _isz(b.dtype)
    row_bytes = E * _isz(x.dtype) + N * _isz(out_dtype)
    tm = _pick_tile(M, row_bytes, resident_bytes=2 * wbytes)
    cost = pl.CostEstimate(
        flops=2 * M * E * N, transcendentals=0,
        bytes_accessed=int(M * E * _isz(x.dtype) + wbytes + M * N * _isz(out_dtype)))
    return pl.pallas_call(
        _kv_kernel,
        out_shape=tuple(jax.ShapeDtypeStruct((M, E), out_dtype) for _ in range(2)),
        grid=(M // tm,),
        in_specs=[
            pl.BlockSpec((tm, E), lambda i: (i, 0)),
            pl.BlockSpec((E, N), lambda i: (0, 0)),
            pl.BlockSpec((1, N), lambda i: (0, 0)),
        ],
        out_specs=tuple(pl.BlockSpec((tm, E), lambda i: (i, 0)) for _ in range(2)),
        compiler_params=_compiler_params(),
        cost_estimate=cost,
    )(x, w, b.reshape(1, N))


def pallas_ln_linear(x, gamma, beta, w, b, out_dtype=None, eps=_LN_EPS):
    M, E = x.shape
    N = w.shape[1]
    out_dtype = out_dtype or x.dtype
    wbytes = E * N * _isz(w.dtype) + N * _isz(b.dtype)
    row_bytes = E * _isz(x.dtype) + N * _isz(out_dtype)
    tm = _pick_tile(M, row_bytes, resident_bytes=2 * wbytes)
    cost = pl.CostEstimate(
        flops=2 * M * E * N, transcendentals=M,
        bytes_accessed=int(M * E * _isz(x.dtype) + wbytes + M * N * _isz(out_dtype)))
    return pl.pallas_call(
        functools.partial(_ln_linear_kernel, eps=eps),
        out_shape=jax.ShapeDtypeStruct((M, N), out_dtype),
        grid=(M // tm,),
        in_specs=[
            pl.BlockSpec((tm, E), lambda i: (i, 0)),
            pl.BlockSpec((1, E), lambda i: (0, 0)),
            pl.BlockSpec((1, E), lambda i: (0, 0)),
            pl.BlockSpec((E, N), lambda i: (0, 0)),
            pl.BlockSpec((1, N), lambda i: (0, 0)),
        ],
        out_specs=pl.BlockSpec((tm, N), lambda i: (i, 0)),
        compiler_params=_compiler_params(),
        cost_estimate=cost,
    )(x, gamma.reshape(1, E), beta.reshape(1, E), w, b.reshape(1, N))


def pallas_linear_residual(x, w, b, res):
    M, K = x.shape
    N = w.shape[1]
    wbytes = K * N * _isz(w.dtype) + N * _isz(b.dtype)
    row_bytes = K * _isz(x.dtype) + 2 * N * _isz(res.dtype)
    tm = _pick_tile(M, row_bytes, resident_bytes=2 * wbytes)
    cost = pl.CostEstimate(
        flops=2 * M * K * N, transcendentals=0,
        bytes_accessed=int(M * K * _isz(x.dtype) + wbytes + 2 * M * N * _isz(res.dtype)))
    return pl.pallas_call(
        _linear_residual_kernel,
        out_shape=jax.ShapeDtypeStruct((M, N), res.dtype),
        grid=(M // tm,),
        in_specs=[
            pl.BlockSpec((tm, K), lambda i: (i, 0)),
            pl.BlockSpec((K, N), lambda i: (0, 0)),
            pl.BlockSpec((1, N), lambda i: (0, 0)),
            pl.BlockSpec((tm, N), lambda i: (i, 0)),
        ],
        out_specs=pl.BlockSpec((tm, N), lambda i: (i, 0)),
        compiler_params=_compiler_params(),
        cost_estimate=cost,
    )(x, w, b.reshape(1, N), res)


def pallas_ffn(x, gamma, beta, w1, b1, w2, b2, eps=_LN_EPS):
    M, E = x.shape
    F = w1.shape[1]
    wbytes = (E * F * _isz(w1.dtype) + F * E * _isz(w2.dtype)
              + F * _isz(b1.dtype) + E * _isz(b2.dtype))
    row_bytes = 2 * E * _isz(x.dtype) + F * 4       # f32 hidden row stays in VMEM
    tm = _pick_tile(M, row_bytes, resident_bytes=2 * wbytes)
    cost = pl.CostEstimate(
        flops=4 * M * E * F, transcendentals=M,
        bytes_accessed=int(2 * M * E * _isz(x.dtype) + wbytes))
    return pl.pallas_call(
        functools.partial(_ffn_kernel, eps=eps),
        out_shape=jax.ShapeDtypeStruct((M, E), x.dtype),
        grid=(M // tm,),
        in_specs=[
            pl.BlockSpec((tm, E), lambda i: (i, 0)),
            pl.BlockSpec((1, E), lambda i: (0, 0)),
            pl.BlockSpec((1, E), lambda i: (0, 0)),
            pl.BlockSpec((E, F), lambda i: (0, 0)),
            pl.BlockSpec((1, F), lambda i: (0, 0)),
            pl.BlockSpec((F, E), lambda i: (0, 0)),
            pl.BlockSpec((1, E), lambda i: (0, 0)),
        ],
        out_specs=pl.BlockSpec((tm, E), lambda i: (i, 0)),
        compiler_params=_compiler_params(),
        cost_estimate=cost,
    )(x, gamma.reshape(1, E), beta.reshape(1, E),
      w1, b1.reshape(1, F), w2, b2.reshape(1, E))


def pallas_layernorm(x, gamma, beta, eps=_LN_EPS):
    M, E = x.shape
    tm = _pick_tile(M, 2 * E * _isz(x.dtype))
    return pl.pallas_call(
        functools.partial(_layernorm_kernel, eps=eps),
        out_shape=jax.ShapeDtypeStruct((M, E), x.dtype),
        grid=(M // tm,),
        in_specs=[
            pl.BlockSpec((tm, E), lambda i: (i, 0)),
            pl.BlockSpec((1, E), lambda i: (0, 0)),
            pl.BlockSpec((1, E), lambda i: (0, 0)),
        ],
        out_specs=pl.BlockSpec((tm, E), lambda i: (i, 0)),
        compiler_params=_compiler_params(),
        cost_estimate=pl.CostEstimate(flops=8 * M * E, transcendentals=M,
                                      bytes_accessed=int(2 * M * E * _isz(x.dtype))),
    )(x, gamma.reshape(1, E), beta.reshape(1, E))


def pallas_mha(q, k, v, mask, num_heads):
    """q: (B,Tq,E), k/v: (B,Tk,E) bf16; mask: (B or 1, Tq or 1, Tk) keep/masked -> (B,Tq,E)."""
    B, Tq, E = q.shape
    Tk = k.shape[1]
    if mask.ndim == 2:
        mask = mask[None]
    mB, mQ, mK = mask.shape
    assert mK == Tk and mQ in (1, Tq) and mB in (1, B), (mask.shape, (B, Tq, Tk))
    scale = 1.0 / math.sqrt(E // num_heads)

    esz = _isz(q.dtype)
    row_bytes = 2 * E * esz + Tk * _isz(mask.dtype)           # q row + out row + mask row
    resident = 2 * 2 * Tk * E * esz                           # K and V blocks, double-buffered
    tq = _pick_tile(Tq, row_bytes, resident_bytes=resident)
    grid = (B, Tq // tq)

    if mQ == 1:
        m_blk = (1, 1, Tk)
        m_map = (lambda b, i: (0, 0, 0)) if mB == 1 else (lambda b, i: (b, 0, 0))
    else:
        m_blk = (1, tq, Tk)
        m_map = (lambda b, i: (0, i, 0)) if mB == 1 else (lambda b, i: (b, i, 0))

    cost = pl.CostEstimate(
        flops=4 * B * Tq * Tk * E,
        transcendentals=B * num_heads * Tq * Tk,
        bytes_accessed=int(2 * B * Tq * E * esz + 2 * B * Tk * E * esz
                           + mB * mQ * mK * _isz(mask.dtype)))
    return pl.pallas_call(
        functools.partial(_mha_kernel, num_heads=num_heads, scale=scale),
        out_shape=jax.ShapeDtypeStruct((B, Tq, E), q.dtype),
        grid=grid,
        in_specs=[
            pl.BlockSpec((1, tq, E), lambda b, i: (b, i, 0)),
            pl.BlockSpec((1, Tk, E), lambda b, i: (b, 0, 0)),
            pl.BlockSpec((1, Tk, E), lambda b, i: (b, 0, 0)),
            pl.BlockSpec(m_blk, m_map),
        ],
        out_specs=pl.BlockSpec((1, tq, E), lambda b, i: (b, i, 0)),
        compiler_params=_compiler_params(2),
        cost_estimate=cost,
    )(q, k, v, mask)


# ----------------------------------------------------------------------------
# Model glue (plain JAX): reshapes and residual plumbing between fused kernels
# ----------------------------------------------------------------------------

def decoder_layer(p, x, mem_bf16, src_mask, tgt_mask, num_heads):
    B, T, E = x.shape
    S = mem_bf16.shape[1]
    x_flat = x.reshape(B * T, E)
    mem_flat = mem_bf16.reshape(B * S, E)

    # Masked self-attention: LN1 fused into fused-QKV projection (3 outputs, no jnp.split);
    # residual add fused into the output projection.
    sa = p["self_attn"]
    q, k, v = pallas_ln_qkv(x_flat, p["ln1_g"], p["ln1_b"], sa["wqkv"], sa["bqkv"])
    attn = pallas_mha(q.reshape(B, T, E), k.reshape(B, T, E), v.reshape(B, T, E),
                      tgt_mask, num_heads)
    x_flat = pallas_linear_residual(attn.reshape(B * T, E), sa["wo"], sa["bo"], x_flat)

    # Cross-attention over encoder memory: LN2 fused into the Q projection; fused K,V
    # projection of memory (2 outputs); residual fused into the output projection.
    ca = p["cross_attn"]
    q = pallas_ln_linear(x_flat, p["ln2_g"], p["ln2_b"], ca["wq"], ca["bq"],
                         out_dtype=jnp.bfloat16)
    k, v = pallas_kv(mem_flat, ca["wkv"], ca["bkv"])
    attn = pallas_mha(q.reshape(B, T, E), k.reshape(B, S, E), v.reshape(B, S, E),
                      src_mask, num_heads)
    x_flat = pallas_linear_residual(attn.reshape(B * T, E), ca["wo"], ca["bo"], x_flat)

    # Feed-forward: LN3 + w1 + ReLU + w2 + residual in one kernel (hidden never hits HBM).
    x_flat = pallas_ffn(x_flat, p["ln3_g"], p["ln3_b"],
                        p["ff_w1"], p["ff_b1"], p["ff_w2"], p["ff_b2"])
    return x_flat.reshape(B, T, E)


def decoder_forward(params, target, memory, source_mask, target_mask, num_heads):
    B, T = target.shape
    E = params["embedding"].shape[1]

    # Embedding lookup + positional encoding (plain-JAX glue: gather + add).
    x = params["embedding"][target] + params["pe"][:T][None, :, :]
    # Dropout after positional encoding is identity in eval mode.

    # Keep/masked indicators in bf16 and native shape ((B,T,T) / (B,1,S)) — the -1e9 additive
    # bias is generated inside the attention kernel, so no f32 (B,T,T) bias array is ever
    # materialized or re-read per layer.
    src_mask = (source_mask != 0).astype(jnp.bfloat16)
    tgt_mask = (target_mask != 0).astype(jnp.bfloat16)

    # Memory only feeds bf16 K/V projections; cast once so its HBM reads are half-width.
    mem_bf16 = memory.astype(jnp.bfloat16)

    for lp in params["layers"]:
        x = decoder_layer(lp, x, mem_bf16, src_mask, tgt_mask, num_heads)
    x = pallas_layernorm(x.reshape(B * T, E),
                         params["ln_f_g"], params["ln_f_b"]).reshape(B, T, E)
    return x


# ----------------------------------------------------------------------------
# Deterministic parameter initialization (bf16 weights, fused QKV / KV built once)
# ----------------------------------------------------------------------------

def _init_linear(key, fan_in, fan_out):
    kw, kb = jax.random.split(key)
    bound = 1.0 / math.sqrt(fan_in)
    w = jax.random.uniform(kw, (fan_in, fan_out), jnp.float32, -bound, bound)
    b = jax.random.uniform(kb, (fan_out,), jnp.float32, -bound, bound)
    return w, b


def _init_mha(key, E):
    ks = jax.random.split(key, 4)
    wq, bq = _init_linear(ks[0], E, E)
    wk, bk = _init_linear(ks[1], E, E)
    wv, bv = _init_linear(ks[2], E, E)
    wo, bo = _init_linear(ks[3], E, E)
    return wq, bq, wk, bk, wv, bv, wo, bo


def init_decoder_params(key, vocab_size, E, max_seq_len, num_layers, ff_dim=2048):
    bf16 = jnp.bfloat16
    keys = jax.random.split(key, num_layers + 1)
    params = {}
    params["embedding"] = jax.random.normal(keys[0], (vocab_size, E), jnp.float32)

    # Sinusoidal positional encoding (buffer).
    position = jnp.arange(max_seq_len, dtype=jnp.float32)[:, None]
    div_term = jnp.exp(jnp.arange(0, E, 2, dtype=jnp.float32) * -(math.log(10000.0) / E))
    pe = jnp.zeros((max_seq_len, E), jnp.float32)
    pe = pe.at[:, 0::2].set(jnp.sin(position * div_term))
    pe = pe.at[:, 1::2].set(jnp.cos(position * div_term))
    params["pe"] = pe

    layers = []
    for li in range(num_layers):
        lk = jax.random.split(keys[li + 1], 4)
        wq, bq, wk, bk, wv, bv, wo, bo = _init_mha(lk[0], E)
        self_attn = dict(wqkv=jnp.concatenate([wq, wk, wv], axis=1).astype(bf16),
                         bqkv=jnp.concatenate([bq, bk, bv], axis=0),
                         wo=wo.astype(bf16), bo=bo)
        wq, bq, wk, bk, wv, bv, wo, bo = _init_mha(lk[1], E)
        cross_attn = dict(wq=wq.astype(bf16), bq=bq,
                          wkv=jnp.concatenate([wk, wv], axis=1).astype(bf16),
                          bkv=jnp.concatenate([bk, bv], axis=0),
                          wo=wo.astype(bf16), bo=bo)
        w1, b1 = _init_linear(lk[2], E, ff_dim)
        w2, b2 = _init_linear(lk[3], ff_dim, E)
        layers.append(dict(
            self_attn=self_attn, cross_attn=cross_attn,
            ff_w1=w1.astype(bf16), ff_b1=b1, ff_w2=w2.astype(bf16), ff_b2=b2,
            ln1_g=jnp.ones((E,), jnp.float32), ln1_b=jnp.zeros((E,), jnp.float32),
            ln2_g=jnp.ones((E,), jnp.float32), ln2_b=jnp.zeros((E,), jnp.float32),
            ln3_g=jnp.ones((E,), jnp.float32), ln3_b=jnp.zeros((E,), jnp.float32),
        ))
    params["layers"] = layers
    params["ln_f_g"] = jnp.ones((E,), jnp.float32)
    params["ln_f_b"] = jnp.zeros((E,), jnp.float32)
    return params


# ----------------------------------------------------------------------------
# Demo
# ----------------------------------------------------------------------------

if __name__ == "__main__":
    VOCAB = 50
    E = 32          # embedding_dim
    MAX_SEQ = 16    # max_seq_len
    HEADS = 4       # num_heads
    LAYERS = 2      # num_layers
    B, T, S = 2, 8, 8

    root = jax.random.PRNGKey(0)
    k_par, k_tgt, k_mem = jax.random.split(root, 3)

    params = init_decoder_params(k_par, VOCAB, E, MAX_SEQ, LAYERS, ff_dim=2048)

    target = jax.random.randint(k_tgt, (B, T), 0, VOCAB)                 # token ids
    memory = jax.random.normal(k_mem, (B, S, E), jnp.float32)            # encoder output
    target_mask = jnp.tril(jnp.ones((T, T), jnp.float32))[None].repeat(B, axis=0)  # causal
    source_mask = jnp.ones((B, 1, S), jnp.float32)                       # (B, 1, S)

    fwd = jax.jit(functools.partial(decoder_forward, num_heads=HEADS))
    out = fwd(params, target, memory, source_mask, target_mask)
    out = jax.block_until_ready(out)

    assert out.shape == (B, T, E), out.shape
    assert bool(jnp.all(jnp.isfinite(out)))
    print("KERNEL_OK")
</pallas_src>

<mosaic_0001>
module attributes {stable_mosaic.version = 11 : i64} {
  func.func @_linear_residual_kernel(%arg0: i32, %arg1: memref<16x32xbf16, #tpu.memory_space<vmem>>, %arg2: memref<32x32xbf16, #tpu.memory_space<vmem>>, %arg3: memref<1x32xf32, #tpu.memory_space<vmem>>, %arg4: memref<16x32xf32, #tpu.memory_space<vmem>>, %arg5: memref<16x32xf32, #tpu.memory_space<vmem>>) attributes {dimension_semantics = [#tpu.dimension_semantics<parallel>], iteration_bounds = array<i64: 1>, scalar_prefetch = 0 : i64, scratch_operands = 0 : i64, tpu.core_type = #tpu.core_type<tc>, window_params = [{transform_indices = @transform_0, window_bounds = array<i64: 16, 32>}, {pipeline_mode = #tpu.pipeline_mode<synchronous>, transform_indices = @transform_1, window_bounds = array<i64: 32, 32>}, {pipeline_mode = #tpu.pipeline_mode<synchronous>, transform_indices = @transform_2, window_bounds = array<i64: 1, 32>}, {transform_indices = @transform_3, window_bounds = array<i64: 16, 32>}, {transform_indices = @transform_4, window_bounds = array<i64: 16, 32>}]} {
    %c0 = arith.constant 0 : index
    %c0_0 = arith.constant 0 : index
    %0 = vector.load %arg1[%c0, %c0_0] : memref<16x32xbf16, #tpu.memory_space<vmem>>, vector<16x32xbf16>
    %c0_1 = arith.constant 0 : index
    %c0_2 = arith.constant 0 : index
    %1 = vector.load %arg2[%c0_1, %c0_2] : memref<32x32xbf16, #tpu.memory_space<vmem>>, vector<32x32xbf16>
    %cst = arith.constant dense<0.000000e+00> : vector<16x32xf32>
    %2 = tpu.matmul %0, %1, %cst {dimension_numbers = #tpu.dot_dimension_numbers<[1], [0], [0], [1], [0, 0, 1, 1], [], []>} : vector<16x32xbf16>, vector<32x32xbf16>, vector<16x32xf32> -> vector<16x32xf32>
    %c0_3 = arith.constant 0 : index
    %c0_4 = arith.constant 0 : index
    %3 = vector.load %arg3[%c0_3, %c0_4] : memref<1x32xf32, #tpu.memory_space<vmem>>, vector<1x32xf32>
    %4 = vector.broadcast %3 : vector<1x32xf32> to vector<16x32xf32>
    %5 = arith.addf %2, %4 : vector<16x32xf32>
    %c0_5 = arith.constant 0 : index
    %c0_6 = arith.constant 0 : index
    %6 = vector.load %arg4[%c0_5, %c0_6] : memref<16x32xf32, #tpu.memory_space<vmem>>, vector<16x32xf32>
    %7 = arith.addf %5, %6 : vector<16x32xf32>
    %c0_7 = arith.constant 0 : index
    %c0_8 = arith.constant 0 : index
    %8 = vector.load %arg5[%c0_7, %c0_8] : memref<16x32xf32, #tpu.memory_space<vmem>>, vector<16x32xf32>
    tpu.vector_store %arg5[%c0_7, %c0_8], %7 {strides = array<i32>} : memref<16x32xf32, #tpu.memory_space<vmem>>, vector<16x32xf32>,
    return
  }
  func.func @transform_0(%arg0: i32) -> (i32, i32) {
    %c0_i32 = arith.constant 0 : i32
    %c0_i32_0 = arith.constant 0 : i32
    return %arg0, %c0_i32 : i32, i32
  }
  func.func @transform_1(%arg0: i32) -> (i32, i32) {
    %c0_i32 = arith.constant 0 : i32
    %c0_i32_0 = arith.constant 0 : i32
    %c0_i32_1 = arith.constant 0 : i32
    return %c0_i32, %c0_i32_0 : i32, i32
  }
  func.func @transform_2(%arg0: i32) -> (i32, i32) {
    %c0_i32 = arith.constant 0 : i32
    %c0_i32_0 = arith.constant 0 : i32
    %c0_i32_1 = arith.constant 0 : i32
    return %c0_i32, %c0_i32_0 : i32, i32
  }
  func.func @transform_3(%arg0: i32) -> (i32, i32) {
    %c0_i32 = arith.constant 0 : i32
    %c0_i32_0 = arith.constant 0 : i32
    return %arg0, %c0_i32 : i32, i32
  }
  func.func @transform_4(%arg0: i32) -> (i32, i32) {
    %c0_i32 = arith.constant 0 : i32
    %c0_i32_0 = arith.constant 0 : i32
    return %arg0, %c0_i32 : i32, i32
  }
}

module attributes {stable_mosaic.version = 11 : i64} {
  func.func @_ln_qkv_kernel(%arg0: i32, %arg1: memref<16x32xf32, #tpu.memory_space<vmem>>, %arg2: memref<1x32xf32, #tpu.memory_space<vmem>>, %arg3: memref<1x32xf32, #tpu.memory_space<vmem>>, %arg4: memref<32x96xbf16, #tpu.memory_space<vmem>>, %arg5: memref<1x96xf32, #tpu.memory_space<vmem>>, %arg6: memref<16x32xbf16, #tpu.memory_space<vmem>>, %arg7: memref<16x32xbf16, #tpu.memory_space<vmem>>, %arg8: memref<16x32xbf16, #tpu.memory_space<vmem>>) attributes {dimension_semantics = [#tpu.dimension_semantics<parallel>], iteration_bounds = array<i64: 1>, scalar_prefetch = 0 : i64, scratch_operands = 0 : i64, tpu.core_type = #tpu.core_type<tc>, window_params = [{transform_indices = @transform_0, window_bounds = array<i64: 16, 32>}, {pipeline_mode = #tpu.pipeline_mode<synchronous>, transform_indices = @transform_1, window_bounds = array<i64: 1, 32>}, {pipeline_mode = #tpu.pipeline_mode<synchronous>, transform_indices = @transform_2, window_bounds = array<i64: 1, 32>}, {pipeline_mode = #tpu.pipeline_mode<synchronous>, transform_indices = @transform_3, window_bounds = array<i64: 32, 96>}, {pipeline_mode = #tpu.pipeline_mode<synchronous>, transform_indices = @transform_4, window_bounds = array<i64: 1, 96>}, {transform_indices = @transform_5, window_bounds = array<i64: 16, 32>}, {transform_indices = @transform_6, window_bounds = array<i64: 16, 32>}, {transform_indices = @transform_7, window_bounds = array<i64: 16, 32>}]} {
    %c0 = arith.constant 0 : index
    %c0_0 = arith.constant 0 : index
    %0 = vector.load %arg1[%c0, %c0_0] : memref<16x32xf32, #tpu.memory_space<vmem>>, vector<16x32xf32>
    %c0_1 = arith.constant 0 : index
    %c0_2 = arith.constant 0 : index
    %1 = vector.load %arg2[%c0_1, %c0_2] : memref<1x32xf32, #tpu.memory_space<vmem>>, vector<1x32xf32>
    %c0_3 = arith.constant 0 : index
    %c0_4 = arith.constant 0 : index
    %2 = vector.load %arg3[%c0_3, %c0_4] : memref<1x32xf32, #tpu.memory_space<vmem>>, vector<1x32xf32>
    %cst = arith.constant dense<0.000000e+00> : vector<16xf32>
    %3 = vector.multi_reduction <add>, %0, %cst [1] : vector<16x32xf32> to vector<16xf32>
    %4 = vector.shape_cast %3 : vector<16xf32> to vector<16x1xf32>
    %cst_5 = arith.constant 3.200000e+01 : f32
    %5 = vector.broadcast %cst_5 : f32 to vector<16x1xf32>
    %6 = arith.divf %4, %5 : vector<16x1xf32>
    %7 = vector.broadcast %6 : vector<16x1xf32> to vector<16x32xf32>
    %8 = arith.subf %0, %7 : vector<16x32xf32>
    %9 = arith.mulf %8, %8 : vector<16x32xf32>
    %cst_6 = arith.constant dense<0.000000e+00> : vector<16xf32>
    %10 = vector.multi_reduction <add>, %9, %cst_6 [1] : vector<16x32xf32> to vector<16xf32>
    %11 = vector.shape_cast %10 : vector<16xf32> to vector<16x1xf32>
    %cst_7 = arith.constant 3.200000e+01 : f32
    %12 = vector.broadcast %cst_7 : f32 to vector<16x1xf32>
    %13 = arith.divf %11, %12 : vector<16x1xf32>
    %14 = vector.broadcast %6 : vector<16x1xf32> to vector<16x32xf32>
    %15 = arith.subf %0, %14 : vector<16x32xf32>
    %cst_8 = arith.constant 9.99999974E-6 : f32
    %16 = vector.broadcast %cst_8 : f32 to vector<16x1xf32>
    %17 = arith.addf %13, %16 : vector<16x1xf32>
    %18 = math.rsqrt %17 : vector<16x1xf32>
    %19 = vector.broadcast %18 : vector<16x1xf32> to vector<16x32xf32>
    %20 = arith.mulf %15, %19 : vector<16x32xf32>
    %21 = vector.broadcast %1 : vector<1x32xf32> to vector<16x32xf32>
    %22 = arith.mulf %20, %21 : vector<16x32xf32>
    %23 = vector.broadcast %2 : vector<1x32xf32> to vector<16x32xf32>
    %24 = arith.addf %22, %23 : vector<16x32xf32>
    %25 = arith.truncf %24 : vector<16x32xf32> to vector<16x32xbf16>
    %c0_9 = arith.constant 0 : index
    %c0_10 = arith.constant 0 : index
    %26 = vector.load %arg4[%c0_9, %c0_10] : memref<32x96xbf16, #tpu.memory_space<vmem>>, vector<32x96xbf16>
    %cst_11 = arith.constant dense<0.000000e+00> : vector<16x96xf32>
    %27 = tpu.matmul %25, %26, %cst_11 {dimension_numbers = #tpu.dot_dimension_numbers<[1], [0], [0], [1], [0, 0, 1, 1], [], []>} : vector<16x32xbf16>, vector<32x96xbf16>, vector<16x96xf32> -> vector<16x96xf32>
    %c0_12 = arith.constant 0 : index
    %c0_13 = arith.constant 0 : index
    %28 = vector.load %arg5[%c0_12, %c0_13] : memref<1x96xf32, #tpu.memory_space<vmem>>, vector<1x96xf32>
    %29 = vector.broadcast %28 : vector<1x96xf32> to vector<16x96xf32>
    %30 = arith.addf %27, %29 : vector<16x96xf32>
    %31 = vector.extract_strided_slice %30 {offsets = [0, 0], sizes = [16, 32], strides = [1, 1]} : vector<16x96xf32> to vector<16x32xf32>
    %32 = arith.truncf %31 : vector<16x32xf32> to vector<16x32xbf16>
    %c0_14 = arith.constant 0 : index
    %c0_15 = arith.constant 0 : index
    %33 = vector.load %arg6[%c0_14, %c0_15] : memref<16x32xbf16, #tpu.memory_space<vmem>>, vector<16x32xbf16>
    tpu.vector_store %arg6[%c0_14, %c0_15], %32 {strides = array<i32>} : memref<16x32xbf16, #tpu.memory_space<vmem>>, vector<16x32xbf16>,
    %34 = vector.extract_strided_slice %30 {offsets = [0, 32], sizes = [16, 32], strides = [1, 1]} : vector<16x96xf32> to vector<16x32xf32>
    %35 = arith.truncf %34 : vector<16x32xf32> to vector<16x32xbf16>
    %c0_16 = arith.constant 0 : index
    %c0_17 = arith.constant 0 : index
    %36 = vector.load %arg7[%c0_16, %c0_17] : memref<16x32xbf16, #tpu.memory_space<vmem>>, vector<16x32xbf16>
    tpu.vector_store %arg7[%c0_16, %c0_17], %35 {strides = array<i32>} : memref<16x32xbf16, #tpu.memory_space<vmem>>, vector<16x32xbf16>,
    %37 = vector.extract_strided_slice %30 {offsets = [0, 64], sizes = [16, 32], strides = [1, 1]} : vector<16x96xf32> to vector<16x32xf32>
    %38 = arith.truncf %37 : vector<16x32xf32> to vector<16x32xbf16>
    %c0_18 = arith.constant 0 : index
    %c0_19 = arith.constant 0 : index
    %39 = vector.load %arg8[%c0_18, %c0_19] : memref<16x32xbf16, #tpu.memory_space<vmem>>, vector<16x32xbf16>
    tpu.vector_store %arg8[%c0_18, %c0_19], %38 {strides = array<i32>} : memref<16x32xbf16, #tpu.memory_space<vmem>>, vector<16x32xbf16>,
    return
  }
  func.func @transform_0(%arg0: i32) -> (i32, i32) {
    %c0_i32 = arith.constant 0 : i32
    %c0_i32_0 = arith.constant 0 : i32
    return %arg0, %c0_i32 : i32, i32
  }
  func.func @transform_1(%arg0: i32) -> (i32, i32) {
    %c0_i32 = arith.constant 0 : i32
    %c0_i32_0 = arith.constant 0 : i32
    %c0_i32_1 = arith.constant 0 : i32
    return %c0_i32, %c0_i32_0 : i32, i32
  }
  func.func @transform_2(%arg0: i32) -> (i32, i32) {
    %c0_i32 = arith.constant 0 : i32
    %c0_i32_0 = arith.constant 0 : i32
    %c0_i32_1 = arith.constant 0 : i32
    return %c0_i32, %c0_i32_0 : i32, i32
  }
  func.func @transform_3(%arg0: i32) -> (i32, i32) {
    %c0_i32 = arith.constant 0 : i32
    %c0_i32_0 = arith.constant 0 : i32
    %c0_i32_1 = arith.constant 0 : i32
    return %c0_i32, %c0_i32_0 : i32, i32
  }
  func.func @transform_4(%arg0: i32) -> (i32, i32) {
    %c0_i32 = arith.constant 0 : i32
    %c0_i32_0 = arith.constant 0 : i32
    %c0_i32_1 = arith.constant 0 : i32
    return %c0_i32, %c0_i32_0 : i32, i32
  }
  func.func @transform_5(%arg0: i32) -> (i32, i32) {
    %c0_i32 = arith.constant 0 : i32
    %c0_i32_0 = arith.constant 0 : i32
    return %arg0, %c0_i32 : i32, i32
  }
  func.func @transform_6(%arg0: i32) -> (i32, i32) {
    %c0_i32 = arith.constant 0 : i32
    %c0_i32_0 = arith.constant 0 : i32
    return %arg0, %c0_i32 : i32, i32
  }
  func.func @transform_7(%arg0: i32) -> (i32, i32) {
    %c0_i32 = arith.constant 0 : i32
    %c0_i32_0 = arith.constant 0 : i32
    return %arg0, %c0_i32 : i32, i32
  }
}

module attributes {stable_mosaic.version = 11 : i64} {
  func.func @_mha_kernel(%arg0: i32, %arg1: i32, %arg2: memref<1x8x32xbf16, #tpu.memory_space<vmem>>, %arg3: memref<1x8x32xbf16, #tpu.memory_space<vmem>>, %arg4: memref<1x8x32xbf16, #tpu.memory_space<vmem>>, %arg5: memref<1x8x8xbf16, #tpu.memory_space<vmem>>, %arg6: memref<1x8x32xbf16, #tpu.memory_space<vmem>>) attributes {dimension_semantics = [#tpu.dimension_semantics<parallel>, #tpu.dimension_semantics<parallel>], iteration_bounds = array<i64: 2, 1>, scalar_prefetch = 0 : i64, scratch_operands = 0 : i64, tpu.core_type = #tpu.core_type<tc>, window_params = [{transform_indices = @transform_0, window_bounds = array<i64: 1, 8, 32>}, {transform_indices = @transform_1, window_bounds = array<i64: 1, 8, 32>}, {transform_indices = @transform_2, window_bounds = array<i64: 1, 8, 32>}, {transform_indices = @transform_3, window_bounds = array<i64: 1, 8, 8>}, {transform_indices = @transform_4, window_bounds = array<i64: 1, 8, 32>}]} {
    %c0 = arith.constant 0 : index
    %c0_0 = arith.constant 0 : index
    %c0_1 = arith.constant 0 : index
    %0 = vector.load %arg2[%c0, %c0_0, %c0_1] : memref<1x8x32xbf16, #tpu.memory_space<vmem>>, vector<1x8x32xbf16>
    %1 = vector.shape_cast %0 : vector<1x8x32xbf16> to vector<8x32xbf16>
    %c0_2 = arith.constant 0 : index
    %c0_3 = arith.constant 0 : index
    %c0_4 = arith.constant 0 : index
    %2 = vector.load %arg3[%c0_2, %c0_3, %c0_4] : memref<1x8x32xbf16, #tpu.memory_space<vmem>>, vector<1x8x32xbf16>
    %3 = vector.shape_cast %2 : vector<1x8x32xbf16> to vector<8x32xbf16>
    %c0_5 = arith.constant 0 : index
    %c0_6 = arith.constant 0 : index
    %c0_7 = arith.constant 0 : index
    %4 = vector.load %arg4[%c0_5, %c0_6, %c0_7] : memref<1x8x32xbf16, #tpu.memory_space<vmem>>, vector<1x8x32xbf16>
    %5 = vector.shape_cast %4 : vector<1x8x32xbf16> to vector<8x32xbf16>
    %c0_8 = arith.constant 0 : index
    %c0_9 = arith.constant 0 : index
    %c0_10 = arith.constant 0 : index
    %6 = vector.load %arg5[%c0_8, %c0_9, %c0_10] : memref<1x8x8xbf16, #tpu.memory_space<vmem>>, vector<1x8x8xbf16>
    %7 = vector.shape_cast %6 : vector<1x8x8xbf16> to vector<8x8xbf16>
    %8 = arith.extf %7 : vector<8x8xbf16> to vector<8x8xf32>
    %cst = arith.constant 0.000000e+00 : f32
    %9 = vector.broadcast %cst : f32 to vector<8x8xf32>
    %10 = arith.cmpf oeq, %8, %9 : vector<8x8xf32>
    %cst_11 = arith.constant -1.000000e+09 : f32
    %cst_12 = arith.constant 0.000000e+00 : f32
    %11 = vector.broadcast %cst_11 : f32 to vector<8x8xf32>
    %12 = vector.broadcast %cst_12 : f32 to vector<8x8xf32>
    %13 = arith.select %10, %11, %12 : vector<8x8xi1>, vector<8x8xf32>
    %14 = vector.extract_strided_slice %1 {offsets = [0, 0], sizes = [8, 8], strides = [1, 1]} : vector<8x32xbf16> to vector<8x8xbf16>
    %15 = vector.extract_strided_slice %3 {offsets = [0, 0], sizes = [8, 8], strides = [1, 1]} : vector<8x32xbf16> to vector<8x8xbf16>
    %cst_13 = arith.constant dense<0.000000e+00> : vector<8x8xf32>
    %16 = tpu.matmul %14, %15, %cst_13 {dimension_numbers = #tpu.dot_dimension_numbers<[1], [1], [0], [0], [0, 0, 1, 0], [], []>} : vector<8x8xbf16>, vector<8x8xbf16>, vector<8x8xf32> -> vector<8x8xf32>
    %cst_14 = arith.constant 0.353553385 : f32
    %17 = vector.broadcast %cst_14 : f32 to vector<8x8xf32>
    %18 = arith.mulf %16, %17 : vector<8x8xf32>
    %19 = arith.addf %18, %13 : vector<8x8xf32>
    %cst_15 = arith.constant dense<0xFF800000> : vector<8xf32>
    %20 = vector.multi_reduction <maximumf>, %19, %cst_15 [1] : vector<8x8xf32> to vector<8xf32>
    %21 = vector.shape_cast %20 : vector<8xf32> to vector<8x1xf32>
    %22 = vector.broadcast %21 : vector<8x1xf32> to vector<8x8xf32>
    %23 = arith.subf %19, %22 : vector<8x8xf32>
    %24 = math.exp %23 : vector<8x8xf32>
    %cst_16 = arith.constant dense<0.000000e+00> : vector<8xf32>
    %25 = vector.multi_reduction <add>, %24, %cst_16 [1] : vector<8x8xf32> to vector<8xf32>
    %26 = vector.shape_cast %25 : vector<8xf32> to vector<8x1xf32>
    %27 = vector.broadcast %26 : vector<8x1xf32> to vector<8x8xf32>
    %28 = arith.divf %24, %27 : vector<8x8xf32>
    %29 = arith.truncf %28 : vector<8x8xf32> to vector<8x8xbf16>
    %30 = vector.extract_strided_slice %5 {offsets = [0, 0], sizes = [8, 8], strides = [1, 1]} : vector<8x32xbf16> to vector<8x8xbf16>
    %cst_17 = arith.constant dense<0.000000e+00> : vector<8x8xf32>
    %31 = tpu.matmul %29, %30, %cst_17 {dimension_numbers = #tpu.dot_dimension_numbers<[1], [0], [0], [1], [0, 0, 1, 1], [], []>} : vector<8x8xbf16>, vector<8x8xbf16>, vector<8x8xf32> -> vector<8x8xf32>
    %32 = arith.truncf %31 : vector<8x8xf32> to vector<8x8xbf16>
    %c0_18 = arith.constant 0 : index
    %c0_19 = arith.constant 0 : index
    %c0_20 = arith.constant 0 : index
    %33 = vector.load %arg6[%c0_18, %c0_19, %c0_20] : memref<1x8x32xbf16, #tpu.memory_space<vmem>>, vector<1x8x8xbf16>
    %34 = vector.shape_cast %33 : vector<1x8x8xbf16> to vector<8x8xbf16>
    %35 = vector.shape_cast %32 : vector<8x8xbf16> to vector<1x8x8xbf16>
    tpu.vector_store %arg6[%c0_18, %c0_19, %c0_20], %35 {strides = array<i32>} : memref<1x8x32xbf16, #tpu.memory_space<vmem>>, vector<1x8x8xbf16>,
    %36 = vector.extract_strided_slice %1 {offsets = [0, 8], sizes = [8, 8], strides = [1, 1]} : vector<8x32xbf16> to vector<8x8xbf16>
    %37 = vector.extract_strided_slice %3 {offsets = [0, 8], sizes = [8, 8], strides = [1, 1]} : vector<8x32xbf16> to vector<8x8xbf16>
    %cst_21 = arith.constant dense<0.000000e+00> : vector<8x8xf32>
    %38 = tpu.matmul %36, %37, %cst_21 {dimension_numbers = #tpu.dot_dimension_numbers<[1], [1], [0], [0], [0, 0, 1, 0], [], []>} : vector<8x8xbf16>, vector<8x8xbf16>, vector<8x8xf32> -> vector<8x8xf32>
    %cst_22 = arith.constant 0.353553385 : f32
    %39 = vector.broadcast %cst_22 : f32 to vector<8x8xf32>
    %40 = arith.mulf %38, %39 : vector<8x8xf32>
    %41 = arith.addf %40, %13 : vector<8x8xf32>
    %cst_23 = arith.constant dense<0xFF800000> : vector<8xf32>
    %42 = vector.multi_reduction <maximumf>, %41, %cst_23 [1] : vector<8x8xf32> to vector<8xf32>
    %43 = vector.shape_cast %42 : vector<8xf32> to vector<8x1xf32>
    %44 = vector.broadcast %43 : vector<8x1xf32> to vector<8x8xf32>
    %45 = arith.subf %41, %44 : vector<8x8xf32>
    %46 = math.exp %45 : vector<8x8xf32>
    %cst_24 = arith.constant dense<0.000000e+00> : vector<8xf32>
    %47 = vector.multi_reduction <add>, %46, %cst_24 [1] : vector<8x8xf32> to vector<8xf32>
    %48 = vector.shape_cast %47 : vector<8xf32> to vector<8x1xf32>
    %49 = vector.broadcast %48 : vector<8x1xf32> to vector<8x8xf32>
    %50 = arith.divf %46, %49 : vector<8x8xf32>
    %51 = arith.truncf %50 : vector<8x8xf32> to vector<8x8xbf16>
    %52 = vector.extract_strided_slice %5 {offsets = [0, 8], sizes = [8, 8], strides = [1, 1]} : vector<8x32xbf16> to vector<8x8xbf16>
    %cst_25 = arith.constant dense<0.000000e+00> : vector<8x8xf32>
    %53 = tpu.matmul %51, %52, %cst_25 {dimension_numbers = #tpu.dot_dimension_numbers<[1], [0], [0], [1], [0, 0, 1, 1], [], []>} : vector<8x8xbf16>, vector<8x8xbf16>, vector<8x8xf32> -> vector<8x8xf32>
    %54 = arith.truncf %53 : vector<8x8xf32> to vector<8x8xbf16>
    %c0_26 = arith.constant 0 : index
    %c0_27 = arith.constant 0 : index
    %c8 = arith.constant 8 : index
    %55 = vector.load %arg6[%c0_26, %c0_27, %c8] : memref<1x8x32xbf16, #tpu.memory_space<vmem>>, vector<1x8x8xbf16>
    %56 = vector.shape_cast %55 : vector<1x8x8xbf16> to vector<8x8xbf16>
    %57 = vector.shape_cast %54 : vector<8x8xbf16> to vector<1x8x8xbf16>
    tpu.vector_store %arg6[%c0_26, %c0_27, %c8], %57 {strides = array<i32>} : memref<1x8x32xbf16, #tpu.memory_space<vmem>>, vector<1x8x8xbf16>,
    %58 = vector.extract_strided_slice %1 {offsets = [0, 16], sizes = [8, 8], strides = [1, 1]} : vector<8x32xbf16> to vector<8x8xbf16>
    %59 = vector.extract_strided_slice %3 {offsets = [0, 16], sizes = [8, 8], strides = [1, 1]} : vector<8x32xbf16> to vector<8x8xbf16>
    %cst_28 = arith.constant dense<0.000000e+00> : vector<8x8xf32>
    %60 = tpu.matmul %58, %59, %cst_28 {dimension_numbers = #tpu.dot_dimension_numbers<[1], [1], [0], [0], [0, 0, 1, 0], [], []>} : vector<8x8xbf16>, vector<8x8xbf16>, vector<8x8xf32> -> vector<8x8xf32>
    %cst_29 = arith.constant 0.353553385 : f32
    %61 = vector.broadcast %cst_29 : f32 to vector<8x8xf32>
    %62 = arith.mulf %60, %61 : vector<8x8xf32>
    %63 = arith.addf %62, %13 : vector<8x8xf32>
    %cst_30 = arith.constant dense<0xFF800000> : vector<8xf32>
    %64 = vector.multi_reduction <maximumf>, %63, %cst_30 [1] : vector<8x8xf32> to vector<8xf32>
    %65 = vector.shape_cast %64 : vector<8xf32> to vector<8x1xf32>
    %66 = vector.broadcast %65 : vector<8x1xf32> to vector<8x8xf32>
    %67 = arith.subf %63, %66 : vector<8x8xf32>
    %68 = math.exp %67 : vector<8x8xf32>
    %cst_31 = arith.constant dense<0.000000e+00> : vector<8xf32>
    %69 = vector.multi_reduction <add>, %68, %cst_31 [1] : vector<8x8xf32> to vector<8xf32>
    %70 = vector.shape_cast %69 : vector<8xf32> to vector<8x1xf32>
    %71 = vector.broadcast %70 : vector<8x1xf32> to vector<8x8xf32>
    %72 = arith.divf %68, %71 : vector<8x8xf32>
    %73 = arith.truncf %72 : vector<8x8xf32> to vector<8x8xbf16>
    %74 = vector.extract_strided_slice %5 {offsets = [0, 16], sizes = [8, 8], strides = [1, 1]} : vector<8x32xbf16> to vector<8x8xbf16>
    %cst_32 = arith.constant dense<0.000000e+00> : vector<8x8xf32>
    %75 = tpu.matmul %73, %74, %cst_32 {dimension_numbers = #tpu.dot_dimension_numbers<[1], [0], [0], [1], [0, 0, 1, 1], [], []>} : vector<8x8xbf16>, vector<8x8xbf16>, vector<8x8xf32> -> vector<8x8xf32>
    %76 = arith.truncf %75 : vector<8x8xf32> to vector<8x8xbf16>
    %c0_33 = arith.constant 0 : index
    %c0_34 = arith.constant 0 : index
    %c16 = arith.constant 16 : index
    %77 = vector.load %arg6[%c0_33, %c0_34, %c16] : memref<1x8x32xbf16, #tpu.memory_space<vmem>>, vector<1x8x8xbf16>
    %78 = vector.shape_cast %77 : vector<1x8x8xbf16> to vector<8x8xbf16>
    %79 = vector.shape_cast %76 : vector<8x8xbf16> to vector<1x8x8xbf16>
    tpu.vector_store %arg6[%c0_33, %c0_34, %c16], %79 {strides = array<i32>} : memref<1x8x32xbf16, #tpu.memory_space<vmem>>, vector<1x8x8xbf16>,
    %80 = vector.extract_strided_slice %1 {offsets = [0, 24], sizes = [8, 8], strides = [1, 1]} : vector<8x32xbf16> to vector<8x8xbf16>
    %81 = vector.extract_strided_slice %3 {offsets = [0, 24], sizes = [8, 8], strides = [1, 1]} : vector<8x32xbf16> to vector<8x8xbf16>
    %cst_35 = arith.constant dense<0.000000e+00> : vector<8x8xf32>
    %82 = tpu.matmul %80, %81, %cst_35 {dimension_numbers = #tpu.dot_dimension_numbers<[1], [1], [0], [0], [0, 0, 1, 0], [], []>} : vector<8x8xbf16>, vector<8x8xbf16>, vector<8x8xf32> -> vector<8x8xf32>
    %cst_36 = arith.constant 0.353553385 : f32
    %83 = vector.broadcast %cst_36 : f32 to vector<8x8xf32>
    %84 = arith.mulf %82, %83 : vector<8x8xf32>
    %85 = arith.addf %84, %13 : vector<8x8xf32>
    %cst_37 = arith.constant dense<0xFF800000> : vector<8xf32>
    %86 = vector.multi_reduction <maximumf>, %85, %cst_37 [1] : vector<8x8xf32> to vector<8xf32>
    %87 = vector.shape_cast %86 : vector<8xf32> to vector<8x1xf32>
    %88 = vector.broadcast %87 : vector<8x1xf32> to vector<8x8xf32>
    %89 = arith.subf %85, %88 : vector<8x8xf32>
    %90 = math.exp %89 : vector<8x8xf32>
    %cst_38 = arith.constant dense<0.000000e+00> : vector<8xf32>
    %91 = vector.multi_reduction <add>, %90, %cst_38 [1] : vector<8x8xf32> to vector<8xf32>
    %92 = vector.shape_cast %91 : vector<8xf32> to vector<8x1xf32>
    %93 = vector.broadcast %92 : vector<8x1xf32> to vector<8x8xf32>
    %94 = arith.divf %90, %93 : vector<8x8xf32>
    %95 = arith.truncf %94 : vector<8x8xf32> to vector<8x8xbf16>
    %96 = vector.extract_strided_slice %5 {offsets = [0, 24], sizes = [8, 8], strides = [1, 1]} : vector<8x32xbf16> to vector<8x8xbf16>
    %cst_39 = arith.constant dense<0.000000e+00> : vector<8x8xf32>
    %97 = tpu.matmul %95, %96, %cst_39 {dimension_numbers = #tpu.dot_dimension_numbers<[1], [0], [0], [1], [0, 0, 1, 1], [], []>} : vector<8x8xbf16>, vector<8x8xbf16>, vector<8x8xf32> -> vector<8x8xf32>
    %98 = arith.truncf %97 : vector<8x8xf32> to vector<8x8xbf16>
    %c0_40 = arith.constant 0 : index
    %c0_41 = arith.constant 0 : index
    %c24 = arith.constant 24 : index
    %99 = vector.load %arg6[%c0_40, %c0_41, %c24] : memref<1x8x32xbf16, #tpu.memory_space<vmem>>, vector<1x8x8xbf16>
    %100 = vector.shape_cast %99 : vector<1x8x8xbf16> to vector<8x8xbf16>
    %101 = vector.shape_cast %98 : vector<8x8xbf16> to vector<1x8x8xbf16>
    tpu.vector_store %arg6[%c0_40, %c0_41, %c24], %101 {strides = array<i32>} : memref<1x8x32xbf16, #tpu.memory_space<vmem>>, vector<1x8x8xbf16>,
    return
  }
  func.func @transform_0(%arg0: i32, %arg1: i32) -> (i32, i32, i32) {
    %c0_i32 = arith.constant 0 : i32
    %c0_i32_0 = arith.constant 0 : i32
    return %arg0, %arg1, %c0_i32 : i32, i32, i32
  }
  func.func @transform_1(%arg0: i32, %arg1: i32) -> (i32, i32, i32) {
    %c0_i32 = arith.constant 0 : i32
    %c0_i32_0 = arith.constant 0 : i32
    %c0_i32_1 = arith.constant 0 : i32
    return %arg0, %c0_i32, %c0_i32_0 : i32, i32, i32
  }
  func.func @transform_2(%arg0: i32, %arg1: i32) -> (i32, i32, i32) {
    %c0_i32 = arith.constant 0 : i32
    %c0_i32_0 = arith.constant 0 : i32
    %c0_i32_1 = arith.constant 0 : i32
    return %arg0, %c0_i32, %c0_i32_0 : i32, i32, i32
  }
  func.func @transform_3(%arg0: i32, %arg1: i32) -> (i32, i32, i32) {
    %c0_i32 = arith.constant 0 : i32
    %c0_i32_0 = arith.constant 0 : i32
    return %arg0, %arg1, %c0_i32 : i32, i32, i32
  }
  func.func @transform_4(%arg0: i32, %arg1: i32) -> (i32, i32, i32) {
    %c0_i32 = arith.constant 0 : i32
    %c0_i32_0 = arith.constant 0 : i32
    return %arg0, %arg1, %c0_i32 : i32, i32, i32
  }
}

module attributes {stable_mosaic.version = 11 : i64} {
  func.func @_ln_linear_kernel(%arg0: i32, %arg1: memref<16x32xf32, #tpu.memory_space<vmem>>, %arg2: memref<1x32xf32, #tpu.memory_space<vmem>>, %arg3: memref<1x32xf32, #tpu.memory_space<vmem>>, %arg4: memref<32x32xbf16, #tpu.memory_space<vmem>>, %arg5: memref<1x32xf32, #tpu.memory_space<vmem>>, %arg6: memref<16x32xbf16, #tpu.memory_space<vmem>>) attributes {dimension_semantics = [#tpu.dimension_semantics<parallel>], iteration_bounds = array<i64: 1>, scalar_prefetch = 0 : i64, scratch_operands = 0 : i64, tpu.core_type = #tpu.core_type<tc>, window_params = [{transform_indices = @transform_0, window_bounds = array<i64: 16, 32>}, {pipeline_mode = #tpu.pipeline_mode<synchronous>, transform_indices = @transform_1, window_bounds = array<i64: 1, 32>}, {pipeline_mode = #tpu.pipeline_mode<synchronous>, transform_indices = @transform_2, window_bounds = array<i64: 1, 32>}, {pipeline_mode = #tpu.pipeline_mode<synchronous>, transform_indices = @transform_3, window_bounds = array<i64: 32, 32>}, {pipeline_mode = #tpu.pipeline_mode<synchronous>, transform_indices = @transform_4, window_bounds = array<i64: 1, 32>}, {transform_indices = @transform_5, window_bounds = array<i64: 16, 32>}]} {
    %c0 = arith.constant 0 : index
    %c0_0 = arith.constant 0 : index
    %0 = vector.load %arg1[%c0, %c0_0] : memref<16x32xf32, #tpu.memory_space<vmem>>, vector<16x32xf32>
    %c0_1 = arith.constant 0 : index
    %c0_2 = arith.constant 0 : index
    %1 = vector.load %arg2[%c0_1, %c0_2] : memref<1x32xf32, #tpu.memory_space<vmem>>, vector<1x32xf32>
    %c0_3 = arith.constant 0 : index
    %c0_4 = arith.constant 0 : index
    %2 = vector.load %arg3[%c0_3, %c0_4] : memref<1x32xf32, #tpu.memory_space<vmem>>, vector<1x32xf32>
    %cst = arith.constant dense<0.000000e+00> : vector<16xf32>
    %3 = vector.multi_reduction <add>, %0, %cst [1] : vector<16x32xf32> to vector<16xf32>
    %4 = vector.shape_cast %3 : vector<16xf32> to vector<16x1xf32>
    %cst_5 = arith.constant 3.200000e+01 : f32
    %5 = vector.broadcast %cst_5 : f32 to vector<16x1xf32>
    %6 = arith.divf %4, %5 : vector<16x1xf32>
    %7 = vector.broadcast %6 : vector<16x1xf32> to vector<16x32xf32>
    %8 = arith.subf %0, %7 : vector<16x32xf32>
    %9 = arith.mulf %8, %8 : vector<16x32xf32>
    %cst_6 = arith.constant dense<0.000000e+00> : vector<16xf32>
    %10 = vector.multi_reduction <add>, %9, %cst_6 [1] : vector<16x32xf32> to vector<16xf32>
    %11 = vector.shape_cast %10 : vector<16xf32> to vector<16x1xf32>
    %cst_7 = arith.constant 3.200000e+01 : f32
    %12 = vector.broadcast %cst_7 : f32 to vector<16x1xf32>
    %13 = arith.divf %11, %12 : vector<16x1xf32>
    %14 = vector.broadcast %6 : vector<16x1xf32> to vector<16x32xf32>
    %15 = arith.subf %0, %14 : vector<16x32xf32>
    %cst_8 = arith.constant 9.99999974E-6 : f32
    %16 = vector.broadcast %cst_8 : f32 to vector<16x1xf32>
    %17 = arith.addf %13, %16 : vector<16x1xf32>
    %18 = math.rsqrt %17 : vector<16x1xf32>
    %19 = vector.broadcast %18 : vector<16x1xf32> to vector<16x32xf32>
    %20 = arith.mulf %15, %19 : vector<16x32xf32>
    %21 = vector.broadcast %1 : vector<1x32xf32> to vector<16x32xf32>
    %22 = arith.mulf %20, %21 : vector<16x32xf32>
    %23 = vector.broadcast %2 : vector<1x32xf32> to vector<16x32xf32>
    %24 = arith.addf %22, %23 : vector<16x32xf32>
    %25 = arith.truncf %24 : vector<16x32xf32> to vector<16x32xbf16>
    %c0_9 = arith.constant 0 : index
    %c0_10 = arith.constant 0 : index
    %26 = vector.load %arg4[%c0_9, %c0_10] : memref<32x32xbf16, #tpu.memory_space<vmem>>, vector<32x32xbf16>
    %cst_11 = arith.constant dense<0.000000e+00> : vector<16x32xf32>
    %27 = tpu.matmul %25, %26, %cst_11 {dimension_numbers = #tpu.dot_dimension_numbers<[1], [0], [0], [1], [0, 0, 1, 1], [], []>} : vector<16x32xbf16>, vector<32x32xbf16>, vector<16x32xf32> -> vector<16x32xf32>
    %c0_12 = arith.constant 0 : index
    %c0_13 = arith.constant 0 : index
    %28 = vector.load %arg5[%c0_12, %c0_13] : memref<1x32xf32, #tpu.memory_space<vmem>>, vector<1x32xf32>
    %29 = vector.broadcast %28 : vector<1x32xf32> to vector<16x32xf32>
    %30 = arith.addf %27, %29 : vector<16x32xf32>
    %31 = arith.truncf %30 : vector<16x32xf32> to vector<16x32xbf16>
    %c0_14 = arith.constant 0 : index
    %c0_15 = arith.constant 0 : index
    %32 = vector.load %arg6[%c0_14, %c0_15] : memref<16x32xbf16, #tpu.memory_space<vmem>>, vector<16x32xbf16>
    tpu.vector_store %arg6[%c0_14, %c0_15], %31 {strides = array<i32>} : memref<16x32xbf16, #tpu.memory_space<vmem>>, vector<16x32xbf16>,
    return
  }
  func.func @transform_0(%arg0: i32) -> (i32, i32) {
    %c0_i32 = arith.constant 0 : i32
    %c0_i32_0 = arith.constant 0 : i32
    return %arg0, %c0_i32 : i32, i32
  }
  func.func @transform_1(%arg0: i32) -> (i32, i32) {
    %c0_i32 = arith.constant 0 : i32
    %c0_i32_0 = arith.constant 0 : i32
    %c0_i32_1 = arith.constant 0 : i32
    return %c0_i32, %c0_i32_0 : i32, i32
  }
  func.func @transform_2(%arg0: i32) -> (i32, i32) {
    %c0_i32 = arith.constant 0 : i32
    %c0_i32_0 = arith.constant 0 : i32
    %c0_i32_1 = arith.constant 0 : i32
    return %c0_i32, %c0_i32_0 : i32, i32
  }
  func.func @transform_3(%arg0: i32) -> (i32, i32) {
    %c0_i32 = arith.constant 0 : i32
    %c0_i32_0 = arith.constant 0 : i32
    %c0_i32_1 = arith.constant 0 : i32
    return %c0_i32, %c0_i32_0 : i32, i32
  }
  func.func @transform_4(%arg0: i32) -> (i32, i32) {
    %c0_i32 = arith.constant 0 : i32
    %c0_i32_0 = arith.constant 0 : i32
    %c0_i32_1 = arith.constant 0 : i32
    return %c0_i32, %c0_i32_0 : i32, i32
  }
  func.func @transform_5(%arg0: i32) -> (i32, i32) {
    %c0_i32 = arith.constant 0 : i32
    %c0_i32_0 = arith.constant 0 : i32
    return %arg0, %c0_i32 : i32, i32
  }
}

module attributes {stable_mosaic.version = 11 : i64} {
  func.func @_kv_kernel(%arg0: i32, %arg1: memref<16x32xbf16, #tpu.memory_space<vmem>>, %arg2: memref<32x64xbf16, #tpu.memory_space<vmem>>, %arg3: memref<1x64xf32, #tpu.memory_space<vmem>>, %arg4: memref<16x32xbf16, #tpu.memory_space<vmem>>, %arg5: memref<16x32xbf16, #tpu.memory_space<vmem>>) attributes {dimension_semantics = [#tpu.dimension_semantics<parallel>], iteration_bounds = array<i64: 1>, scalar_prefetch = 0 : i64, scratch_operands = 0 : i64, tpu.core_type = #tpu.core_type<tc>, window_params = [{transform_indices = @transform_0, window_bounds = array<i64: 16, 32>}, {pipeline_mode = #tpu.pipeline_mode<synchronous>, transform_indices = @transform_1, window_bounds = array<i64: 32, 64>}, {pipeline_mode = #tpu.pipeline_mode<synchronous>, transform_indices = @transform_2, window_bounds = array<i64: 1, 64>}, {transform_indices = @transform_3, window_bounds = array<i64: 16, 32>}, {transform_indices = @transform_4, window_bounds = array<i64: 16, 32>}]} {
    %c0 = arith.constant 0 : index
    %c0_0 = arith.constant 0 : index
    %0 = vector.load %arg1[%c0, %c0_0] : memref<16x32xbf16, #tpu.memory_space<vmem>>, vector<16x32xbf16>
    %c0_1 = arith.constant 0 : index
    %c0_2 = arith.constant 0 : index
    %1 = vector.load %arg2[%c0_1, %c0_2] : memref<32x64xbf16, #tpu.memory_space<vmem>>, vector<32x64xbf16>
    %cst = arith.constant dense<0.000000e+00> : vector<16x64xf32>
    %2 = tpu.matmul %0, %1, %cst {dimension_numbers = #tpu.dot_dimension_numbers<[1], [0], [0], [1], [0, 0, 1, 1], [], []>} : vector<16x32xbf16>, vector<32x64xbf16>, vector<16x64xf32> -> vector<16x64xf32>
    %c0_3 = arith.constant 0 : index
    %c0_4 = arith.constant 0 : index
    %3 = vector.load %arg3[%c0_3, %c0_4] : memref<1x64xf32, #tpu.memory_space<vmem>>, vector<1x64xf32>
    %4 = vector.broadcast %3 : vector<1x64xf32> to vector<16x64xf32>
    %5 = arith.addf %2, %4 : vector<16x64xf32>
    %6 = vector.extract_strided_slice %5 {offsets = [0, 0], sizes = [16, 32], strides = [1, 1]} : vector<16x64xf32> to vector<16x32xf32>
    %7 = arith.truncf %6 : vector<16x32xf32> to vector<16x32xbf16>
    %c0_5 = arith.constant 0 : index
    %c0_6 = arith.constant 0 : index
    %8 = vector.load %arg4[%c0_5, %c0_6] : memref<16x32xbf16, #tpu.memory_space<vmem>>, vector<16x32xbf16>
    tpu.vector_store %arg4[%c0_5, %c0_6], %7 {strides = array<i32>} : memref<16x32xbf16, #tpu.memory_space<vmem>>, vector<16x32xbf16>,
    %9 = vector.extract_strided_slice %5 {offsets = [0, 32], sizes = [16, 32], strides = [1, 1]} : vector<16x64xf32> to vector<16x32xf32>
    %10 = arith.truncf %9 : vector<16x32xf32> to vector<16x32xbf16>
    %c0_7 = arith.constant 0 : index
    %c0_8 = arith.constant 0 : index
    %11 = vector.load %arg5[%c0_7, %c0_8] : memref<16x32xbf16, #tpu.memory_space<vmem>>, vector<16x32xbf16>
    tpu.vector_store %arg5[%c0_7, %c0_8], %10 {strides = array<i32>} : memref<16x32xbf16, #tpu.memory_space<vmem>>, vector<16x32xbf16>,
    return
  }
  func.func @transform_0(%arg0: i32) -> (i32, i32) {
    %c0_i32 = arith.constant 0 : i32
    %c0_i32_0 = arith.constant 0 : i32
    return %arg0, %c0_i32 : i32, i32
  }
  func.func @transform_1(%arg0: i32) -> (i32, i32) {
    %c0_i32 = arith.constant 0 : i32
    %c0_i32_0 = arith.constant 0 : i32
    %c0_i32_1 = arith.constant 0 : i32
    return %c0_i32, %c0_i32_0 : i32, i32
  }
  func.func @transform_2(%arg0: i32) -> (i32, i32) {
    %c0_i32 = arith.constant 0 : i32
    %c0_i32_0 = arith.constant 0 : i32
    %c0_i32_1 = arith.constant 0 : i32
    return %c0_i32, %c0_i32_0 : i32, i32
  }
  func.func @transform_3(%arg0: i32) -> (i32, i32) {
    %c0_i32 = arith.constant 0 : i32
    %c0_i32_0 = arith.constant 0 : i32
    return %arg0, %c0_i32 : i32, i32
  }
  func.func @transform_4(%arg0: i32) -> (i32, i32) {
    %c0_i32 = arith.constant 0 : i32
    %c0_i32_0 = arith.constant 0 : i32
    return %arg0, %c0_i32 : i32, i32
  }
}

module attributes {stable_mosaic.version = 11 : i64} {
  func.func @_ffn_kernel(%arg0: i32, %arg1: memref<16x32xf32, #tpu.memory_space<vmem>>, %arg2: memref<1x32xf32, #tpu.memory_space<vmem>>, %arg3: memref<1x32xf32, #tpu.memory_space<vmem>>, %arg4: memref<32x2048xbf16, #tpu.memory_space<vmem>>, %arg5: memref<1x2048xf32, #tpu.memory_space<vmem>>, %arg6: memref<2048x32xbf16, #tpu.memory_space<vmem>>, %arg7: memref<1x32xf32, #tpu.memory_space<vmem>>, %arg8: memref<16x32xf32, #tpu.memory_space<vmem>>) attributes {dimension_semantics = [#tpu.dimension_semantics<parallel>], iteration_bounds = array<i64: 1>, scalar_prefetch = 0 : i64, scratch_operands = 0 : i64, tpu.core_type = #tpu.core_type<tc>, window_params = [{transform_indices = @transform_0, window_bounds = array<i64: 16, 32>}, {pipeline_mode = #tpu.pipeline_mode<synchronous>, transform_indices = @transform_1, window_bounds = array<i64: 1, 32>}, {pipeline_mode = #tpu.pipeline_mode<synchronous>, transform_indices = @transform_2, window_bounds = array<i64: 1, 32>}, {pipeline_mode = #tpu.pipeline_mode<synchronous>, transform_indices = @transform_3, window_bounds = array<i64: 32, 2048>}, {pipeline_mode = #tpu.pipeline_mode<synchronous>, transform_indices = @transform_4, window_bounds = array<i64: 1, 2048>}, {pipeline_mode = #tpu.pipeline_mode<synchronous>, transform_indices = @transform_5, window_bounds = array<i64: 2048, 32>}, {pipeline_mode = #tpu.pipeline_mode<synchronous>, transform_indices = @transform_6, window_bounds = array<i64: 1, 32>}, {transform_indices = @transform_7, window_bounds = array<i64: 16, 32>}]} {
    %c0 = arith.constant 0 : index
    %c0_0 = arith.constant 0 : index
    %0 = vector.load %arg1[%c0, %c0_0] : memref<16x32xf32, #tpu.memory_space<vmem>>, vector<16x32xf32>
    %c0_1 = arith.constant 0 : index
    %c0_2 = arith.constant 0 : index
    %1 = vector.load %arg2[%c0_1, %c0_2] : memref<1x32xf32, #tpu.memory_space<vmem>>, vector<1x32xf32>
    %c0_3 = arith.constant 0 : index
    %c0_4 = arith.constant 0 : index
    %2 = vector.load %arg3[%c0_3, %c0_4] : memref<1x32xf32, #tpu.memory_space<vmem>>, vector<1x32xf32>
    %cst = arith.constant dense<0.000000e+00> : vector<16xf32>
    %3 = vector.multi_reduction <add>, %0, %cst [1] : vector<16x32xf32> to vector<16xf32>
    %4 = vector.shape_cast %3 : vector<16xf32> to vector<16x1xf32>
    %cst_5 = arith.constant 3.200000e+01 : f32
    %5 = vector.broadcast %cst_5 : f32 to vector<16x1xf32>
    %6 = arith.divf %4, %5 : vector<16x1xf32>
    %7 = vector.broadcast %6 : vector<16x1xf32> to vector<16x32xf32>
    %8 = arith.subf %0, %7 : vector<16x32xf32>
    %9 = arith.mulf %8, %8 : vector<16x32xf32>
    %cst_6 = arith.constant dense<0.000000e+00> : vector<16xf32>
    %10 = vector.multi_reduction <add>, %9, %cst_6 [1] : vector<16x32xf32> to vector<16xf32>
    %11 = vector.shape_cast %10 : vector<16xf32> to vector<16x1xf32>
    %cst_7 = arith.constant 3.200000e+01 : f32
    %12 = vector.broadcast %cst_7 : f32 to vector<16x1xf32>
    %13 = arith.divf %11, %12 : vector<16x1xf32>
    %14 = vector.broadcast %6 : vector<16x1xf32> to vector<16x32xf32>
    %15 = arith.subf %0, %14 : vector<16x32xf32>
    %cst_8 = arith.constant 9.99999974E-6 : f32
    %16 = vector.broadcast %cst_8 : f32 to vector<16x1xf32>
    %17 = arith.addf %13, %16 : vector<16x1xf32>
    %18 = math.rsqrt %17 : vector<16x1xf32>
    %19 = vector.broadcast %18 : vector<16x1xf32> to vector<16x32xf32>
    %20 = arith.mulf %15, %19 : vector<16x32xf32>
    %21 = vector.broadcast %1 : vector<1x32xf32> to vector<16x32xf32>
    %22 = arith.mulf %20, %21 : vector<16x32xf32>
    %23 = vector.broadcast %2 : vector<1x32xf32> to vector<16x32xf32>
    %24 = arith.addf %22, %23 : vector<16x32xf32>
    %25 = arith.truncf %24 : vector<16x32xf32> to vector<16x32xbf16>
    %c0_9 = arith.constant 0 : index
    %c0_10 = arith.constant 0 : index
    %26 = vector.load %arg4[%c0_9, %c0_10] : memref<32x2048xbf16, #tpu.memory_space<vmem>>, vector<32x2048xbf16>
    %cst_11 = arith.constant dense<0.000000e+00> : vector<16x2048xf32>
    %27 = tpu.matmul %25, %26, %cst_11 {dimension_numbers = #tpu.dot_dimension_numbers<[1], [0], [0], [1], [0, 0, 1, 1], [], []>} : vector<16x32xbf16>, vector<32x2048xbf16>, vector<16x2048xf32> -> vector<16x2048xf32>
    %c0_12 = arith.constant 0 : index
    %c0_13 = arith.constant 0 : index
    %28 = vector.load %arg5[%c0_12, %c0_13] : memref<1x2048xf32, #tpu.memory_space<vmem>>, vector<1x2048xf32>
    %29 = vector.broadcast %28 : vector<1x2048xf32> to vector<16x2048xf32>
    %30 = arith.addf %27, %29 : vector<16x2048xf32>
    %cst_14 = arith.constant 0.000000e+00 : f32
    %31 = vector.broadcast %cst_14 : f32 to vector<16x2048xf32>
    %32 = arith.maximumf %30, %31 : vector<16x2048xf32>
    %33 = arith.truncf %32 : vector<16x2048xf32> to vector<16x2048xbf16>
    %c0_15 = arith.constant 0 : index
    %c0_16 = arith.constant 0 : index
    %34 = vector.load %arg6[%c0_15, %c0_16] : memref<2048x32xbf16, #tpu.memory_space<vmem>>, vector<2048x32xbf16>
    %cst_17 = arith.constant dense<0.000000e+00> : vector<16x32xf32>
    %35 = tpu.matmul %33, %34, %cst_17 {dimension_numbers = #tpu.dot_dimension_numbers<[1], [0], [0], [1], [0, 0, 1, 1], [], []>} : vector<16x2048xbf16>, vector<2048x32xbf16>, vector<16x32xf32> -> vector<16x32xf32>
    %c0_18 = arith.constant 0 : index
    %c0_19 = arith.constant 0 : index
    %36 = vector.load %arg7[%c0_18, %c0_19] : memref<1x32xf32, #tpu.memory_space<vmem>>, vector<1x32xf32>
    %37 = vector.broadcast %36 : vector<1x32xf32> to vector<16x32xf32>
    %38 = arith.addf %35, %37 : vector<16x32xf32>
    %39 = arith.addf %38, %0 : vector<16x32xf32>
    %c0_20 = arith.constant 0 : index
    %c0_21 = arith.constant 0 : index
    %40 = vector.load %arg8[%c0_20, %c0_21] : memref<16x32xf32, #tpu.memory_space<vmem>>, vector<16x32xf32>
    tpu.vector_store %arg8[%c0_20, %c0_21], %39 {strides = array<i32>} : memref<16x32xf32, #tpu.memory_space<vmem>>, vector<16x32xf32>,
    return
  }
  func.func @transform_0(%arg0: i32) -> (i32, i32) {
    %c0_i32 = arith.constant 0 : i32
    %c0_i32_0 = arith.constant 0 : i32
    return %arg0, %c0_i32 : i32, i32
  }
  func.func @transform_1(%arg0: i32) -> (i32, i32) {
    %c0_i32 = arith.constant 0 : i32
    %c0_i32_0 = arith.constant 0 : i32
    %c0_i32_1 = arith.constant 0 : i32
    return %c0_i32, %c0_i32_0 : i32, i32
  }
  func.func @transform_2(%arg0: i32) -> (i32, i32) {
    %c0_i32 = arith.constant 0 : i32
    %c0_i32_0 = arith.constant 0 : i32
    %c0_i32_1 = arith.constant 0 : i32
    return %c0_i32, %c0_i32_0 : i32, i32
  }
  func.func @transform_3(%arg0: i32) -> (i32, i32) {
    %c0_i32 = arith.constant 0 : i32
    %c0_i32_0 = arith.constant 0 : i32
    %c0_i32_1 = arith.constant 0 : i32
    return %c0_i32, %c0_i32_0 : i32, i32
  }
  func.func @transform_4(%arg0: i32) -> (i32, i32) {
    %c0_i32 = arith.constant 0 : i32
    %c0_i32_0 = arith.constant 0 : i32
    %c0_i32_1 = arith.constant 0 : i32
    return %c0_i32, %c0_i32_0 : i32, i32
  }
  func.func @transform_5(%arg0: i32) -> (i32, i32) {
    %c0_i32 = arith.constant 0 : i32
    %c0_i32_0 = arith.constant 0 : i32
    %c0_i32_1 = arith.constant 0 : i32
    return %c0_i32, %c0_i32_0 : i32, i32
  }
  func.func @transform_6(%arg0: i32) -> (i32, i32) {
    %c0_i32 = arith.constant 0 : i32
    %c0_i32_0 = arith.constant 0 : i32
    %c0_i32_1 = arith.constant 0 : i32
    return %c0_i32, %c0_i32_0 : i32, i32
  }
  func.func @transform_7(%arg0: i32) -> (i32, i32) {
    %c0_i32 = arith.constant 0 : i32
    %c0_i32_0 = arith.constant 0 : i32
    return %arg0, %c0_i32 : i32, i32
  }
}

module attributes {stable_mosaic.version = 11 : i64} {
  func.func @_mha_kernel(%arg0: i32, %arg1: i32, %arg2: memref<1x8x32xbf16, #tpu.memory_space<vmem>>, %arg3: memref<1x8x32xbf16, #tpu.memory_space<vmem>>, %arg4: memref<1x8x32xbf16, #tpu.memory_space<vmem>>, %arg5: memref<1x1x8xbf16, #tpu.memory_space<vmem>>, %arg6: memref<1x8x32xbf16, #tpu.memory_space<vmem>>) attributes {dimension_semantics = [#tpu.dimension_semantics<parallel>, #tpu.dimension_semantics<parallel>], iteration_bounds = array<i64: 2, 1>, scalar_prefetch = 0 : i64, scratch_operands = 0 : i64, tpu.core_type = #tpu.core_type<tc>, window_params = [{transform_indices = @transform_0, window_bounds = array<i64: 1, 8, 32>}, {transform_indices = @transform_1, window_bounds = array<i64: 1, 8, 32>}, {transform_indices = @transform_2, window_bounds = array<i64: 1, 8, 32>}, {transform_indices = @transform_3, window_bounds = array<i64: 1, 1, 8>}, {transform_indices = @transform_4, window_bounds = array<i64: 1, 8, 32>}]} {
    %c0 = arith.constant 0 : index
    %c0_0 = arith.constant 0 : index
    %c0_1 = arith.constant 0 : index
    %0 = vector.load %arg2[%c0, %c0_0, %c0_1] : memref<1x8x32xbf16, #tpu.memory_space<vmem>>, vector<1x8x32xbf16>
    %1 = vector.shape_cast %0 : vector<1x8x32xbf16> to vector<8x32xbf16>
    %c0_2 = arith.constant 0 : index
    %c0_3 = arith.constant 0 : index
    %c0_4 = arith.constant 0 : index
    %2 = vector.load %arg3[%c0_2, %c0_3, %c0_4] : memref<1x8x32xbf16, #tpu.memory_space<vmem>>, vector<1x8x32xbf16>
    %3 = vector.shape_cast %2 : vector<1x8x32xbf16> to vector<8x32xbf16>
    %c0_5 = arith.constant 0 : index
    %c0_6 = arith.constant 0 : index
    %c0_7 = arith.constant 0 : index
    %4 = vector.load %arg4[%c0_5, %c0_6, %c0_7] : memref<1x8x32xbf16, #tpu.memory_space<vmem>>, vector<1x8x32xbf16>
    %5 = vector.shape_cast %4 : vector<1x8x32xbf16> to vector<8x32xbf16>
    %c0_8 = arith.constant 0 : index
    %c0_9 = arith.constant 0 : index
    %c0_10 = arith.constant 0 : index
    %6 = vector.load %arg5[%c0_8, %c0_9, %c0_10] : memref<1x1x8xbf16, #tpu.memory_space<vmem>>, vector<1x1x8xbf16>
    %7 = vector.shape_cast %6 : vector<1x1x8xbf16> to vector<1x8xbf16>
    %8 = arith.extf %7 : vector<1x8xbf16> to vector<1x8xf32>
    %cst = arith.constant 0.000000e+00 : f32
    %9 = vector.broadcast %cst : f32 to vector<1x8xf32>
    %10 = arith.cmpf oeq, %8, %9 : vector<1x8xf32>
    %cst_11 = arith.constant -1.000000e+09 : f32
    %cst_12 = arith.constant 0.000000e+00 : f32
    %11 = vector.broadcast %cst_11 : f32 to vector<1x8xf32>
    %12 = vector.broadcast %cst_12 : f32 to vector<1x8xf32>
    %13 = arith.select %10, %11, %12 : vector<1x8xi1>, vector<1x8xf32>
    %14 = vector.extract_strided_slice %1 {offsets = [0, 0], sizes = [8, 8], strides = [1, 1]} : vector<8x32xbf16> to vector<8x8xbf16>
    %15 = vector.extract_strided_slice %3 {offsets = [0, 0], sizes = [8, 8], strides = [1, 1]} : vector<8x32xbf16> to vector<8x8xbf16>
    %cst_13 = arith.constant dense<0.000000e+00> : vector<8x8xf32>
    %16 = tpu.matmul %14, %15, %cst_13 {dimension_numbers = #tpu.dot_dimension_numbers<[1], [1], [0], [0], [0, 0, 1, 0], [], []>} : vector<8x8xbf16>, vector<8x8xbf16>, vector<8x8xf32> -> vector<8x8xf32>
    %cst_14 = arith.constant 0.353553385 : f32
    %17 = vector.broadcast %cst_14 : f32 to vector<8x8xf32>
    %18 = arith.mulf %16, %17 : vector<8x8xf32>
    %19 = vector.broadcast %13 : vector<1x8xf32> to vector<8x8xf32>
    %20 = arith.addf %18, %19 : vector<8x8xf32>
    %cst_15 = arith.constant dense<0xFF800000> : vector<8xf32>
    %21 = vector.multi_reduction <maximumf>, %20, %cst_15 [1] : vector<8x8xf32> to vector<8xf32>
    %22 = vector.shape_cast %21 : vector<8xf32> to vector<8x1xf32>
    %23 = vector.broadcast %22 : vector<8x1xf32> to vector<8x8xf32>
    %24 = arith.subf %20, %23 : vector<8x8xf32>
    %25 = math.exp %24 : vector<8x8xf32>
    %cst_16 = arith.constant dense<0.000000e+00> : vector<8xf32>
    %26 = vector.multi_reduction <add>, %25, %cst_16 [1] : vector<8x8xf32> to vector<8xf32>
    %27 = vector.shape_cast %26 : vector<8xf32> to vector<8x1xf32>
    %28 = vector.broadcast %27 : vector<8x1xf32> to vector<8x8xf32>
    %29 = arith.divf %25, %28 : vector<8x8xf32>
    %30 = arith.truncf %29 : vector<8x8xf32> to vector<8x8xbf16>
    %31 = vector.extract_strided_slice %5 {offsets = [0, 0], sizes = [8, 8], strides = [1, 1]} : vector<8x32xbf16> to vector<8x8xbf16>
    %cst_17 = arith.constant dense<0.000000e+00> : vector<8x8xf32>
    %32 = tpu.matmul %30, %31, %cst_17 {dimension_numbers = #tpu.dot_dimension_numbers<[1], [0], [0], [1], [0, 0, 1, 1], [], []>} : vector<8x8xbf16>, vector<8x8xbf16>, vector<8x8xf32> -> vector<8x8xf32>
    %33 = arith.truncf %32 : vector<8x8xf32> to vector<8x8xbf16>
    %c0_18 = arith.constant 0 : index
    %c0_19 = arith.constant 0 : index
    %c0_20 = arith.constant 0 : index
    %34 = vector.load %arg6[%c0_18, %c0_19, %c0_20] : memref<1x8x32xbf16, #tpu.memory_space<vmem>>, vector<1x8x8xbf16>
    %35 = vector.shape_cast %34 : vector<1x8x8xbf16> to vector<8x8xbf16>
    %36 = vector.shape_cast %33 : vector<8x8xbf16> to vector<1x8x8xbf16>
    tpu.vector_store %arg6[%c0_18, %c0_19, %c0_20], %36 {strides = array<i32>} : memref<1x8x32xbf16, #tpu.memory_space<vmem>>, vector<1x8x8xbf16>,
    %37 = vector.extract_strided_slice %1 {offsets = [0, 8], sizes = [8, 8], strides = [1, 1]} : vector<8x32xbf16> to vector<8x8xbf16>
    %38 = vector.extract_strided_slice %3 {offsets = [0, 8], sizes = [8, 8], strides = [1, 1]} : vector<8x32xbf16> to vector<8x8xbf16>
    %cst_21 = arith.constant dense<0.000000e+00> : vector<8x8xf32>
    %39 = tpu.matmul %37, %38, %cst_21 {dimension_numbers = #tpu.dot_dimension_numbers<[1], [1], [0], [0], [0, 0, 1, 0], [], []>} : vector<8x8xbf16>, vector<8x8xbf16>, vector<8x8xf32> -> vector<8x8xf32>
    %cst_22 = arith.constant 0.353553385 : f32
    %40 = vector.broadcast %cst_22 : f32 to vector<8x8xf32>
    %41 = arith.mulf %39, %40 : vector<8x8xf32>
    %42 = vector.broadcast %13 : vector<1x8xf32> to vector<8x8xf32>
    %43 = arith.addf %41, %42 : vector<8x8xf32>
    %cst_23 = arith.constant dense<0xFF800000> : vector<8xf32>
    %44 = vector.multi_reduction <maximumf>, %43, %cst_23 [1] : vector<8x8xf32> to vector<8xf32>
    %45 = vector.shape_cast %44 : vector<8xf32> to vector<8x1xf32>
    %46 = vector.broadcast %45 : vector<8x1xf32> to vector<8x8xf32>
    %47 = arith.subf %43, %46 : vector<8x8xf32>
    %48 = math.exp %47 : vector<8x8xf32>
    %cst_24 = arith.constant dense<0.000000e+00> : vector<8xf32>
    %49 = vector.multi_reduction <add>, %48, %cst_24 [1] : vector<8x8xf32> to vector<8xf32>
    %50 = vector.shape_cast %49 : vector<8xf32> to vector<8x1xf32>
    %51 = vector.broadcast %50 : vector<8x1xf32> to vector<8x8xf32>
    %52 = arith.divf %48, %51 : vector<8x8xf32>
    %53 = arith.truncf %52 : vector<8x8xf32> to vector<8x8xbf16>
    %54 = vector.extract_strided_slice %5 {offsets = [0, 8], sizes = [8, 8], strides = [1, 1]} : vector<8x32xbf16> to vector<8x8xbf16>
    %cst_25 = arith.constant dense<0.000000e+00> : vector<8x8xf32>
    %55 = tpu.matmul %53, %54, %cst_25 {dimension_numbers = #tpu.dot_dimension_numbers<[1], [0], [0], [1], [0, 0, 1, 1], [], []>} : vector<8x8xbf16>, vector<8x8xbf16>, vector<8x8xf32> -> vector<8x8xf32>
    %56 = arith.truncf %55 : vector<8x8xf32> to vector<8x8xbf16>
    %c0_26 = arith.constant 0 : index
    %c0_27 = arith.constant 0 : index
    %c8 = arith.constant 8 : index
    %57 = vector.load %arg6[%c0_26, %c0_27, %c8] : memref<1x8x32xbf16, #tpu.memory_space<vmem>>, vector<1x8x8xbf16>
    %58 = vector.shape_cast %57 : vector<1x8x8xbf16> to vector<8x8xbf16>
    %59 = vector.shape_cast %56 : vector<8x8xbf16> to vector<1x8x8xbf16>
    tpu.vector_store %arg6[%c0_26, %c0_27, %c8], %59 {strides = array<i32>} : memref<1x8x32xbf16, #tpu.memory_space<vmem>>, vector<1x8x8xbf16>,
    %60 = vector.extract_strided_slice %1 {offsets = [0, 16], sizes = [8, 8], strides = [1, 1]} : vector<8x32xbf16> to vector<8x8xbf16>
    %61 = vector.extract_strided_slice %3 {offsets = [0, 16], sizes = [8, 8], strides = [1, 1]} : vector<8x32xbf16> to vector<8x8xbf16>
    %cst_28 = arith.constant dense<0.000000e+00> : vector<8x8xf32>
    %62 = tpu.matmul %60, %61, %cst_28 {dimension_numbers = #tpu.dot_dimension_numbers<[1], [1], [0], [0], [0, 0, 1, 0], [], []>} : vector<8x8xbf16>, vector<8x8xbf16>, vector<8x8xf32> -> vector<8x8xf32>
    %cst_29 = arith.constant 0.353553385 : f32
    %63 = vector.broadcast %cst_29 : f32 to vector<8x8xf32>
    %64 = arith.mulf %62, %63 : vector<8x8xf32>
    %65 = vector.broadcast %13 : vector<1x8xf32> to vector<8x8xf32>
    %66 = arith.addf %64, %65 : vector<8x8xf32>
    %cst_30 = arith.constant dense<0xFF800000> : vector<8xf32>
    %67 = vector.multi_reduction <maximumf>, %66, %cst_30 [1] : vector<8x8xf32> to vector<8xf32>
    %68 = vector.shape_cast %67 : vector<8xf32> to vector<8x1xf32>
    %69 = vector.broadcast %68 : vector<8x1xf32> to vector<8x8xf32>
    %70 = arith.subf %66, %69 : vector<8x8xf32>
    %71 = math.exp %70 : vector<8x8xf32>
    %cst_31 = arith.constant dense<0.000000e+00> : vector<8xf32>
    %72 = vector.multi_reduction <add>, %71, %cst_31 [1] : vector<8x8xf32> to vector<8xf32>
    %73 = vector.shape_cast %72 : vector<8xf32> to vector<8x1xf32>
    %74 = vector.broadcast %73 : vector<8x1xf32> to vector<8x8xf32>
    %75 = arith.divf %71, %74 : vector<8x8xf32>
    %76 = arith.truncf %75 : vector<8x8xf32> to vector<8x8xbf16>
    %77 = vector.extract_strided_slice %5 {offsets = [0, 16], sizes = [8, 8], strides = [1, 1]} : vector<8x32xbf16> to vector<8x8xbf16>
    %cst_32 = arith.constant dense<0.000000e+00> : vector<8x8xf32>
    %78 = tpu.matmul %76, %77, %cst_32 {dimension_numbers = #tpu.dot_dimension_numbers<[1], [0], [0], [1], [0, 0, 1, 1], [], []>} : vector<8x8xbf16>, vector<8x8xbf16>, vector<8x8xf32> -> vector<8x8xf32>
    %79 = arith.truncf %78 : vector<8x8xf32> to vector<8x8xbf16>
    %c0_33 = arith.constant 0 : index
    %c0_34 = arith.constant 0 : index
    %c16 = arith.constant 16 : index
    %80 = vector.load %arg6[%c0_33, %c0_34, %c16] : memref<1x8x32xbf16, #tpu.memory_space<vmem>>, vector<1x8x8xbf16>
    %81 = vector.shape_cast %80 : vector<1x8x8xbf16> to vector<8x8xbf16>
    %82 = vector.shape_cast %79 : vector<8x8xbf16> to vector<1x8x8xbf16>
    tpu.vector_store %arg6[%c0_33, %c0_34, %c16], %82 {strides = array<i32>} : memref<1x8x32xbf16, #tpu.memory_space<vmem>>, vector<1x8x8xbf16>,
    %83 = vector.extract_strided_slice %1 {offsets = [0, 24], sizes = [8, 8], strides = [1, 1]} : vector<8x32xbf16> to vector<8x8xbf16>
    %84 = vector.extract_strided_slice %3 {offsets = [0, 24], sizes = [8, 8], strides = [1, 1]} : vector<8x32xbf16> to vector<8x8xbf16>
    %cst_35 = arith.constant dense<0.000000e+00> : vector<8x8xf32>
    %85 = tpu.matmul %83, %84, %cst_35 {dimension_numbers = #tpu.dot_dimension_numbers<[1], [1], [0], [0], [0, 0, 1, 0], [], []>} : vector<8x8xbf16>, vector<8x8xbf16>, vector<8x8xf32> -> vector<8x8xf32>
    %cst_36 = arith.constant 0.353553385 : f32
    %86 = vector.broadcast %cst_36 : f32 to vector<8x8xf32>
    %87 = arith.mulf %85, %86 : vector<8x8xf32>
    %88 = vector.broadcast %13 : vector<1x8xf32> to vector<8x8xf32>
    %89 = arith.addf %87, %88 : vector<8x8xf32>
    %cst_37 = arith.constant dense<0xFF800000> : vector<8xf32>
    %90 = vector.multi_reduction <maximumf>, %89, %cst_37 [1] : vector<8x8xf32> to vector<8xf32>
    %91 = vector.shape_cast %90 : vector<8xf32> to vector<8x1xf32>
    %92 = vector.broadcast %91 : vector<8x1xf32> to vector<8x8xf32>
    %93 = arith.subf %89, %92 : vector<8x8xf32>
    %94 = math.exp %93 : vector<8x8xf32>
    %cst_38 = arith.constant dense<0.000000e+00> : vector<8xf32>
    %95 = vector.multi_reduction <add>, %94, %cst_38 [1] : vector<8x8xf32> to vector<8xf32>
    %96 = vector.shape_cast %95 : vector<8xf32> to vector<8x1xf32>
    %97 = vector.broadcast %96 : vector<8x1xf32> to vector<8x8xf32>
    %98 = arith.divf %94, %97 : vector<8x8xf32>
    %99 = arith.truncf %98 : vector<8x8xf32> to vector<8x8xbf16>
    %100 = vector.extract_strided_slice %5 {offsets = [0, 24], sizes = [8, 8], strides = [1, 1]} : vector<8x32xbf16> to vector<8x8xbf16>
    %cst_39 = arith.constant dense<0.000000e+00> : vector<8x8xf32>
    %101 = tpu.matmul %99, %100, %cst_39 {dimension_numbers = #tpu.dot_dimension_numbers<[1], [0], [0], [1], [0, 0, 1, 1], [], []>} : vector<8x8xbf16>, vector<8x8xbf16>, vector<8x8xf32> -> vector<8x8xf32>
    %102 = arith.truncf %101 : vector<8x8xf32> to vector<8x8xbf16>
    %c0_40 = arith.constant 0 : index
    %c0_41 = arith.constant 0 : index
    %c24 = arith.constant 24 : index
    %103 = vector.load %arg6[%c0_40, %c0_41, %c24] : memref<1x8x32xbf16, #tpu.memory_space<vmem>>, vector<1x8x8xbf16>
    %104 = vector.shape_cast %103 : vector<1x8x8xbf16> to vector<8x8xbf16>
    %105 = vector.shape_cast %102 : vector<8x8xbf16> to vector<1x8x8xbf16>
    tpu.vector_store %arg6[%c0_40, %c0_41, %c24], %105 {strides = array<i32>} : memref<1x8x32xbf16, #tpu.memory_space<vmem>>, vector<1x8x8xbf16>,
    return
  }
  func.func @transform_0(%arg0: i32, %arg1: i32) -> (i32, i32, i32) {
    %c0_i32 = arith.constant 0 : i32
    %c0_i32_0 = arith.constant 0 : i32
    return %arg0, %arg1, %c0_i32 : i32, i32, i32
  }
  func.func @transform_1(%arg0: i32, %arg1: i32) -> (i32, i32, i32) {
    %c0_i32 = arith.constant 0 : i32
    %c0_i32_0 = arith.constant 0 : i32
    %c0_i32_1 = arith.constant 0 : i32
    return %arg0, %c0_i32, %c0_i32_0 : i32, i32, i32
  }
  func.func @transform_2(%arg0: i32, %arg1: i32) -> (i32, i32, i32) {
    %c0_i32 = arith.constant 0 : i32
    %c0_i32_0 = arith.constant 0 : i32
    %c0_i32_1 = arith.constant 0 : i32
    return %arg0, %c0_i32, %c0_i32_0 : i32, i32, i32
  }
  func.func @transform_3(%arg0: i32, %arg1: i32) -> (i32, i32, i32) {
    %c0_i32 = arith.constant 0 : i32
    %c0_i32_0 = arith.constant 0 : i32
    %c0_i32_1 = arith.constant 0 : i32
    return %arg0, %c0_i32, %c0_i32_0 : i32, i32, i32
  }
  func.func @transform_4(%arg0: i32, %arg1: i32) -> (i32, i32, i32) {
    %c0_i32 = arith.constant 0 : i32
    %c0_i32_0 = arith.constant 0 : i32
    return %arg0, %arg1, %c0_i32 : i32, i32, i32
  }
}

module attributes {stable_mosaic.version = 11 : i64} {
  func.func @_layernorm_kernel(%arg0: i32, %arg1: memref<16x32xf32, #tpu.memory_space<vmem>>, %arg2: memref<1x32xf32, #tpu.memory_space<vmem>>, %arg3: memref<1x32xf32, #tpu.memory_space<vmem>>, %arg4: memref<16x32xf32, #tpu.memory_space<vmem>>) attributes {dimension_semantics = [#tpu.dimension_semantics<parallel>], iteration_bounds = array<i64: 1>, scalar_prefetch = 0 : i64, scratch_operands = 0 : i64, tpu.core_type = #tpu.core_type<tc>, window_params = [{transform_indices = @transform_0, window_bounds = array<i64: 16, 32>}, {pipeline_mode = #tpu.pipeline_mode<synchronous>, transform_indices = @transform_1, window_bounds = array<i64: 1, 32>}, {pipeline_mode = #tpu.pipeline_mode<synchronous>, transform_indices = @transform_2, window_bounds = array<i64: 1, 32>}, {transform_indices = @transform_3, window_bounds = array<i64: 16, 32>}]} {
    %c0 = arith.constant 0 : index
    %c0_0 = arith.constant 0 : index
    %0 = vector.load %arg1[%c0, %c0_0] : memref<16x32xf32, #tpu.memory_space<vmem>>, vector<16x32xf32>
    %c0_1 = arith.constant 0 : index
    %c0_2 = arith.constant 0 : index
    %1 = vector.load %arg2[%c0_1, %c0_2] : memref<1x32xf32, #tpu.memory_space<vmem>>, vector<1x32xf32>
    %c0_3 = arith.constant 0 : index
    %c0_4 = arith.constant 0 : index
    %2 = vector.load %arg3[%c0_3, %c0_4] : memref<1x32xf32, #tpu.memory_space<vmem>>, vector<1x32xf32>
    %cst = arith.constant dense<0.000000e+00> : vector<16xf32>
    %3 = vector.multi_reduction <add>, %0, %cst [1] : vector<16x32xf32> to vector<16xf32>
    %4 = vector.shape_cast %3 : vector<16xf32> to vector<16x1xf32>
    %cst_5 = arith.constant 3.200000e+01 : f32
    %5 = vector.broadcast %cst_5 : f32 to vector<16x1xf32>
    %6 = arith.divf %4, %5 : vector<16x1xf32>
    %7 = vector.broadcast %6 : vector<16x1xf32> to vector<16x32xf32>
    %8 = arith.subf %0, %7 : vector<16x32xf32>
    %9 = arith.mulf %8, %8 : vector<16x32xf32>
    %cst_6 = arith.constant dense<0.000000e+00> : vector<16xf32>
    %10 = vector.multi_reduction <add>, %9, %cst_6 [1] : vector<16x32xf32> to vector<16xf32>
    %11 = vector.shape_cast %10 : vector<16xf32> to vector<16x1xf32>
    %cst_7 = arith.constant 3.200000e+01 : f32
    %12 = vector.broadcast %cst_7 : f32 to vector<16x1xf32>
    %13 = arith.divf %11, %12 : vector<16x1xf32>
    %14 = vector.broadcast %6 : vector<16x1xf32> to vector<16x32xf32>
    %15 = arith.subf %0, %14 : vector<16x32xf32>
    %cst_8 = arith.constant 9.99999974E-6 : f32
    %16 = vector.broadcast %cst_8 : f32 to vector<16x1xf32>
    %17 = arith.addf %13, %16 : vector<16x1xf32>
    %18 = math.rsqrt %17 : vector<16x1xf32>
    %19 = vector.broadcast %18 : vector<16x1xf32> to vector<16x32xf32>
    %20 = arith.mulf %15, %19 : vector<16x32xf32>
    %21 = vector.broadcast %1 : vector<1x32xf32> to vector<16x32xf32>
    %22 = arith.mulf %20, %21 : vector<16x32xf32>
    %23 = vector.broadcast %2 : vector<1x32xf32> to vector<16x32xf32>
    %24 = arith.addf %22, %23 : vector<16x32xf32>
    %c0_9 = arith.constant 0 : index
    %c0_10 = arith.constant 0 : index
    %25 = vector.load %arg4[%c0_9, %c0_10] : memref<16x32xf32, #tpu.memory_space<vmem>>, vector<16x32xf32>
    tpu.vector_store %arg4[%c0_9, %c0_10], %24 {strides = array<i32>} : memref<16x32xf32, #tpu.memory_space<vmem>>, vector<16x32xf32>,
    return
  }
  func.func @transform_0(%arg0: i32) -> (i32, i32) {
    %c0_i32 = arith.constant 0 : i32
    %c0_i32_0 = arith.constant 0 : i32
    return %arg0, %c0_i32 : i32, i32
  }
  func.func @transform_1(%arg0: i32) -> (i32, i32) {
    %c0_i32 = arith.constant 0 : i32
    %c0_i32_0 = arith.constant 0 : i32
    %c0_i32_1 = arith.constant 0 : i32
    return %c0_i32, %c0_i32_0 : i32, i32
  }
  func.func @transform_2(%arg0: i32) -> (i32, i32) {
    %c0_i32 = arith.constant 0 : i32
    %c0_i32_0 = arith.constant 0 : i32
    %c0_i32_1 = arith.constant 0 : i32
    return %c0_i32, %c0_i32_0 : i32, i32
  }
  func.func @transform_3(%arg0: i32) -> (i32, i32) {
    %c0_i32 = arith.constant 0 : i32
    %c0_i32_0 = arith.constant 0 : i32
    return %arg0, %c0_i32 : i32, i32
  }
}

</mosaic_0001>

<bundles_post_ra>
// kernel: decoder_forward.17
= control target key start
LH: loop header
LB: loop body
LE: loop exit
PB: predicated region body
PF: predicated region fallthrough
CT: control target
= control target key end

     0   :  { %vm28_vm0 = vcmask 261120   ;;  %v210_v14 = vmov 0.0   ;;  %vm211_vm1 = vmmov 0   ;;  %vm148_vm2 = vcmask 257024   ;;  %s213_s14 = smov 96   ;;  %s304_s0 = inlined_call_operand.vmem [shape: f32[16,32], index: 0, kind: input, shape index: {}]   ;;  %s305_s3 = inlined_call_operand.vmem [shape: bf16[32,96], index: 3, kind: input, shape index: {}]   ;;  %s306_s1 = inlined_call_operand.vmem [shape: f32[1,32], index: 1, kind: input, shape index: {}]   ;;  %s307_s2 = inlined_call_operand.vmem [shape: f32[1,32], index: 2, kind: input, shape index: {}]   ;;  %s308_s4 = inlined_call_operand.vmem [shape: f32[1,96], index: 4, kind: input, shape index: {}]   ;;  %s309_s5 = inlined_call_operand.vmem [shape: bf16[16,32], index: 5, kind: output, shape index: {0}]   ;;  %s310_s7 = inlined_call_operand.vmem [shape: bf16[16,32], index: 7, kind: output, shape index: {2}]   ;;  %s311_s6 = inlined_call_operand.vmem [shape: bf16[16,32], index: 6, kind: output, shape index: {1}]  }
   0x1   :  { %v24_v0 = vld [vmem:[%s304_s0] sm:$0xff]  ;;  %v25_v1 = vld [vmem:[%s304_s0 + $0x8] sm:$0xff]  ;;  %192 = vmatprep.subr.bf16.mxu0 %v210_v14  ;;  %196 = vmatprep.mubr.msk.bf16.mxu0 %vm211_vm1, %v210_v14 }
   0x2   :  { %v29_v2 = vsel %vm28_vm0, %v24_v0, 0.0  ;;  %v32_v3 = vsel %vm28_vm0, %v25_v1, 0.0  ;;  %v204_v15 = vld [vmem:[%s305_s3 + $0x8] sm:$0xff]   ;;  %v205_v16 = vld [vmem:[%s305_s3] sm:$0xff]  }
   0x3   :  { %30 = vadd.xlane.f32.xlu0 %v29_v2  ;;  %193 = vmatpush3.bf16.msra.mxu0 %v204_v15  ;;  %v179_v25 = vld [vmem:[%s306_s1] ss:$0 sm:$0xff] }
   0x4   :  { %194 = vmatprep.subr.bf16.mxu0 %v210_v14  ;;  %v180_v29 = vld [vmem:[%s307_s2] ss:$0 sm:$0xff]  ;;  %s212_s2 = smov 64  }
   0x5   :  { %v181_v34 = vld [vmem:[%s308_s4] ss:$0 sm:$0xff] }
   0x7   :  { %33 = vadd.xlane.f32.xlu0 %v32_v3  ;;  %195 = vmatpush3.bf16.msra.mxu0 %v205_v16 }
  0x8c   :  { %v31_v4 = vpop.xlane.xlu0 %30 }
  0x8d   :  { %v36_v5 = vmul.f32 0.03125, %v31_v4 }
  0x8f   :  { %v38_v6 = vsub.f32 %v24_v0, %v36_v5 }
  0x90   :  { %v34_v7 = vpop.xlane.xlu0 %33 }
  0x91   :  { %v37_v8 = vmul.f32 0.03125, %v34_v7  ;;  %v40_v9 = vmul.f32 %v38_v6, %v38_v6 }
  0x93   :  { %v39_v10 = vsub.f32 %v25_v1, %v37_v8  ;;  %v42_v11 = vsel %vm28_vm0, %v40_v9, 0.0 }
  0x94   :  { %43 = vadd.xlane.f32.xlu1 %v42_v11 }
  0x95   :  { %v41_v12 = vmul.f32 %v39_v10, %v39_v10 }
  0x97   :  { %v45_v13 = vsel %vm28_vm0, %v41_v12, 0.0 }
  0x98   :  { %46 = vadd.xlane.f32.xlu1 %v45_v13 }
 0x11d   :  { %v44_v17 = vpop.xlane.xlu1 %43 }
 0x11e   :  { %v48_v18 = vmul.f32 0.03125, %v44_v17 }
 0x120   :  { %v50_v19 = vadd.f32 1e-05, %v48_v18 }
 0x121   :  { %v47_v20 = vpop.xlane.xlu1 %46 }
 0x122   :  { %206 = vrsqrt.f32 %v50_v19  ;;  %v49_v21 = vmul.f32 0.03125, %v47_v20 }
 0x124   :  { %v51_v22 = vadd.f32 1e-05, %v49_v21 }
 0x126   :  { %208 = vrsqrt.f32 %v51_v22 }
 0x12f   :  { %v207_v23 = vpop.eup %206 }
 0x130   :  { %v54_v24 = vmul.f32 %v207_v23, %v38_v6 }
 0x132   :  { %v62_v28 = vmul.f32 %v179_v25, %v54_v24 }
 0x133   :  { %v209_v26 = vpop.eup %208 }
 0x134   :  { %v55_v27 = vmul.f32 %v209_v26, %v39_v10  ;;  %v70_v31 = vadd.f32 %v180_v29, %v62_v28 }
 0x136   :  { %v63_v30 = vmul.f32 %v179_v25, %v55_v27 }
 0x138   :  { %v71_v32 = vadd.f32 %v180_v29, %v63_v30 }
 0x13a   :  { %v72_v33 = vpack.c.bf16 %v71_v32, %v70_v31 }
 0x13c   :  { %197 = vmatmul.mubr.msk.bf16.vlgmr.msra.gmra.mxu0 %vm28_vm0, %v72_v33 }
 0x1fc   :  { %v133_v35 = vpop.f32.mrf.mxu0 }
 0x1fd   :  { %v134_v36 = vadd.f32 %v181_v34, %v133_v35 }
 0x1fe   :  { %v198_v37 = vpop.f32.mrf.mxu0 }
 0x1ff   :  { %v187_v38 = vpack.c.bf16 %v134_v36, %v134_v36 }
 0x200   :  { %v136_v39 = vpop.f32.mrf.mxu0 }
 0x201   :  { %149 = vst.msk [vmem:[%s309_s5] sm:$0xf] %vm148_vm2, %v187_v38  ;;  %v137_v40 = vadd.f32 %v181_v34, %v136_v39  ;;  %159 = vrot.lane.b32.xlu1 %v187_v38, %s212_s2  ;;  %151 = vrot.lane.b32.xlu0 %v187_v38, %s213_s14 }
 0x202   :  { %v199_v41 = vpop.f32.mrf.mxu0 }
 0x203   :  { %v188_v42 = vpack.c.bf16 %v137_v40, %v137_v40 }
 0x205   :  { %150 = vst.msk [vmem:[%s309_s5 + $0x4] sm:$0xf] %vm148_vm2, %v188_v42  ;;  %153 = vrot.lane.b32.xlu1 %v188_v42, %s213_s14 }
 0x209   :  { %161 = vrot.lane.b32.xlu1 %v188_v42, %s212_s2 }
 0x273   :  { %v160_v43 = vpop.permute.xlu1 %159  ;;  %v152_v44 = vpop.permute.xlu0 %151 }
 0x274   :  { %165 = vst.msk [vmem:[%s310_s7] sm:$0xf] %vm148_vm2, %v160_v43  ;;  %157 = vst.msk [vmem:[%s311_s6] sm:$0xf] %vm148_vm2, %v152_v44 }
 0x277   :  { %v154_v45 = vpop.permute.xlu1 %153 }
 0x278   :  { %158 = vst.msk [vmem:[%s311_s6 + $0x4] sm:$0xf] %vm148_vm2, %v154_v45 }
 0x27b   :  { %v162_v46 = vpop.permute.xlu1 %161 }
 0x27c   :  { %166 = vst.msk [vmem:[%s310_s7 + $0x4] sm:$0xf] %vm148_vm2, %v162_v46 }

// kernel: decoder_forward.19
= control target key start
LH: loop header
LB: loop body
LE: loop exit
PB: predicated region body
PF: predicated region fallthrough
CT: control target
= control target key end

     0   :  { %v124_v0 = vmov 0.0   ;;  %vm125_vm0 = vmmov 0   ;;  %vm48_vm1 = vcmask 261120   ;;  %s178_s1 = inlined_call_operand.vmem [shape: bf16[32,32], index: 1, kind: input, shape index: {}]   ;;  %s179_s0 = inlined_call_operand.vmem [shape: bf16[16,32], index: 0, kind: input, shape index: {}]   ;;  %s180_s2 = inlined_call_operand.vmem [shape: f32[1,32], index: 2, kind: input, shape index: {}]   ;;  %s181_s3 = inlined_call_operand.vmem [shape: f32[16,32], index: 3, kind: input, shape index: {}]   ;;  %s182_s4 = inlined_call_operand.vmem [shape: f32[16,32], index: 4, kind: output, shape index: {}]  }
   0x1   :  { %111 = vmatprep.subr.bf16.mxu0 %v124_v0  ;;  %v121_v1 = vld [vmem:[%s178_s1 + $0x8] sm:$0xff]   ;;  %115 = vmatprep.mubr.msk.bf16.mxu0 %vm125_vm0, %v124_v0  ;;  %v122_v2 = vld [vmem:[%s178_s1] sm:$0xff]  }
   0x2   :  { %112 = vmatpush3.bf16.msra.mxu0 %v121_v1  ;;  %v123_v3 = vld [vmem:[%s179_s0] sm:$0xff]   ;;  %v94_v11 = vld [vmem:[%s181_s3 + $0x8] sm:$0xff] }
   0x3   :  { %113 = vmatprep.subr.bf16.mxu0 %v124_v0  ;;  %v103_v4 = vld [vmem:[%s180_s2] ss:$0 sm:$0xff] }
   0x4   :  { %v93_v6 = vld [vmem:[%s181_s3] sm:$0xff] }
   0x6   :  { %114 = vmatpush3.bf16.msra.mxu0 %v122_v2 }
   0x9   :  { %116 = vmatmul.mubr.msk.bf16.vlgmr.msra.gmra.mxu0 %vm48_vm1, %v123_v3 }
  0xc9   :  { %v86_v5 = vpop.f32.mrf.mxu0 }
  0xca   :  { %v87_v7 = vadd.f32 %v103_v4, %v86_v5 }
  0xcb   :  { %v117_v8 = vpop.f32.mrf.mxu0 }
  0xcc   :  { %v95_v9 = vadd.f32 %v93_v6, %v87_v7 }
  0xcd   :  { %v89_v10 = vpop.f32.mrf.mxu0 }
  0xce   :  { %97 = vst.msk [vmem:[%s182_s4] sm:$0xff] %vm48_vm1, %v95_v9  ;;  %v90_v12 = vadd.f32 %v103_v4, %v89_v10 }
  0xcf   :  { %v118_v13 = vpop.f32.mrf.mxu0 }
  0xd0   :  { %v96_v14 = vadd.f32 %v94_v11, %v90_v12 }
  0xd2   :  { %98 = vst.msk [vmem:[%s182_s4 + $0x8] sm:$0xff] %vm48_vm1, %v96_v14 }

// kernel: decoder_forward.20
= control target key start
LH: loop header
LB: loop body
LE: loop exit
PB: predicated region body
PF: predicated region fallthrough
CT: control target
= control target key end

     0   :  { %vm25_vm0 = vcmask 261120   ;;  %v181_v14 = vmov 0.0   ;;  %vm182_vm1 = vmmov 0   ;;  %vm145_vm2 = vcmask 257024   ;;  %s245_s0 = inlined_call_operand.vmem [shape: f32[16,32], index: 0, kind: input, shape index: {}]   ;;  %s246_s3 = inlined_call_operand.vmem [shape: bf16[32,32], index: 3, kind: input, shape index: {}]   ;;  %s247_s1 = inlined_call_operand.vmem [shape: f32[1,32], index: 1, kind: input, shape index: {}]   ;;  %s248_s2 = inlined_call_operand.vmem [shape: f32[1,32], index: 2, kind: input, shape index: {}]   ;;  %s249_s4 = inlined_call_operand.vmem [shape: f32[1,32], index: 4, kind: input, shape index: {}]   ;;  %s250_s5 = inlined_call_operand.vmem [shape: bf16[16,32], index: 5, kind: output, shape index: {}]  }
   0x1   :  { %v21_v0 = vld [vmem:[%s245_s0] sm:$0xff]  ;;  %v22_v1 = vld [vmem:[%s245_s0 + $0x8] sm:$0xff]  ;;  %165 = vmatprep.subr.bf16.mxu0 %v181_v14  ;;  %169 = vmatprep.mubr.msk.bf16.mxu0 %vm182_vm1, %v181_v14 }
   0x2   :  { %v26_v2 = vsel %vm25_vm0, %v21_v0, 0.0  ;;  %v29_v3 = vsel %vm25_vm0, %v22_v1, 0.0  ;;  %v175_v15 = vld [vmem:[%s246_s3 + $0x8] sm:$0xff]   ;;  %v176_v16 = vld [vmem:[%s246_s3] sm:$0xff]  }
   0x3   :  { %27 = vadd.xlane.f32.xlu0 %v26_v2  ;;  %166 = vmatpush3.bf16.msra.mxu0 %v175_v15  ;;  %v152_v25 = vld [vmem:[%s247_s1] ss:$0 sm:$0xff] }
   0x4   :  { %167 = vmatprep.subr.bf16.mxu0 %v181_v14  ;;  %v153_v29 = vld [vmem:[%s248_s2] ss:$0 sm:$0xff] }
   0x5   :  { %v154_v34 = vld [vmem:[%s249_s4] ss:$0 sm:$0xff] }
   0x7   :  { %30 = vadd.xlane.f32.xlu0 %v29_v3  ;;  %168 = vmatpush3.bf16.msra.mxu0 %v176_v16 }
  0x8c   :  { %v28_v4 = vpop.xlane.xlu0 %27 }
  0x8d   :  { %v33_v5 = vmul.f32 0.03125, %v28_v4 }
  0x8f   :  { %v35_v6 = vsub.f32 %v21_v0, %v33_v5 }
  0x90   :  { %v31_v7 = vpop.xlane.xlu0 %30 }
  0x91   :  { %v34_v8 = vmul.f32 0.03125, %v31_v7  ;;  %v37_v9 = vmul.f32 %v35_v6, %v35_v6 }
  0x93   :  { %v36_v10 = vsub.f32 %v22_v1, %v34_v8  ;;  %v39_v11 = vsel %vm25_vm0, %v37_v9, 0.0 }
  0x94   :  { %40 = vadd.xlane.f32.xlu1 %v39_v11 }
  0x95   :  { %v38_v12 = vmul.f32 %v36_v10, %v36_v10 }
  0x97   :  { %v42_v13 = vsel %vm25_vm0, %v38_v12, 0.0 }
  0x98   :  { %43 = vadd.xlane.f32.xlu1 %v42_v13 }
 0x11d   :  { %v41_v17 = vpop.xlane.xlu1 %40 }
 0x11e   :  { %v45_v18 = vmul.f32 0.03125, %v41_v17 }
 0x120   :  { %v47_v19 = vadd.f32 1e-05, %v45_v18 }
 0x121   :  { %v44_v20 = vpop.xlane.xlu1 %43 }
 0x122   :  { %177 = vrsqrt.f32 %v47_v19  ;;  %v46_v21 = vmul.f32 0.03125, %v44_v20 }
 0x124   :  { %v48_v22 = vadd.f32 1e-05, %v46_v21 }
 0x126   :  { %179 = vrsqrt.f32 %v48_v22 }
 0x12f   :  { %v178_v23 = vpop.eup %177 }
 0x130   :  { %v51_v24 = vmul.f32 %v178_v23, %v35_v6 }
 0x132   :  { %v59_v28 = vmul.f32 %v152_v25, %v51_v24 }
 0x133   :  { %v180_v26 = vpop.eup %179 }
 0x134   :  { %v52_v27 = vmul.f32 %v180_v26, %v36_v10  ;;  %v67_v31 = vadd.f32 %v153_v29, %v59_v28 }
 0x136   :  { %v60_v30 = vmul.f32 %v152_v25, %v52_v27 }
 0x138   :  { %v68_v32 = vadd.f32 %v153_v29, %v60_v30 }
 0x13a   :  { %v69_v33 = vpack.c.bf16 %v68_v32, %v67_v31 }
 0x13c   :  { %170 = vmatmul.mubr.msk.bf16.vlgmr.msra.gmra.mxu0 %vm25_vm0, %v69_v33 }
 0x1fc   :  { %v130_v35 = vpop.f32.mrf.mxu0 }
 0x1fd   :  { %v131_v36 = vadd.f32 %v154_v34, %v130_v35 }
 0x1fe   :  { %v171_v37 = vpop.f32.mrf.mxu0 }
 0x1ff   :  { %v160_v38 = vpack.c.bf16 %v131_v36, %v131_v36 }
 0x200   :  { %v133_v39 = vpop.f32.mrf.mxu0 }
 0x201   :  { %146 = vst.msk [vmem:[%s250_s5] sm:$0xf] %vm145_vm2, %v160_v38  ;;  %v134_v40 = vadd.f32 %v154_v34, %v133_v39 }
 0x202   :  { %v172_v41 = vpop.f32.mrf.mxu0 }
 0x203   :  { %v161_v42 = vpack.c.bf16 %v134_v40, %v134_v40 }
 0x205   :  { %147 = vst.msk [vmem:[%s250_s5 + $0x4] sm:$0xf] %vm145_vm2, %v161_v42 }

// kernel: decoder_forward.18
= control target key start
LH: loop header
LB: loop body
LE: loop exit
PB: predicated region body
PF: predicated region fallthrough
CT: control target
= control target key end

     0   :  { %s1091_s15 = smov 0   ;;  %s1093_s16 = smov 0   ;;  %s1215_s0 = inlined_call_operand.vmem [shape: bf16[2,8,32], index: 0, kind: input, shape index: {}]   ;;  %s1216_s1 = inlined_call_operand.vmem [shape: bf16[2,8,32], index: 1, kind: input, shape index: {}]   ;;  %s1217_s2 = inlined_call_operand.vmem [shape: bf16[2,8,32], index: 2, kind: input, shape index: {}]   ;;  %s1218_s3 = inlined_call_operand.vmem [shape: bf16[2,8,8], index: 3, kind: input, shape index: {}]   ;;  %s1219_s4 = inlined_call_operand.vmem [shape: bf16[2,8,32], index: 4, kind: output, shape index: {}]  }
   0x1   :  { %s1095_s17 = smov 0  }
   0x2 LB: > { %s26_s18 = sadd.s32 1, %s1052_s16  ;;  %p894_p0 = scmp.ge.s32.totalorder %s1056_s17, 1  ;;  %s1056_s17 = sphi %s1095_s17, %s14_s17   ;;  %s1052_s16 = sphi %s1093_s16, %s1221_s16   ;;  %s1048_s15 = sphi %s1091_s15, %s1220_s15  }
   0x3   : > { %p28_p1 = scmp.ge.s32.totalorder %s26_s18, 2  ;;  %p212_p2 = scmp.lt.s32.totalorder %s1056_s17, 3 }
   0x5   : > { %s1223_s18 = smov (%p28_p1, %s26_s18), 0  ;;  %p213_p3 = pnand %p894_p0, %p212_p2 }
   0x6   : > { %p257_p4 = scmp.lt.s32.totalorder (!%p213_p3), %s1048_s15, 1  ;;  %s1060_s29 = smov (!%p213_p3), 120  }
   0x7   : > { %216 = sbr.rel (%p213_p3) target bundleno = 1418 (0x58a), region = 36  ;;  %s1061_s30 = smov (!%p213_p3), 112  }
   0x8   : > { %s1062_s5 = smov (!%p213_p3), 104   ;;  %s1063_s12 = smov (!%p213_p3), 8  }
   0x9   : > { %s1064_s13 = smov (!%p213_p3), 16   ;;  %s1065_s14 = smov (!%p213_p3), 24  }
   0xc   : > { %v1058_v0 = vmov 0.0   ;;  %vm1059_vm0 = vmmov 0   ;;  %s1225_s15 = smov (!%p257_p4, %s1048_s15), 1  ;;  %vm294_vm1 = vcmask 64512   ;;  %vm358_vm3 = vcmask 1043456  }
   0xd   : > { %935 = vmatprep.subr.bf16.mxu0 %v1058_v0  ;;  %937 = vmatprep.mubr.msk.bf16.mxu0 %vm1059_vm0, %v1058_v0  ;;  %s1115_s19 = sshll.u32 %s1225_s15, 2  ;;  %vm403_vm4 = vcmask 60416   ;;  %vm533_vm5 = vcmask 126016   ;;  %vm654_vm6 = vcmask 191616   ;;  %vm775_vm7 = vcmask 257216  }
   0xe   : > { %941 = vmatprep.subr.bf16.mxu1 %v1058_v0  ;;  %943 = vmatprep.mubr.msk.bf16.mxu1 %vm1059_vm0, %v1058_v0  ;;  %s267_s22 = scalar_lea.vmem %s1216_s1, %s1115_s19  ;;  %s263_s25 = scalar_lea.vmem %s1215_s0, %s1115_s19 }
   0xf   : > { %v288_v1 = vld [vmem:[%s267_s22] sm:$0xf]  ;;  %s278_s28 = scalar_lea.vmem %s1218_s3, %s1115_s19  ;;  %s271_s8 = scalar_lea.vmem %s1217_s2, %s1115_s19 }
  0x10   : > { %v299_v2 = vsel %vm294_vm1, %v288_v1, 0  ;;  %v287_v3 = vld [vmem:[%s263_s25] sm:$0xf]  ;;  %v903_v14 = vcombine.low %v288_v1, %v288_v1  ;;  %s1174_s11 = scalar_lea.vmem %s1219_s4, %s1115_s19 }
  0x11   : > { %936 = vmatpush3.bf16.xpose.msra.mxu0 %v299_v2  ;;  %v290_v4 = vld [vmem:[%s278_s28] sm:$0xf]  ;;  %v902_v15 = vcombine.low %v287_v3, %v287_v3 }
  0x12   : > { %953 = vmatprep.subr.bf16.mxu0 %v1058_v0  ;;  %v291_v5 = vunpack.c.l.bf16 %v290_v4  ;;  %413 = vrot.lane.b32.xlu1 %v903_v14, %s1060_s29  ;;  %v1149_v21 = vld [vmem:[%s271_s8] sm:$0xf] }
  0x13   : > { %v360_v22 = vsel %vm358_vm3, %v1149_v21, 0 }
  0x14   : > { %vm292_vm2 = vcmp.eq.f32.partialorder %v291_v5, 0.0  ;;  %942 = vmatpush3.bf16.msra.mxu1 %v360_v22 }
  0x15   : > { %v1135_v7 = vsel %vm292_vm2, -1e+09, %v1058_v0  ;;  %947 = vmatprep.subr.bf16.mxu1 %v1058_v0 }
  0x16   : > { %408 = vrot.lane.b32.xlu1 %v902_v15, %s1060_s29 }
  0x18   : > { %938 = vmatmul.mubr.msk.bf16.vlgmr.msra.gmra.mxu0 %vm294_vm1, %v287_v3 }
  0x19   : > { %955 = vmatprep.mubr.msk.bf16.mxu0 %vm1059_vm0, %v1058_v0 }
  0x1a   : > { %535 = vrot.lane.b32.xlu1 %v902_v15, %s1061_s30 }
  0x1e   : > { %658 = vrot.lane.b32.xlu1 %v903_v14, %s1062_s5 }
  0x22   : > { %656 = vrot.lane.b32.xlu1 %v902_v15, %s1062_s5 }
  0x84   : > { %v414_v25 = vpop.permute.xlu1 %413 }
  0x85   : > { %v419_v27 = vsel %vm294_vm1, %v414_v25, 0 }
  0x88   : > { %v409_v29 = vpop.permute.xlu1 %408 }
  0x8c   : > { %v536_v31 = vpop.permute.xlu1 %535 }
  0x90   : > { %v659_v33 = vpop.permute.xlu1 %658 }
  0x91   : > { %v664_v34 = vsel %vm294_vm1, %v659_v33, 0 }
  0x94   : > { %v657_v35 = vpop.permute.xlu1 %656 }
  0xd8   : > { %v335_v6 = vpop.f32.mrf.mxu0 }
  0xd9   : > { %v341_v8 = vmul.f32 0.35355338, %v335_v6 }
  0xda   : > { %v939_v9 = vpop.f32.mrf.mxu0 }
  0xdb   : > { %v342_v10 = vadd.f32 %v341_v8, %v1135_v7  ;;  %v905_v9 = vcombine.low %v1149_v21, %v1149_v21 }
  0xdc   : > { %v338_v11 = vpop.f32.mrf.mxu0 }
  0xdd   : > { %v343_v12 = vsel %vm294_vm1, %v342_v10, -inf }
  0xde   : > { %344 = vmax.xlane.f32.xlu0 %v343_v12  ;;  %v940_v13 = vpop.f32.mrf.mxu0 }
 0x167   : > { %v345_v16 = vpop.xlane.xlu0 %344 }
 0x168   : > { %v346_v17 = vsub.f32 %v342_v10, %v345_v16 }
 0x16a   : > { %v347_v18 = vmul.f32 1.442695, %v346_v17 }
 0x16c   : > { %1018 = vpow2.f32 %v347_v18 }
 0x179   : > { %v1019_v19 = vpop.eup %1018 }
 0x17a   : > { %v349_v20 = vsel %vm294_vm1, %v1019_v19, 0.0 }
 0x17b   : > { %350 = vadd.xlane.f32.xlu0 %v349_v20 }
 0x191   : > { %537 = vrot.lane.b32.xlu0 %v903_v14, %s1061_s30 }
 0x204   : > { %v351_v23 = vpop.xlane.xlu0 %350 }
 0x205   : > { %1020 = vrcp.f32 %v351_v23 }
 0x208   : > { %v538_v30 = vpop.permute.xlu0 %537 }
 0x209   : > { %v543_v32 = vsel %vm294_vm1, %v538_v30, 0 }
 0x212   : > { %v1021_v24 = vpop.eup %1020 }
 0x213   : > { %v353_v26 = vmul.f32 %v1021_v24, %v1019_v19 }
 0x215   : > { %v354_v28 = vpack.c.bf16 %v353_v26, %v353_v26 }
 0x217   : > { %944 = vmatmul.mubr.msk.bf16.vlgmr.msra.gmra.mxu1 %vm294_vm1, %v354_v28 }
 0x218   : > { %948 = vmatpush3.bf16.xpose.msra.mxu1 %v419_v27  ;;  %949 = vmatprep.mubr.msk.bf16.mxu1 %vm1059_vm0, %v1058_v0 }
 0x219   : > { %959 = vmatprep.subr.bf16.mxu1 %v1058_v0 }
 0x21f   : > { %950 = vmatmul.mubr.msk.bf16.vlgmr.msra.gmra.mxu1 %vm294_vm1, %v409_v29 }
 0x220   : > { %960 = vmatpush3.bf16.xpose.msra.mxu1 %v543_v32  ;;  %961 = vmatprep.mubr.msk.bf16.mxu1 %vm1059_vm0, %v1058_v0 }
 0x221   : > { %971 = vmatprep.subr.bf16.mxu1 %v1058_v0 }
 0x227   : > { %962 = vmatmul.mubr.msk.bf16.vlgmr.msra.gmra.mxu1 %vm294_vm1, %v536_v31 }
 0x228   : > { %972 = vmatpush3.bf16.xpose.msra.mxu1 %v664_v34  ;;  %973 = vmatprep.mubr.msk.bf16.mxu1 %vm1059_vm0, %v1058_v0 }
 0x22f   : > { %974 = vmatmul.mubr.msk.bf16.vlgmr.msra.gmra.mxu1 %vm294_vm1, %v657_v35 }
 0x2d7   : > { %v396_v36 = vpop.f32.mrf.mxu1 }
 0x2d8   : > { %v402_v37 = vpack.c.bf16 %v396_v36, %v396_v36 }
 0x2d9   : > { %v945_v38 = vpop.f32.mrf.mxu1 }
 0x2da   : > { %404 = vst.msk [vmem:[%s1174_s11] sm:$0xf] %vm403_vm4, %v402_v37 }
 0x2db   : > { %v399_v39 = vpop.f32.mrf.mxu1 }
 0x2dd   : > { %v946_v40 = vpop.f32.mrf.mxu1 }
 0x2df   : > { %v455_v41 = vpop.f32.mrf.mxu1 }
 0x2e0   : > { %v461_v42 = vmul.f32 0.35355338, %v455_v41 }
 0x2e1   : > { %v951_v43 = vpop.f32.mrf.mxu1 }
 0x2e2   : > { %v462_v44 = vadd.f32 %v461_v42, %v1135_v7 }
 0x2e3   : > { %v458_v45 = vpop.f32.mrf.mxu1 }
 0x2e4   : > { %v463_v46 = vsel %vm294_vm1, %v462_v44, -inf }
 0x2e5   : > { %464 = vmax.xlane.f32.xlu1 %v463_v46  ;;  %v952_v47 = vpop.f32.mrf.mxu1 }
 0x2e7   : > { %v579_v48 = vpop.f32.mrf.mxu1 }
 0x2e8   : > { %v585_v49 = vmul.f32 0.35355338, %v579_v48 }
 0x2e9   : > { %v963_v50 = vpop.f32.mrf.mxu1 }
 0x2ea   : > { %v586_v51 = vadd.f32 %v585_v49, %v1135_v7 }
 0x2eb   : > { %v582_v52 = vpop.f32.mrf.mxu1 }
 0x2ec   : > { %v587_v53 = vsel %vm294_vm1, %v586_v51, -inf }
 0x2ed   : > { %588 = vmax.xlane.f32.xlu0 %v587_v53  ;;  %v964_v54 = vpop.f32.mrf.mxu1 }
 0x2ef   : > { %v700_v55 = vpop.f32.mrf.mxu1 }
 0x2f0   : > { %v706_v56 = vmul.f32 0.35355338, %v700_v55 }
 0x2f1   : > { %v975_v57 = vpop.f32.mrf.mxu1 }
 0x2f2   : > { %v707_v58 = vadd.f32 %v706_v56, %v1135_v7 }
 0x2f3   : > { %v703_v59 = vpop.f32.mrf.mxu1 }
 0x2f4   : > { %v708_v60 = vsel %vm294_vm1, %v707_v58, -inf }
 0x2f5   : > { %709 = vmax.xlane.f32.xlu1 %v708_v60  ;;  %v976_v61 = vpop.f32.mrf.mxu1 }
 0x36e   : > { %v465_v62 = vpop.xlane.xlu1 %464 }
 0x36f   : > { %v466_v63 = vsub.f32 %v462_v44, %v465_v62 }
 0x371   : > { %v467_v1 = vmul.f32 1.442695, %v466_v63 }
 0x373   : > { %1022 = vpow2.f32 %v467_v1 }
 0x376   : > { %v589_v2 = vpop.xlane.xlu0 %588 }
 0x377   : > { %v590_v3 = vsub.f32 %v586_v51, %v589_v2 }
 0x379   : > { %v591_v4 = vmul.f32 1.442695, %v590_v3 }
 0x37b   : > { %1024 = vpow2.f32 %v591_v4 }
 0x37e   : > { %v710_v10 = vpop.xlane.xlu1 %709 }
 0x37f   : > { %v711_v11 = vsub.f32 %v707_v58, %v710_v10 }
 0x380   : > { %v1023_v5 = vpop.eup %1022 }
 0x381   : > { %v469_v6 = vsel %vm294_vm1, %v1023_v5, 0.0  ;;  %v712_v12 = vmul.f32 1.442695, %v711_v11 }
 0x382   : > { %470 = vadd.xlane.f32.xlu1 %v469_v6 }
 0x383   : > { %1026 = vpow2.f32 %v712_v12 }
 0x388   : > { %v1025_v8 = vpop.eup %1024 }
 0x389   : > { %v593_v7 = vsel %vm294_vm1, %v1025_v8, 0.0 }
 0x38a   : > { %594 = vadd.xlane.f32.xlu0 %v593_v7 }
 0x390   : > { %v1027_v13 = vpop.eup %1026 }
 0x391   : > { %v714_v14 = vsel %vm294_vm1, %v1027_v13, 0.0 }
 0x393   : > { %599 = vrot.lane.b32.xlu1 %v905_v9, %s1061_s30 }
 0x3a0   : > { %478 = vrot.lane.b32.xlu0 %v905_v9, %s1060_s29 }
 0x3b7   : > { %715 = vadd.xlane.f32.xlu1 %v714_v14 }
 0x3c8   : > { %720 = vrot.lane.b32.xlu1 %v905_v9, %s1062_s5 }
 0x40b   : > { %v471_v15 = vpop.xlane.xlu1 %470 }
 0x40c   : > { %1028 = vrcp.f32 %v471_v15 }
 0x40f   : > { %v600_v21 = vpop.permute.xlu1 %599 }
 0x410   : > { %v605_v23 = vsel %vm358_vm3, %v600_v21, 0 }
 0x413   : > { %v595_v16 = vpop.xlane.xlu0 %594 }
 0x414   : > { %1030 = vrcp.f32 %v595_v16 }
 0x417   : > { %v479_v17 = vpop.permute.xlu0 %478 }
 0x418   : > { %v484_v18 = vsel %vm358_vm3, %v479_v17, 0 }
 0x419   : > { %v1029_v19 = vpop.eup %1028  ;;  %954 = vmatpush3.bf16.msra.mxu0 %v484_v18 }
 0x41a   : > { %965 = vmatprep.subr.bf16.mxu0 %v1058_v0  ;;  %v473_v20 = vmul.f32 %v1029_v19, %v1023_v5 }
 0x41c   : > { %v474_v22 = vpack.c.bf16 %v473_v20, %v473_v20 }
 0x41e   : > { %956 = vmatmul.mubr.msk.bf16.vlgmr.msra.gmra.mxu0 %vm294_vm1, %v474_v22 }
 0x41f   : > { %966 = vmatpush3.bf16.msra.mxu0 %v605_v23  ;;  %967 = vmatprep.mubr.msk.bf16.mxu0 %vm1059_vm0, %v1058_v0 }
 0x420   : > { %977 = vmatprep.subr.bf16.mxu0 %v1058_v0 }
 0x421   : > { %v1031_v24 = vpop.eup %1030 }
 0x422   : > { %v597_v25 = vmul.f32 %v1031_v24, %v1025_v8 }
 0x424   : > { %v598_v26 = vpack.c.bf16 %v597_v25, %v597_v25 }
 0x426   : > { %968 = vmatmul.mubr.msk.bf16.vlgmr.msra.gmra.mxu0 %vm294_vm1, %v598_v26 }
 0x427   : > { %979 = vmatprep.mubr.msk.bf16.mxu0 %vm1059_vm0, %v1058_v0 }
 0x440   : > { %v716_v27 = vpop.xlane.xlu1 %715 }
 0x441   : > { %1032 = vrcp.f32 %v716_v27 }
 0x444   : > { %v721_v28 = vpop.permute.xlu1 %720 }
 0x445   : > { %v726_v29 = vsel %vm358_vm3, %v721_v28, 0 }
 0x446   : > { %978 = vmatpush3.bf16.msra.mxu0 %v726_v29 }
 0x44e   : > { %v1033_v30 = vpop.eup %1032 }
 0x44f   : > { %v718_v31 = vmul.f32 %v1033_v30, %v1027_v13 }
 0x451   : > { %v719_v32 = vpack.c.bf16 %v718_v31, %v718_v31 }
 0x453   : > { %980 = vmatmul.mubr.msk.bf16.vlgmr.msra.gmra.mxu0 %vm294_vm1, %v719_v32 }
 0x4de   : > { %v520_v33 = vpop.f32.mrf.mxu0 }
 0x4df   : > { %v916_v34 = vpack.c.bf16 %v520_v33, %v520_v33 }
 0x4e0   : > { %v957_v35 = vpop.f32.mrf.mxu0 }
 0x4e1   : > { %530 = vrot.lane.b32.xlu0 %v916_v34, %s1063_s12 }
 0x4e2   : > { %v523_v36 = vpop.f32.mrf.mxu0 }
 0x4e4   : > { %v958_v37 = vpop.f32.mrf.mxu0 }
 0x4e6   : > { %v641_v38 = vpop.f32.mrf.mxu0 }
 0x4e7   : > { %v917_v0 = vpack.c.bf16 %v641_v38, %v641_v38 }
 0x4e8   : > { %v969_v39 = vpop.f32.mrf.mxu0 }
 0x4e9   : > { %651 = vrot.lane.b32.xlu1 %v917_v0, %s1064_s13 }
 0x4ea   : > { %v644_v40 = vpop.f32.mrf.mxu0 }
 0x4ec   : > { %v970_v41 = vpop.f32.mrf.mxu0 }
 0x513   : > { %v762_v42 = vpop.f32.mrf.mxu0 }
 0x514   : > { %v918_v43 = vpack.c.bf16 %v762_v42, %v762_v42 }
 0x515   : > { %v981_v44 = vpop.f32.mrf.mxu0 }
 0x516   : > { %772 = vrot.lane.b32.xlu0 %v918_v43, %s1065_s14 }
 0x517   : > { %v765_v45 = vpop.f32.mrf.mxu0 }
 0x519   : > { %v982_v46 = vpop.f32.mrf.mxu0 }
 0x553   : > { %v531_v47 = vpop.permute.xlu0 %530 }
 0x554   : > { %534 = vst.msk [vmem:[%s1174_s11] sm:$0xf] %vm533_vm5, %v531_v47 }
 0x55b   : > { %v652_v48 = vpop.permute.xlu1 %651 }
 0x55c   : > { %655 = vst.msk [vmem:[%s1174_s11] sm:$0xf] %vm654_vm6, %v652_v48 }
 0x588   : > { %v773_v49 = vpop.permute.xlu0 %772 }
 0x589   : > { %776 = vst.msk [vmem:[%s1174_s11] sm:$0xf] %vm775_vm7, %v773_v49 }
 0x58a PF: > { %s14_s17 = sadd.s32 1, %s1056_s17   ;;  %s1220_s15 = smov %s1052_s16 }
 0x58b   : > { %p11_p5 = scmp.ge.s32.totalorder %s14_s17, 4   ;;  %s1221_s16 = smov %s1223_s18 }
 0x58d   :  { %13 = sbr.rel (!%p11_p5) target bundleno = 2 (0x2), region = 75 }

// kernel: decoder_forward.21
= control target key start
LH: loop header
LB: loop body
LE: loop exit
PB: predicated region body
PF: predicated region fallthrough
CT: control target
= control target key end

     0   :  { %v145_v0 = vmov 0.0   ;;  %vm146_vm0 = vmmov 0   ;;  %vm47_vm1 = vcmask 261120   ;;  %vm100_vm2 = vcmask 257024   ;;  %s201_s1 = inlined_call_operand.vmem [shape: bf16[32,64], index: 1, kind: input, shape index: {}]   ;;  %s202_s0 = inlined_call_operand.vmem [shape: bf16[16,32], index: 0, kind: input, shape index: {}]   ;;  %s203_s2 = inlined_call_operand.vmem [shape: f32[1,64], index: 2, kind: input, shape index: {}]   ;;  %s204_s3 = inlined_call_operand.vmem [shape: bf16[16,32], index: 3, kind: output, shape index: {0}]   ;;  %s205_s4 = inlined_call_operand.vmem [shape: bf16[16,32], index: 4, kind: output, shape index: {1}]  }
   0x1   :  { %131 = vmatprep.subr.bf16.mxu0 %v145_v0  ;;  %v142_v1 = vld [vmem:[%s201_s1 + $0x8] sm:$0xff]   ;;  %135 = vmatprep.mubr.msk.bf16.mxu0 %vm146_vm0, %v145_v0  ;;  %v143_v2 = vld [vmem:[%s201_s1] sm:$0xff]  }
   0x2   :  { %132 = vmatpush3.bf16.msra.mxu0 %v142_v1  ;;  %v144_v3 = vld [vmem:[%s202_s0] sm:$0xff]   ;;  %s147_s0 = smov 96  }
   0x3   :  { %133 = vmatprep.subr.bf16.mxu0 %v145_v0  ;;  %v119_v4 = vld [vmem:[%s203_s2] ss:$0 sm:$0xff] }
   0x6   :  { %134 = vmatpush3.bf16.msra.mxu0 %v143_v2 }
   0x9   :  { %136 = vmatmul.mubr.msk.bf16.vlgmr.msra.gmra.mxu0 %vm47_vm1, %v144_v3 }
  0xc9   :  { %v85_v5 = vpop.f32.mrf.mxu0 }
  0xca   :  { %v86_v6 = vadd.f32 %v119_v4, %v85_v5 }
  0xcb   :  { %v137_v7 = vpop.f32.mrf.mxu0 }
  0xcc   :  { %v126_v8 = vpack.c.bf16 %v86_v6, %v86_v6 }
  0xcd   :  { %v88_v9 = vpop.f32.mrf.mxu0 }
  0xce   :  { %101 = vst.msk [vmem:[%s204_s3] sm:$0xf] %vm100_vm2, %v126_v8  ;;  %v89_v10 = vadd.f32 %v119_v4, %v88_v9  ;;  %103 = vrot.lane.b32.xlu0 %v126_v8, %s147_s0 }
  0xcf   :  { %v138_v11 = vpop.f32.mrf.mxu0 }
  0xd0   :  { %v127_v12 = vpack.c.bf16 %v89_v10, %v89_v10 }
  0xd2   :  { %102 = vst.msk [vmem:[%s204_s3 + $0x4] sm:$0xf] %vm100_vm2, %v127_v12  ;;  %105 = vrot.lane.b32.xlu0 %v127_v12, %s147_s0 }
 0x140   :  { %v104_v13 = vpop.permute.xlu0 %103 }
 0x141   :  { %109 = vst.msk [vmem:[%s205_s4] sm:$0xf] %vm100_vm2, %v104_v13 }
 0x144   :  { %v106_v14 = vpop.permute.xlu0 %105 }
 0x145   :  { %110 = vst.msk [vmem:[%s205_s4 + $0x4] sm:$0xf] %vm100_vm2, %v106_v14 }

// kernel: decoder_forward.33
= control target key start
LH: loop header
LB: loop body
LE: loop exit
PB: predicated region body
PF: predicated region fallthrough
CT: control target
= control target key end

     0   :  { %vm19_vm0 = vcmask 261120   ;;  %s156_s0 = inlined_call_operand.vmem [shape: f32[16,32], index: 0, kind: input, shape index: {}]   ;;  %s157_s1 = inlined_call_operand.vmem [shape: f32[1,32], index: 1, kind: input, shape index: {}]   ;;  %s158_s2 = inlined_call_operand.vmem [shape: f32[1,32], index: 2, kind: input, shape index: {}]   ;;  %s159_s3 = inlined_call_operand.hbm [shape: f32[16,32], index: 3, kind: output, shape index: {}]  }
   0x1   :  { %v15_v0 = vld [vmem:[%s156_s0] sm:$0xff]  ;;  %v16_v1 = vld [vmem:[%s156_s0 + $0x8] sm:$0xff] }
   0x2   :  { %8 = vsyncpa [#allocation3], 0  ;;  %v20_v2 = vsel %vm19_vm0, %v15_v0, 0.0  ;;  %v23_v3 = vsel %vm19_vm0, %v16_v1, 0.0  ;;  %v81_v21 = vld [vmem:[%s157_s1] ss:$0 sm:$0xff] }
   0x3   :  { %21 = vadd.xlane.f32.xlu0 %v20_v2  ;;  %v82_v23 = vld [vmem:[%s158_s2] ss:$0 sm:$0xff]  ;;  %s112_s19 = smov [#allocation2]  }
   0x4   :  { %s70_s20 = sshll.u32 %s112_s19, 4  ;;  %s71_s20 = int_to_ptr.vmem [resolvable:$true] %s70_s20 }
   0x5   :  { %s90_s21 = scalar_lea.vmem %s71_s20, 256  ;;  %p95_p1 = scmp.lt.s32.totalorder %s71_s20, %s71_s20 }
   0x6   :  { %p91_p0 = scmp.ne.s32.totalorder %s71_s20, %s90_s21  ;;  %p96_p2 = scmp.lt.s32.totalorder %s90_s21, %s90_s21 }
   0x7   :  { %24 = vadd.xlane.f32.xlu0 %v23_v3 }
   0x8   :  { %p97_p3 = por %p96_p2, %p95_p1 }
   0xa   :  { %p98_p4 = pnand %p97_p3, %p91_p0 }
  0x8c   :  { %v22_v4 = vpop.xlane.xlu0 %21 }
  0x8d   :  { %v27_v5 = vmul.f32 0.03125, %v22_v4 }
  0x8f   :  { %v29_v6 = vsub.f32 %v15_v0, %v27_v5 }
  0x90   :  { %v25_v7 = vpop.xlane.xlu0 %24 }
  0x91   :  { %v28_v8 = vmul.f32 0.03125, %v25_v7  ;;  %v31_v9 = vmul.f32 %v29_v6, %v29_v6 }
  0x93   :  { %v30_v10 = vsub.f32 %v16_v1, %v28_v8  ;;  %v33_v11 = vsel %vm19_vm0, %v31_v9, 0.0 }
  0x94   :  { %34 = vadd.xlane.f32.xlu1 %v33_v11 }
  0x95   :  { %v32_v12 = vmul.f32 %v30_v10, %v30_v10 }
  0x97   :  { %v36_v13 = vsel %vm19_vm0, %v32_v12, 0.0 }
  0x98   :  { %37 = vadd.xlane.f32.xlu1 %v36_v13 }
 0x11d   :  { %v35_v14 = vpop.xlane.xlu1 %34 }
 0x11e   :  { %v39_v15 = vmul.f32 0.03125, %v35_v14 }
 0x120   :  { %v41_v16 = vadd.f32 1e-05, %v39_v15 }
 0x121   :  { %v38_v17 = vpop.xlane.xlu1 %37 }
 0x122   :  { %86 = vrsqrt.f32 %v41_v16  ;;  %v40_v18 = vmul.f32 0.03125, %v38_v17 }
 0x124   :  { %v42_v19 = vadd.f32 1e-05, %v40_v18 }
 0x126   :  { %88 = vrsqrt.f32 %v42_v19 }
 0x12f   :  { %v87_v20 = vpop.eup %86 }
 0x130   :  { %v45_v22 = vmul.f32 %v87_v20, %v29_v6 }
 0x132   :  { %v53_v24 = vmul.f32 %v81_v21, %v45_v22 }
 0x133   :  { %v89_v25 = vpop.eup %88 }
 0x134   :  { %v46_v26 = vmul.f32 %v89_v25, %v30_v10  ;;  %v61_v27 = vadd.f32 %v82_v23, %v53_v24 }
 0x136   :  { %v54_v28 = vmul.f32 %v81_v21, %v46_v26  ;;  %63 = vst.msk [vmem:[#allocation2] sm:$0xff] %vm19_vm0, %v61_v27 }
 0x138   :  { %v62_v29 = vadd.f32 %v82_v23, %v54_v28 }
 0x13a   :  { %64 = vst.msk [vmem:[#allocation2 + $0x8] sm:$0xff] %vm19_vm0, %v62_v29 }
 0x13b   :  { %101 = shalt.err (!%p98_p4)
}
 0x13c   :  { %s113_s1 = smov 128   ;;  %s114_s2 = smov 8  }
 0x13d   :  { %76 = dma.vmem_to_hbm [thread:$0]  %s71_s20, 256, %s159_s3, [#allocation3], %s113_s1, %s113_s1, %s114_s2  }
 0x13e   :  { %110 = dma.done.wait [#allocation3], 256  }
 0x13f   :  { %111 = vsyncadd [#allocation3], 4294967040 }
 0x140   :  { %80 = vsyncpa [#allocation3], 1 }

// kernel: decoder_forward.22
= control target key start
LH: loop header
LB: loop body
LE: loop exit
PB: predicated region body
PF: predicated region fallthrough
CT: control target
= control target key end

     0   :  { %s1074_s15 = smov 0   ;;  %s1076_s16 = smov 0   ;;  %s1197_s0 = inlined_call_operand.vmem [shape: bf16[2,8,32], index: 0, kind: input, shape index: {}]   ;;  %s1198_s1 = inlined_call_operand.vmem [shape: bf16[2,8,32], index: 1, kind: input, shape index: {}]   ;;  %s1199_s2 = inlined_call_operand.vmem [shape: bf16[2,8,32], index: 2, kind: input, shape index: {}]   ;;  %s1200_s3 = inlined_call_operand.vmem [shape: bf16[2,1,8], index: 3, kind: input, shape index: {}]   ;;  %s1201_s4 = inlined_call_operand.vmem [shape: bf16[2,8,32], index: 4, kind: output, shape index: {}]  }
   0x1   :  { %s1078_s17 = smov 0  }
   0x2 LB: > { %s26_s18 = sadd.s32 1, %s1035_s16  ;;  %p878_p0 = scmp.ge.s32.totalorder %s1039_s17, 1  ;;  %s1039_s17 = sphi %s1078_s17, %s14_s17   ;;  %s1035_s16 = sphi %s1076_s16, %s1203_s16   ;;  %s1031_s15 = sphi %s1074_s15, %s1202_s15  }
   0x3   : > { %p28_p1 = scmp.ge.s32.totalorder %s26_s18, 2  ;;  %p206_p2 = scmp.lt.s32.totalorder %s1039_s17, 3 }
   0x5   : > { %s1205_s18 = smov (%p28_p1, %s26_s18), 0  ;;  %p207_p3 = pnand %p878_p0, %p206_p2 }
   0x6   : > { %p247_p4 = scmp.lt.s32.totalorder (!%p207_p3), %s1031_s15, 1  ;;  %s1043_s29 = smov (!%p207_p3), 120  }
   0x7   : > { %210 = sbr.rel (%p207_p3) target bundleno = 1418 (0x58a), region = 36  ;;  %s1044_s30 = smov (!%p207_p3), 112  }
   0x8   : > { %s1045_s5 = smov (!%p207_p3), 104   ;;  %s1046_s12 = smov (!%p207_p3), 8  }
   0x9   : > { %s1047_s13 = smov (!%p207_p3), 16   ;;  %s1048_s14 = smov (!%p207_p3), 24  }
   0xc   : > { %v1041_v0 = vmov 0.0   ;;  %vm1042_vm0 = vmmov 0   ;;  %s1207_s15 = smov (!%p247_p4, %s1031_s15), 1  ;;  %vm280_vm1 = vcmask 64512   ;;  %v328_v5 = vlaneseq }
   0xd   : > { %918 = vmatprep.subr.bf16.mxu0 %v1041_v0  ;;  %920 = vmatprep.mubr.msk.bf16.mxu0 %vm1042_vm0, %v1041_v0  ;;  %s1098_s19 = sshll.u32 %s1207_s15, 2  ;;  %s264_s28 = scalar_lea.vmem %s1200_s3, %s1207_s15  ;;  %vm348_vm3 = vcmask 1043456   ;;  %vm393_vm4 = vcmask 60416   ;;  %vm523_vm5 = vcmask 126016   ;;  %vm644_vm6 = vcmask 191616  }
   0xe   : > { %924 = vmatprep.subr.bf16.mxu1 %v1041_v0  ;;  %926 = vmatprep.mubr.msk.bf16.mxu1 %vm1042_vm0, %v1041_v0  ;;  %s257_s22 = scalar_lea.vmem %s1198_s1, %s1098_s19  ;;  %s253_s25 = scalar_lea.vmem %s1197_s0, %s1098_s19  ;;  %v276_v4 = vld [vmem:[%s264_s28] sm:$0x1]  ;;  %v329_v7 = vshrl.u32 %v328_v5, 7  ;;  %vm765_vm7 = vcmask 257216  }
   0xf   : > { %v274_v1 = vld [vmem:[%s257_s22] sm:$0xf]  ;;  %v277_v6 = vunpack.c.l.bf16 %v276_v4  ;;  %s261_s8 = scalar_lea.vmem %s1199_s2, %s1098_s19  ;;  %s1156_s11 = scalar_lea.vmem %s1201_s4, %s1098_s19 }
  0x10   : > { %v285_v2 = vsel %vm280_vm1, %v274_v1, 0  ;;  %v273_v3 = vld [vmem:[%s253_s25] sm:$0xf]  ;;  %v330_v8 = vsub.s32 0, %v329_v7  ;;  %v886_v18 = vcombine.low %v274_v1, %v274_v1 }
  0x11   : > { %919 = vmatpush3.bf16.xpose.msra.mxu0 %v285_v2  ;;  %vm278_vm2 = vcmp.eq.f32.partialorder %v277_v6, 0.0  ;;  %v885_v19 = vcombine.low %v273_v3, %v273_v3  ;;  %v1131_v25 = vld [vmem:[%s261_s8] sm:$0xf] }
  0x12   : > { %936 = vmatprep.subr.bf16.mxu0 %v1041_v0  ;;  %v279_v9 = vsel %vm278_vm2, -1e+09, %v1041_v0  ;;  %403 = vrot.lane.b32.xlu1 %v886_v18, %s1043_s29  ;;  %v350_v26 = vsel %vm348_vm3, %v1131_v25, 0 }
  0x13   : > { %v1117_v10 = vrot.slane %v279_v9, %v330_v8  ;;  %925 = vmatpush3.bf16.msra.mxu1 %v350_v26 }
  0x14   : > { %930 = vmatprep.subr.bf16.mxu1 %v1041_v0 }
  0x16   : > { %398 = vrot.lane.b32.xlu1 %v885_v19, %s1043_s29 }
  0x18   : > { %921 = vmatmul.mubr.msk.bf16.vlgmr.msra.gmra.mxu0 %vm280_vm1, %v273_v3 }
  0x19   : > { %938 = vmatprep.mubr.msk.bf16.mxu0 %vm1042_vm0, %v1041_v0 }
  0x1a   : > { %525 = vrot.lane.b32.xlu1 %v885_v19, %s1044_s30 }
  0x1e   : > { %648 = vrot.lane.b32.xlu1 %v886_v18, %s1045_s5 }
  0x22   : > { %646 = vrot.lane.b32.xlu1 %v885_v19, %s1045_s5 }
  0x84   : > { %v404_v29 = vpop.permute.xlu1 %403 }
  0x85   : > { %v409_v31 = vsel %vm280_vm1, %v404_v29, 0 }
  0x88   : > { %v399_v33 = vpop.permute.xlu1 %398 }
  0x8c   : > { %v526_v35 = vpop.permute.xlu1 %525 }
  0x90   : > { %v649_v37 = vpop.permute.xlu1 %648 }
  0x91   : > { %v654_v38 = vsel %vm280_vm1, %v649_v37, 0 }
  0x94   : > { %v647_v39 = vpop.permute.xlu1 %646 }
  0xd8   : > { %v321_v11 = vpop.f32.mrf.mxu0 }
  0xd9   : > { %v327_v12 = vmul.f32 0.35355338, %v321_v11 }
  0xda   : > { %v922_v13 = vpop.f32.mrf.mxu0 }
  0xdb   : > { %v332_v14 = vadd.f32 %v1117_v10, %v327_v12  ;;  %v888_v13 = vcombine.low %v1131_v25, %v1131_v25 }
  0xdc   : > { %v324_v15 = vpop.f32.mrf.mxu0 }
  0xdd   : > { %v333_v16 = vsel %vm280_vm1, %v332_v14, -inf }
  0xde   : > { %334 = vmax.xlane.f32.xlu0 %v333_v16  ;;  %v923_v17 = vpop.f32.mrf.mxu0 }
 0x167   : > { %v335_v20 = vpop.xlane.xlu0 %334 }
 0x168   : > { %v336_v21 = vsub.f32 %v332_v14, %v335_v20 }
 0x16a   : > { %v337_v22 = vmul.f32 1.442695, %v336_v21 }
 0x16c   : > { %1001 = vpow2.f32 %v337_v22 }
 0x179   : > { %v1002_v23 = vpop.eup %1001 }
 0x17a   : > { %v339_v24 = vsel %vm280_vm1, %v1002_v23, 0.0 }
 0x17b   : > { %340 = vadd.xlane.f32.xlu0 %v339_v24 }
 0x191   : > { %527 = vrot.lane.b32.xlu0 %v886_v18, %s1044_s30 }
 0x204   : > { %v341_v27 = vpop.xlane.xlu0 %340 }
 0x205   : > { %1003 = vrcp.f32 %v341_v27 }
 0x208   : > { %v528_v34 = vpop.permute.xlu0 %527 }
 0x209   : > { %v533_v36 = vsel %vm280_vm1, %v528_v34, 0 }
 0x212   : > { %v1004_v28 = vpop.eup %1003 }
 0x213   : > { %v343_v30 = vmul.f32 %v1004_v28, %v1002_v23 }
 0x215   : > { %v344_v32 = vpack.c.bf16 %v343_v30, %v343_v30 }
 0x217   : > { %927 = vmatmul.mubr.msk.bf16.vlgmr.msra.gmra.mxu1 %vm280_vm1, %v344_v32 }
 0x218   : > { %931 = vmatpush3.bf16.xpose.msra.mxu1 %v409_v31  ;;  %932 = vmatprep.mubr.msk.bf16.mxu1 %vm1042_vm0, %v1041_v0 }
 0x219   : > { %942 = vmatprep.subr.bf16.mxu1 %v1041_v0 }
 0x21f   : > { %933 = vmatmul.mubr.msk.bf16.vlgmr.msra.gmra.mxu1 %vm280_vm1, %v399_v33 }
 0x220   : > { %943 = vmatpush3.bf16.xpose.msra.mxu1 %v533_v36  ;;  %944 = vmatprep.mubr.msk.bf16.mxu1 %vm1042_vm0, %v1041_v0 }
 0x221   : > { %954 = vmatprep.subr.bf16.mxu1 %v1041_v0 }
 0x227   : > { %945 = vmatmul.mubr.msk.bf16.vlgmr.msra.gmra.mxu1 %vm280_vm1, %v526_v35 }
 0x228   : > { %955 = vmatpush3.bf16.xpose.msra.mxu1 %v654_v38  ;;  %956 = vmatprep.mubr.msk.bf16.mxu1 %vm1042_vm0, %v1041_v0 }
 0x22f   : > { %957 = vmatmul.mubr.msk.bf16.vlgmr.msra.gmra.mxu1 %vm280_vm1, %v647_v39 }
 0x2d7   : > { %v386_v40 = vpop.f32.mrf.mxu1 }
 0x2d8   : > { %v392_v41 = vpack.c.bf16 %v386_v40, %v386_v40 }
 0x2d9   : > { %v928_v42 = vpop.f32.mrf.mxu1 }
 0x2da   : > { %394 = vst.msk [vmem:[%s1156_s11] sm:$0xf] %vm393_vm4, %v392_v41 }
 0x2db   : > { %v389_v43 = vpop.f32.mrf.mxu1 }
 0x2dd   : > { %v929_v44 = vpop.f32.mrf.mxu1 }
 0x2df   : > { %v445_v45 = vpop.f32.mrf.mxu1 }
 0x2e0   : > { %v451_v46 = vmul.f32 0.35355338, %v445_v45 }
 0x2e1   : > { %v934_v47 = vpop.f32.mrf.mxu1 }
 0x2e2   : > { %v452_v48 = vadd.f32 %v451_v46, %v1117_v10 }
 0x2e3   : > { %v448_v49 = vpop.f32.mrf.mxu1 }
 0x2e4   : > { %v453_v50 = vsel %vm280_vm1, %v452_v48, -inf }
 0x2e5   : > { %454 = vmax.xlane.f32.xlu1 %v453_v50  ;;  %v935_v51 = vpop.f32.mrf.mxu1 }
 0x2e7   : > { %v569_v52 = vpop.f32.mrf.mxu1 }
 0x2e8   : > { %v575_v53 = vmul.f32 0.35355338, %v569_v52 }
 0x2e9   : > { %v946_v54 = vpop.f32.mrf.mxu1 }
 0x2ea   : > { %v576_v55 = vadd.f32 %v575_v53, %v1117_v10 }
 0x2eb   : > { %v572_v56 = vpop.f32.mrf.mxu1 }
 0x2ec   : > { %v577_v57 = vsel %vm280_vm1, %v576_v55, -inf }
 0x2ed   : > { %578 = vmax.xlane.f32.xlu0 %v577_v57  ;;  %v947_v58 = vpop.f32.mrf.mxu1 }
 0x2ef   : > { %v690_v59 = vpop.f32.mrf.mxu1 }
 0x2f0   : > { %v696_v60 = vmul.f32 0.35355338, %v690_v59 }
 0x2f1   : > { %v958_v61 = vpop.f32.mrf.mxu1 }
 0x2f2   : > { %v697_v62 = vadd.f32 %v696_v60, %v1117_v10 }
 0x2f3   : > { %v693_v63 = vpop.f32.mrf.mxu1 }
 0x2f4   : > { %v698_v1 = vsel %vm280_vm1, %v697_v62, -inf }
 0x2f5   : > { %699 = vmax.xlane.f32.xlu1 %v698_v1  ;;  %v959_v2 = vpop.f32.mrf.mxu1 }
 0x36e   : > { %v455_v3 = vpop.xlane.xlu1 %454 }
 0x36f   : > { %v456_v4 = vsub.f32 %v452_v48, %v455_v3 }
 0x371   : > { %v457_v5 = vmul.f32 1.442695, %v456_v4 }
 0x373   : > { %1005 = vpow2.f32 %v457_v5 }
 0x376   : > { %v579_v6 = vpop.xlane.xlu0 %578 }
 0x377   : > { %v580_v7 = vsub.f32 %v576_v55, %v579_v6 }
 0x379   : > { %v581_v8 = vmul.f32 1.442695, %v580_v7 }
 0x37b   : > { %1007 = vpow2.f32 %v581_v8 }
 0x37e   : > { %v700_v14 = vpop.xlane.xlu1 %699 }
 0x37f   : > { %v701_v15 = vsub.f32 %v697_v62, %v700_v14 }
 0x380   : > { %v1006_v9 = vpop.eup %1005 }
 0x381   : > { %v459_v11 = vsel %vm280_vm1, %v1006_v9, 0.0  ;;  %v702_v16 = vmul.f32 1.442695, %v701_v15 }
 0x382   : > { %460 = vadd.xlane.f32.xlu1 %v459_v11 }
 0x383   : > { %1009 = vpow2.f32 %v702_v16 }
 0x388   : > { %v1008_v12 = vpop.eup %1007 }
 0x389   : > { %v583_v10 = vsel %vm280_vm1, %v1008_v12, 0.0 }
 0x38a   : > { %584 = vadd.xlane.f32.xlu0 %v583_v10 }
 0x390   : > { %v1010_v17 = vpop.eup %1009 }
 0x391   : > { %v704_v18 = vsel %vm280_vm1, %v1010_v17, 0.0 }
 0x393   : > { %589 = vrot.lane.b32.xlu1 %v888_v13, %s1044_s30 }
 0x3a0   : > { %468 = vrot.lane.b32.xlu0 %v888_v13, %s1043_s29 }
 0x3b7   : > { %705 = vadd.xlane.f32.xlu1 %v704_v18 }
 0x3c8   : > { %710 = vrot.lane.b32.xlu1 %v888_v13, %s1045_s5 }
 0x40b   : > { %v461_v19 = vpop.xlane.xlu1 %460 }
 0x40c   : > { %1011 = vrcp.f32 %v461_v19 }
 0x40f   : > { %v590_v25 = vpop.permute.xlu1 %589 }
 0x410   : > { %v595_v27 = vsel %vm348_vm3, %v590_v25, 0 }
 0x413   : > { %v585_v20 = vpop.xlane.xlu0 %584 }
 0x414   : > { %1013 = vrcp.f32 %v585_v20 }
 0x417   : > { %v469_v21 = vpop.permute.xlu0 %468 }
 0x418   : > { %v474_v22 = vsel %vm348_vm3, %v469_v21, 0 }
 0x419   : > { %v1012_v23 = vpop.eup %1011  ;;  %937 = vmatpush3.bf16.msra.mxu0 %v474_v22 }
 0x41a   : > { %948 = vmatprep.subr.bf16.mxu0 %v1041_v0  ;;  %v463_v24 = vmul.f32 %v1012_v23, %v1006_v9 }
 0x41c   : > { %v464_v26 = vpack.c.bf16 %v463_v24, %v463_v24 }
 0x41e   : > { %939 = vmatmul.mubr.msk.bf16.vlgmr.msra.gmra.mxu0 %vm280_vm1, %v464_v26 }
 0x41f   : > { %949 = vmatpush3.bf16.msra.mxu0 %v595_v27  ;;  %950 = vmatprep.mubr.msk.bf16.mxu0 %vm1042_vm0, %v1041_v0 }
 0x420   : > { %960 = vmatprep.subr.bf16.mxu0 %v1041_v0 }
 0x421   : > { %v1014_v28 = vpop.eup %1013 }
 0x422   : > { %v587_v29 = vmul.f32 %v1014_v28, %v1008_v12 }
 0x424   : > { %v588_v30 = vpack.c.bf16 %v587_v29, %v587_v29 }
 0x426   : > { %951 = vmatmul.mubr.msk.bf16.vlgmr.msra.gmra.mxu0 %vm280_vm1, %v588_v30 }
 0x427   : > { %962 = vmatprep.mubr.msk.bf16.mxu0 %vm1042_vm0, %v1041_v0 }
 0x440   : > { %v706_v31 = vpop.xlane.xlu1 %705 }
 0x441   : > { %1015 = vrcp.f32 %v706_v31 }
 0x444   : > { %v711_v32 = vpop.permute.xlu1 %710 }
 0x445   : > { %v716_v33 = vsel %vm348_vm3, %v711_v32, 0 }
 0x446   : > { %961 = vmatpush3.bf16.msra.mxu0 %v716_v33 }
 0x44e   : > { %v1016_v34 = vpop.eup %1015 }
 0x44f   : > { %v708_v35 = vmul.f32 %v1016_v34, %v1010_v17 }
 0x451   : > { %v709_v36 = vpack.c.bf16 %v708_v35, %v708_v35 }
 0x453   : > { %963 = vmatmul.mubr.msk.bf16.vlgmr.msra.gmra.mxu0 %vm280_vm1, %v709_v36 }
 0x4de   : > { %v510_v37 = vpop.f32.mrf.mxu0 }
 0x4df   : > { %v899_v38 = vpack.c.bf16 %v510_v37, %v510_v37 }
 0x4e0   : > { %v940_v39 = vpop.f32.mrf.mxu0 }
 0x4e1   : > { %520 = vrot.lane.b32.xlu0 %v899_v38, %s1046_s12 }
 0x4e2   : > { %v513_v40 = vpop.f32.mrf.mxu0 }
 0x4e4   : > { %v941_v41 = vpop.f32.mrf.mxu0 }
 0x4e6   : > { %v631_v42 = vpop.f32.mrf.mxu0 }
 0x4e7   : > { %v900_v0 = vpack.c.bf16 %v631_v42, %v631_v42 }
 0x4e8   : > { %v952_v43 = vpop.f32.mrf.mxu0 }
 0x4e9   : > { %641 = vrot.lane.b32.xlu1 %v900_v0, %s1047_s13 }
 0x4ea   : > { %v634_v44 = vpop.f32.mrf.mxu0 }
 0x4ec   : > { %v953_v45 = vpop.f32.mrf.mxu0 }
 0x513   : > { %v752_v46 = vpop.f32.mrf.mxu0 }
 0x514   : > { %v901_v47 = vpack.c.bf16 %v752_v46, %v752_v46 }
 0x515   : > { %v964_v48 = vpop.f32.mrf.mxu0 }
 0x516   : > { %762 = vrot.lane.b32.xlu0 %v901_v47, %s1048_s14 }
 0x517   : > { %v755_v49 = vpop.f32.mrf.mxu0 }
 0x519   : > { %v965_v50 = vpop.f32.mrf.mxu0 }
 0x553   : > { %v521_v51 = vpop.permute.xlu0 %520 }
 0x554   : > { %524 = vst.msk [vmem:[%s1156_s11] sm:$0xf] %vm523_vm5, %v521_v51 }
 0x55b   : > { %v642_v52 = vpop.permute.xlu1 %641 }
 0x55c   : > { %645 = vst.msk [vmem:[%s1156_s11] sm:$0xf] %vm644_vm6, %v642_v52 }
 0x588   : > { %v763_v53 = vpop.permute.xlu0 %762 }
 0x589   : > { %766 = vst.msk [vmem:[%s1156_s11] sm:$0xf] %vm765_vm7, %v763_v53 }
 0x58a PF: > { %s14_s17 = sadd.s32 1, %s1039_s17   ;;  %s1202_s15 = smov %s1035_s16 }
 0x58b   : > { %p11_p5 = scmp.ge.s32.totalorder %s14_s17, 4   ;;  %s1203_s16 = smov %s1205_s18 }
 0x58d   :  { %13 = sbr.rel (!%p11_p5) target bundleno = 2 (0x2), region = 75 }

// kernel: decoder_forward.24
= control target key start
LH: loop header
LB: loop body
LE: loop exit
PB: predicated region body
PF: predicated region fallthrough
CT: control target
= control target key end

     0   :  { %vm31_vm0 = vcmask 261120   ;;  %v2596_v35 = vmov 0   ;;  %s3280_s0 = inlined_call_operand.vmem [shape: f32[16,32], index: 0, kind: input, shape index: {}]   ;;  %s3281_s3 = inlined_call_operand.vmem [shape: bf16[32,2048], index: 3, kind: input, shape index: {}]   ;;  %s3282_s5 = inlined_call_operand.vmem [shape: bf16[2048,32], index: 5, kind: input, shape index: {}]   ;;  %s3283_s1 = inlined_call_operand.vmem [shape: f32[1,32], index: 1, kind: input, shape index: {}]   ;;  %s3284_s2 = inlined_call_operand.vmem [shape: f32[1,32], index: 2, kind: input, shape index: {}]   ;;  %s3285_s4 = inlined_call_operand.vmem [shape: f32[1,2048], index: 4, kind: input, shape index: {}]   ;;  %s3286_s6 = inlined_call_operand.vmem [shape: f32[1,32], index: 6, kind: input, shape index: {}]   ;;  %s3287_s7 = inlined_call_operand.vmem [shape: f32[16,32], index: 7, kind: output, shape index: {}]  }
   0x1   :  { %v27_v0 = vld [vmem:[%s3280_s0] sm:$0xff]  ;;  %v28_v1 = vld [vmem:[%s3280_s0 + $0x8] sm:$0xff]  ;;  %v94_v30 = vld [vmem:[%s3281_s3 + $0x90] sm:$0xff]  ;;  %387 = vmatprep.mubr.bf16.mxu0 %v2596_v35  ;;  %430 = vmatprep.mubr.bf16.mxu1 %v2596_v35 }
   0x2   :  { %v32_v2 = vsel %vm31_vm0, %v27_v0, 0.0  ;;  %v35_v3 = vsel %vm31_vm0, %v28_v1, 0.0  ;;  %v92_v14 = vld [vmem:[%s3281_s3 + $0x80] sm:$0xff]  ;;  %v93_v16 = vld [vmem:[%s3281_s3 + $0x88] sm:$0xff]  ;;  %v102_v31 = vld [vmem:[%s3281_s3 + $0xd0] sm:$0xff] }
   0x3   :  { %33 = vadd.xlane.f32.xlu0 %v32_v2  ;;  %v100_v15 = vld [vmem:[%s3281_s3 + $0xc0] sm:$0xff]  ;;  %v101_v18 = vld [vmem:[%s3281_s3 + $0xc8] sm:$0xff]  ;;  %v95_v32 = vld [vmem:[%s3281_s3 + $0x98] sm:$0xff]  ;;  %v2137_v33 = vcombine.high %v94_v30, %v102_v31  ;;  %v2136_v36 = vcombine.low %v94_v30, %v102_v31 }
   0x4   :  { %v2133_v17 = vcombine.high %v92_v14, %v100_v15  ;;  %v2135_v19 = vcombine.high %v93_v16, %v101_v18  ;;  %v2132_v20 = vcombine.low %v92_v14, %v100_v15  ;;  %v2134_v21 = vcombine.low %v93_v16, %v101_v18  ;;  %v76_v22 = vld [vmem:[%s3281_s3] sm:$0xff]  ;;  %v77_v24 = vld [vmem:[%s3281_s3 + $0x8] sm:$0xff]  ;;  %v103_v34 = vld [vmem:[%s3281_s3 + $0xd8] sm:$0xff] }
   0x5   :  { %v84_v23 = vld [vmem:[%s3281_s3 + $0x40] sm:$0xff]  ;;  %v85_v26 = vld [vmem:[%s3281_s3 + $0x48] sm:$0xff]  ;;  %v2138_v37 = vcombine.low %v95_v32, %v103_v34  ;;  %v2139_v38 = vcombine.high %v95_v32, %v103_v34  ;;  %v78_v53 = vld [vmem:[%s3281_s3 + $0x10] sm:$0xff] }
   0x6   :  { %367 = vmatprep.subr.bf16.mxu0 %v2133_v17  ;;  %410 = vmatprep.subr.bf16.mxu1 %v2135_v19  ;;  %v2117_v25 = vcombine.high %v76_v22, %v84_v23  ;;  %v2119_v27 = vcombine.high %v77_v24, %v85_v26  ;;  %v2116_v28 = vcombine.low %v76_v22, %v84_v23  ;;  %v2114_v46 = vld [vmem:[%s3283_s1] ss:$0 sm:$0xff]  ;;  %v86_v54 = vld [vmem:[%s3281_s3 + $0x50] sm:$0xff]  ;;  %v79_v55 = vld [vmem:[%s3281_s3 + $0x18] sm:$0xff] }
   0x7   :  { %36 = vadd.xlane.f32.xlu0 %v35_v3  ;;  %368 = vmatpush1.bf16.msra.mxu0 %v2132_v20  ;;  %v2118_v29 = vcombine.low %v77_v24, %v85_v26  ;;  %v2115_v51 = vld [vmem:[%s3284_s2] ss:$0 sm:$0xff]  ;;  %v87_v56 = vld [vmem:[%s3281_s3 + $0x58] sm:$0xff]  ;;  %v2121_v60 = vcombine.high %v78_v53, %v86_v54  ;;  %v2120_v2 = vcombine.low %v78_v53, %v86_v54  ;;  %v98_v14 = vld [vmem:[%s3281_s3 + $0xb0] sm:$0xff] }
   0x8   :  { %411 = vmatpush1.bf16.msra.mxu1 %v2134_v21  ;;  %369 = vmatprep.subr.bf16.mxu0 %v2117_v25  ;;  %v2123_v61 = vcombine.high %v79_v55, %v87_v56  ;;  %v96_v62 = vld [vmem:[%s3281_s3 + $0xa0] sm:$0xff]  ;;  %v2122_v3 = vcombine.low %v79_v55, %v87_v56  ;;  %v106_v15 = vld [vmem:[%s3281_s3 + $0xf0] sm:$0xff]  ;;  %v99_v16 = vld [vmem:[%s3281_s3 + $0xb8] sm:$0xff] }
   0x9   :  { %412 = vmatprep.subr.bf16.mxu1 %v2119_v27  ;;  %v104_v63 = vld [vmem:[%s3281_s3 + $0xe0] sm:$0xff]  ;;  %v107_v17 = vld [vmem:[%s3281_s3 + $0xf8] sm:$0xff]  ;;  %v2145_v20 = vcombine.high %v98_v14, %v106_v15  ;;  %v82_v22 = vld [vmem:[%s3281_s3 + $0x30] sm:$0xff]  ;;  %v2144_v26 = vcombine.low %v98_v14, %v106_v15 }
   0xa   :  { %v2147_v21 = vcombine.high %v99_v16, %v107_v17  ;;  %v90_v23 = vld [vmem:[%s3281_s3 + $0x70] sm:$0xff]  ;;  %v83_v24 = vld [vmem:[%s3281_s3 + $0x38] sm:$0xff]  ;;  %v2146_v27 = vcombine.low %v99_v16, %v107_v17  ;;  %v2486_v56 = vld [vmem:[%s3282_s5 + $0x48] sm:$0xff]  }
   0xb   :  { %370 = vmatpush1.bf16.msra.mxu0 %v2116_v28  ;;  %v91_v25 = vld [vmem:[%s3281_s3 + $0x78] sm:$0xff]  ;;  %v2129_v28 = vcombine.high %v82_v22, %v90_v23  ;;  %v2128_v30 = vcombine.low %v82_v22, %v90_v23  ;;  %v2483_v53 = vld [vmem:[%s3282_s5 + $0xd0] sm:$0xff]  }
   0xc   :  { %413 = vmatpush1.bf16.msra.mxu1 %v2118_v29  ;;  %453 = vmatprep.subr.bf16.mxu0 %v2137_v33  ;;  %v2131_v29 = vcombine.high %v83_v24, %v91_v25  ;;  %v2130_v31 = vcombine.low %v83_v24, %v91_v25  ;;  %v2462_v32 = vld [vmem:[%s3282_s5 + $0x78] sm:$0xff]   ;;  %v2484_v54 = vld [vmem:[%s3282_s5 + $0x10] sm:$0xff]  }
   0xd   :  { %496 = vmatprep.subr.bf16.mxu1 %v2139_v38  ;;  %v2463_v33 = vld [vmem:[%s3282_s5 + $0xf8] sm:$0xff]   ;;  %v2468_v38 = vld [vmem:[%s3282_s5 + $0x30] sm:$0xff]  }
   0xe   :  { %v2464_v34 = vld [vmem:[%s3282_s5 + $0x38] sm:$0xff]   ;;  %v2485_v55 = vld [vmem:[%s3282_s5 + $0x90] sm:$0xff]  }
  0x8c   :  { %v34_v4 = vpop.xlane.xlu0 %33 }
  0x8d   :  { %v39_v5 = vmul.f32 0.03125, %v34_v4  ;;  %v2141_v4 = vcombine.high %v96_v62, %v104_v63 }
  0x8f   :  { %v41_v6 = vsub.f32 %v27_v0, %v39_v5  ;;  %v97_v0 = vld [vmem:[%s3281_s3 + $0xa8] sm:$0xff] }
  0x90   :  { %v37_v7 = vpop.xlane.xlu0 %36 }
  0x91   :  { %v40_v8 = vmul.f32 0.03125, %v37_v7  ;;  %v43_v9 = vmul.f32 %v41_v6, %v41_v6  ;;  %v88_v7 = vld [vmem:[%s3281_s3 + $0x60] sm:$0xff] }
  0x93   :  { %v42_v10 = vsub.f32 %v28_v1, %v40_v8  ;;  %v45_v11 = vsel %vm31_vm0, %v43_v9, 0.0  ;;  %v105_v1 = vld [vmem:[%s3281_s3 + $0xe8] sm:$0xff] }
  0x94   :  { %46 = vadd.xlane.f32.xlu1 %v45_v11  ;;  %v2143_v5 = vcombine.high %v97_v0, %v105_v1  ;;  %v81_v8 = vld [vmem:[%s3281_s3 + $0x28] sm:$0xff]  ;;  %v2142_v11 = vcombine.low %v97_v0, %v105_v1  ;;  %v2494_v0 = vld [vmem:[%s3282_s5 + $0x178] sm:$0xff]  }
  0x95   :  { %v44_v12 = vmul.f32 %v42_v10, %v42_v10  ;;  %v89_v9 = vld [vmem:[%s3281_s3 + $0x68] sm:$0xff]  ;;  %v2495_v1 = vld [vmem:[%s3282_s5 + $0x1f8] sm:$0xff]  }
  0x96   :  { %v2126_v19 = vcombine.low %v81_v8, %v89_v9 }
  0x97   :  { %v48_v13 = vsel %vm31_vm0, %v44_v12, 0.0 }
  0x98   :  { %49 = vadd.xlane.f32.xlu1 %v48_v13  ;;  %v2127_v13 = vcombine.high %v81_v8, %v89_v9  ;;  %v2886_v8 = vld [vmem:[%s3285_s4] sm:$0xff] }
 0x11d   :  { %v47_v39 = vpop.xlane.xlu1 %46 }
 0x11e   :  { %v51_v40 = vmul.f32 0.03125, %v47_v39  ;;  %v2469_v39 = vld [vmem:[%s3282_s5 + $0xb0] sm:$0xff]  }
 0x120   :  { %v53_v41 = vadd.f32 1e-05, %v51_v40  ;;  %v2470_v40 = vld [vmem:[%s3282_s5 + $0x68] sm:$0xff]  }
 0x121   :  { %v50_v42 = vpop.xlane.xlu1 %49 }
 0x122   :  { %2590 = vrsqrt.f32 %v53_v41  ;;  %v52_v43 = vmul.f32 0.03125, %v50_v42  ;;  %v2471_v41 = vld [vmem:[%s3282_s5 + $0xe8] sm:$0xff]  }
 0x123   :  { %v2472_v42 = vld [vmem:[%s3282_s5 + $0x28] sm:$0xff]  }
 0x124   :  { %v54_v44 = vadd.f32 1e-05, %v52_v43  ;;  %v2473_v43 = vld [vmem:[%s3282_s5 + $0xa8] sm:$0xff]  }
 0x126   :  { %2592 = vrsqrt.f32 %v54_v44  ;;  %v2474_v44 = vld [vmem:[%s3282_s5 + $0x60] sm:$0xff]  }
 0x12f   :  { %v2591_v45 = vpop.eup %2590 }
 0x130   :  { %v57_v47 = vmul.f32 %v2591_v45, %v41_v6  ;;  %v80_v6 = vld [vmem:[%s3281_s3 + $0x20] sm:$0xff] }
 0x131   :  { %v2125_v12 = vcombine.high %v80_v6, %v88_v7  ;;  %v2124_v18 = vcombine.low %v80_v6, %v88_v7  ;;  %v2475_v45 = vld [vmem:[%s3282_s5 + $0xe0] sm:$0xff]  }
 0x132   :  { %v65_v49 = vmul.f32 %v2114_v46, %v57_v47  ;;  %v2477_v47 = vld [vmem:[%s3282_s5 + $0xa0] sm:$0xff]  }
 0x133   :  { %v2593_v48 = vpop.eup %2592 }
 0x134   :  { %v58_v50 = vmul.f32 %v2593_v48, %v42_v10  ;;  %v73_v57 = vadd.f32 %v2115_v51, %v65_v49  ;;  %v2140_v10 = vcombine.low %v96_v62, %v104_v63  ;;  %v2478_v48 = vld [vmem:[%s3282_s5 + $0x58] sm:$0xff]   ;;  %v2492_v62 = vld [vmem:[%s3282_s5] sm:$0xff]  }
 0x135   :  { %v2479_v49 = vld [vmem:[%s3282_s5 + $0xd8] sm:$0xff]   ;;  %v2493_v63 = vld [vmem:[%s3282_s5 + $0x80] sm:$0xff]  }
 0x136   :  { %v66_v52 = vmul.f32 %v2114_v46, %v58_v50  ;;  %v2476_v46 = vld [vmem:[%s3282_s5 + $0x20] sm:$0xff]   ;;  %v2480_v50 = vld [vmem:[%s3282_s5 + $0x18] sm:$0xff]  }
 0x138   :  { %v74_v58 = vadd.f32 %v2115_v51, %v66_v52  ;;  %v2481_v51 = vld [vmem:[%s3282_s5 + $0x98] sm:$0xff]   ;;  %v2482_v52 = vld [vmem:[%s3282_s5 + $0x50] sm:$0xff]  }
 0x13a   :  { %v2703_v59 = vpack.c.bf16 %v74_v58, %v73_v57  ;;  %v2487_v57 = vld [vmem:[%s3282_s5 + $0xc8] sm:$0xff]  }
 0x13b   :  { %v2488_v58 = vld [vmem:[%s3282_s5 + $0x8] sm:$0xff]  }
 0x13c   :  { %2148 = vmatmul.mubr.msk.bf16.vlgmr.msra.gmra.mxu0 %vm31_vm0, %v2703_v59  ;;  %2149 = vmatmul.mubr.msk.bf16.vlgmr.msra.gmra.mxu1 %vm31_vm0, %v2703_v59 }
 0x13d   :  { %454 = vmatpush1.bf16.msra.mxu0 %v2136_v36  ;;  %497 = vmatpush1.bf16.msra.mxu1 %v2138_v37  ;;  %v2465_v36 = vld [vmem:[%s3282_s5 + $0xb8] sm:$0xff]   ;;  %v2466_v37 = vld [vmem:[%s3282_s5 + $0x70] sm:$0xff]  }
 0x13e   :  { %455 = vmatprep.subr.bf16.mxu0 %v2121_v60  ;;  %498 = vmatprep.subr.bf16.mxu1 %v2123_v61  ;;  %v2490_v60 = vld [vmem:[%s3282_s5 + $0x40] sm:$0xff]  }
 0x13f   :  { %473 = vmatprep.mubr.bf16.mxu0 %v2596_v35  ;;  %516 = vmatprep.mubr.bf16.mxu1 %v2596_v35  ;;  %v2491_v61 = vld [vmem:[%s3282_s5 + $0xc0] sm:$0xff]  }
 0x141   :  { %456 = vmatpush1.bf16.msra.mxu0 %v2120_v2  ;;  %499 = vmatpush1.bf16.msra.mxu1 %v2122_v3  ;;  %v112_v2 = vlaneseq }
 0x142   :  { %539 = vmatprep.subr.bf16.mxu0 %v2141_v4  ;;  %582 = vmatprep.subr.bf16.mxu1 %v2143_v5 }
 0x143   :  { %v2877_v3 = vshrl.u32 %v112_v2, 7 }
 0x144   :  { %2150 = vmatmul.mubr.msk.bf16.vlgmr.msra.gmra.mxu0 %vm31_vm0, %v2703_v59  ;;  %2151 = vmatmul.mubr.msk.bf16.vlgmr.msra.gmra.mxu1 %vm31_vm0, %v2703_v59 }
 0x145   :  { %540 = vmatpush1.bf16.msra.mxu0 %v2140_v10  ;;  %583 = vmatpush1.bf16.msra.mxu1 %v2142_v11  ;;  %v118_v4 = vsub.s32 1, %v2877_v3  ;;  %v126_v5 = vsub.s32 3, %v2877_v3  ;;  %v114_v6 = vsub.s32 0, %v2877_v3  ;;  %v122_v7 = vsub.s32 2, %v2877_v3 }
 0x146   :  { %541 = vmatprep.subr.bf16.mxu0 %v2125_v12  ;;  %584 = vmatprep.subr.bf16.mxu1 %v2127_v13 }
 0x147   :  { %559 = vmatprep.mubr.bf16.mxu0 %v2596_v35  ;;  %602 = vmatprep.mubr.bf16.mxu1 %v2596_v35  ;;  %v119_v11 = vrot.slane %v2886_v8, %v118_v4  ;;  %v127_v12 = vrot.slane %v2886_v8, %v126_v5  ;;  %v115_v13 = vrot.slane %v2886_v8, %v114_v6 }
 0x148   :  { %v123_v14 = vrot.slane %v2886_v8, %v122_v7 }
 0x149   :  { %542 = vmatpush1.bf16.msra.mxu0 %v2124_v18  ;;  %585 = vmatpush1.bf16.msra.mxu1 %v2126_v19  ;;  %v134_v19 = vsub.s32 5, %v2877_v3 }
 0x14a   :  { %625 = vmatprep.subr.bf16.mxu0 %v2145_v20  ;;  %668 = vmatprep.subr.bf16.mxu1 %v2147_v21  ;;  %v142_v20 = vsub.s32 7, %v2877_v3 }
 0x14c   :  { %2152 = vmatmul.mubr.msk.bf16.vlgmr.msra.gmra.mxu0 %vm31_vm0, %v2703_v59  ;;  %2153 = vmatmul.mubr.msk.bf16.vlgmr.msra.gmra.mxu1 %vm31_vm0, %v2703_v59 }
 0x14d   :  { %626 = vmatpush1.bf16.msra.mxu0 %v2144_v26  ;;  %669 = vmatpush1.bf16.msra.mxu1 %v2146_v27 }
 0x14e   :  { %627 = vmatprep.subr.bf16.mxu0 %v2129_v28  ;;  %670 = vmatprep.subr.bf16.mxu1 %v2131_v29 }
 0x14f   :  { %645 = vmatprep.mubr.bf16.mxu0 %v2596_v35  ;;  %688 = vmatprep.mubr.bf16.mxu1 %v2596_v35  ;;  %v2467_v35 = vld [vmem:[%s3282_s5 + $0xf0] sm:$0xff]  }
 0x151   :  { %628 = vmatpush1.bf16.msra.mxu0 %v2128_v30  ;;  %671 = vmatpush1.bf16.msra.mxu1 %v2130_v31 }
 0x152   :  { %2285 = vmatprep.subr.bf16.mxu0 %v2462_v32  ;;  %2307 = vmatprep.subr.bf16.mxu1 %v2463_v33 }
 0x154   :  { %2154 = vmatmul.mubr.msk.bf16.vlgmr.msra.gmra.mxu0 %vm31_vm0, %v2703_v59  ;;  %2155 = vmatmul.mubr.msk.bf16.vlgmr.msra.gmra.mxu1 %vm31_vm0, %v2703_v59  ;;  %v2489_v59 = vld [vmem:[%s3282_s5 + $0x88] sm:$0xff]  }
 0x155   :  { %2286 = vmatpush3.bf16.msra.mxu0 %v2464_v34  ;;  %2308 = vmatpush3.bf16.msra.mxu1 %v2465_v36  ;;  %v135_v36 = vrot.slane %v2886_v8, %v134_v19 }
 0x156   :  { %2287 = vmatprep.subr.bf16.mxu0 %v2466_v37  ;;  %2309 = vmatprep.subr.bf16.mxu1 %v2467_v35  ;;  %v143_v37 = vrot.slane %v2886_v8, %v142_v20 }
 0x159   :  { %2288 = vmatpush3.bf16.msra.mxu0 %v2468_v38  ;;  %2310 = vmatpush3.bf16.msra.mxu1 %v2469_v39 }
 0x15a   :  { %2289 = vmatprep.subr.bf16.mxu0 %v2470_v40  ;;  %2311 = vmatprep.subr.bf16.mxu1 %v2471_v41 }
 0x15d   :  { %2290 = vmatpush3.bf16.msra.mxu0 %v2472_v42  ;;  %2312 = vmatpush3.bf16.msra.mxu1 %v2473_v43 }
 0x15e   :  { %2291 = vmatprep.subr.bf16.mxu0 %v2474_v44  ;;  %2313 = vmatprep.subr.bf16.mxu1 %v2475_v45 }
 0x161   :  { %2292 = vmatpush3.bf16.msra.mxu0 %v2476_v46  ;;  %2314 = vmatpush3.bf16.msra.mxu1 %v2477_v47  ;;  %v2496_v47 = vld [vmem:[%s3282_s5 + $0x138] sm:$0xff]  }
 0x162   :  { %2293 = vmatprep.subr.bf16.mxu0 %v2478_v48  ;;  %2315 = vmatprep.subr.bf16.mxu1 %v2479_v49  ;;  %v2497_v48 = vld [vmem:[%s3282_s5 + $0x1b8] sm:$0xff]  }
 0x165   :  { %2294 = vmatpush3.bf16.msra.mxu0 %v2480_v50  ;;  %2316 = vmatpush3.bf16.msra.mxu1 %v2481_v51 }
 0x166   :  { %2295 = vmatprep.subr.bf16.mxu0 %v2482_v52  ;;  %2317 = vmatprep.subr.bf16.mxu1 %v2483_v53  ;;  %v2498_v53 = vld [vmem:[%s3282_s5 + $0x170] sm:$0xff]  }
 0x169   :  { %2296 = vmatpush3.bf16.msra.mxu0 %v2484_v54  ;;  %2318 = vmatpush3.bf16.msra.mxu1 %v2485_v55  ;;  %v2499_v54 = vld [vmem:[%s3282_s5 + $0x1f0] sm:$0xff]  }
 0x16a   :  { %2297 = vmatprep.subr.bf16.mxu0 %v2486_v56  ;;  %2319 = vmatprep.subr.bf16.mxu1 %v2487_v57 }
 0x16d   :  { %2298 = vmatpush3.bf16.msra.mxu0 %v2488_v58  ;;  %2320 = vmatpush3.bf16.msra.mxu1 %v2489_v59 }
 0x16e   :  { %2299 = vmatprep.subr.bf16.mxu0 %v2490_v60  ;;  %2321 = vmatprep.subr.bf16.mxu1 %v2491_v61  ;;  %v2500_v61 = vld [vmem:[%s3282_s5 + $0x130] sm:$0xff]  }
 0x171   :  { %2300 = vmatpush3.bf16.msra.mxu0 %v2492_v62  ;;  %2322 = vmatpush3.bf16.msra.mxu1 %v2493_v63  ;;  %v2501_v62 = vld [vmem:[%s3282_s5 + $0x1b0] sm:$0xff]   ;;  %v2502_v63 = vld [vmem:[%s3282_s5 + $0x168] sm:$0xff]  }
 0x172   :  { %2329 = vmatprep.subr.bf16.mxu0 %v2494_v0  ;;  %2351 = vmatprep.subr.bf16.mxu1 %v2495_v1 }
 0x1fc   :  { %v389_v9 = vpop.f32.mrf.mxu0  ;;  %v432_v10 = vpop.f32.mrf.mxu1 }
 0x1fd   :  { %v390_v25 = vadd.f32 %v389_v9, %v115_v13  ;;  %v433_v26 = vadd.f32 %v432_v10, %v123_v14  ;;  %v2503_v10 = vld [vmem:[%s3282_s5 + $0x1e8] sm:$0xff]  }
 0x1fe   :  { %v391_v15 = vpop.f32.mrf.mxu0  ;;  %v434_v16 = vpop.f32.mrf.mxu1 }
 0x1ff   :  { %v392_v21 = vadd.f32 %v391_v15, %v119_v11  ;;  %v435_v22 = vadd.f32 %v434_v16, %v127_v12  ;;  %v699_v41 = vmax.f32 %v390_v25, 0.0  ;;  %v701_v42 = vmax.f32 %v433_v26, 0.0  ;;  %v2506_v15 = vld [vmem:[%s3282_s5 + $0x160] sm:$0xff]   ;;  %v2512_v26 = vld [vmem:[%s3282_s5 + $0x118] sm:$0xff]  }
 0x200   :  { %v393_v17 = vpop.f32.mrf.mxu0  ;;  %v436_v18 = vpop.f32.mrf.mxu1  ;;  %v2507_v16 = vld [vmem:[%s3282_s5 + $0x1e0] sm:$0xff]  }
 0x201   :  { %v394_v23 = vadd.f32 %v393_v17, %v115_v13  ;;  %v437_v24 = vadd.f32 %v436_v18, %v123_v14  ;;  %v700_v35 = vmax.f32 %v392_v21, 0.0  ;;  %v702_v38 = vmax.f32 %v435_v22, 0.0  ;;  %v2504_v13 = vld [vmem:[%s3282_s5 + $0x128] sm:$0xff]   ;;  %v2508_v18 = vld [vmem:[%s3282_s5 + $0x120] sm:$0xff]  }
 0x202   :  { %v395_v27 = vpop.f32.mrf.mxu0  ;;  %v438_v28 = vpop.f32.mrf.mxu1  ;;  %v2505_v14 = vld [vmem:[%s3282_s5 + $0x1a8] sm:$0xff]   ;;  %v2509_v22 = vld [vmem:[%s3282_s5 + $0x1a0] sm:$0xff]  }
 0x203   :  { %v396_v29 = vadd.f32 %v395_v27, %v119_v11  ;;  %v439_v30 = vadd.f32 %v438_v28, %v127_v12  ;;  %v715_v31 = vmax.f32 %v394_v23, 0.0  ;;  %v717_v32 = vmax.f32 %v437_v24, 0.0  ;;  %v2510_v23 = vld [vmem:[%s3282_s5 + $0x158] sm:$0xff]  }
 0x204   :  { %v2902_v33 = vpop.f32.mrf.mxu0  ;;  %v2904_v34 = vpop.f32.mrf.mxu1  ;;  %v2511_v24 = vld [vmem:[%s3282_s5 + $0x1d8] sm:$0xff]  }
 0x205   :  { %v716_v39 = vmax.f32 %v396_v29, 0.0  ;;  %v718_v40 = vmax.f32 %v439_v30, 0.0  ;;  %v731_v49 = vpack.c.bf16 %v715_v31, %v699_v41  ;;  %v733_v50 = vpack.c.bf16 %v717_v32, %v701_v42  ;;  %v2513_v28 = vld [vmem:[%s3282_s5 + $0x198] sm:$0xff]   ;;  %v2514_v29 = vld [vmem:[%s3282_s5 + $0x150] sm:$0xff]  }
 0x206   :  { %v477_v43 = vpop.f32.mrf.mxu0  ;;  %v520_v44 = vpop.f32.mrf.mxu1  ;;  %v2515_v30 = vld [vmem:[%s3282_s5 + $0x1d0] sm:$0xff]   ;;  %v130_v31 = vsub.s32 4, %v2877_v3  ;;  %v138_v32 = vsub.s32 6, %v2877_v3 }
 0x207   :  { %v732_v45 = vpack.c.bf16 %v716_v39, %v700_v35  ;;  %v734_v46 = vpack.c.bf16 %v718_v40, %v702_v38  ;;  %v478_v55 = vadd.f32 %v477_v43, %v135_v36  ;;  %v521_v56 = vadd.f32 %v520_v44, %v143_v37  ;;  %v2517_v38 = vld [vmem:[%s3282_s5 + $0x190] sm:$0xff]   ;;  %v2518_v39 = vld [vmem:[%s3282_s5 + $0x148] sm:$0xff]  }
 0x208   :  { %v2918_v51 = vpop.f32.mrf.mxu0  ;;  %v2920_v52 = vpop.f32.mrf.mxu1  ;;  %v2519_v40 = vld [vmem:[%s3282_s5 + $0x1c8] sm:$0xff]   ;;  %v131_v41 = vrot.slane %v2886_v8, %v130_v31  ;;  %v139_v42 = vrot.slane %v2886_v8, %v138_v32 }
 0x209   :  { %1810 = vmatprep.mubr.bf16.mxu0 %v732_v45  ;;  %1851 = vmatprep.mubr.bf16.mxu1 %v734_v46  ;;  %v704_v0 = vmax.f32 %v478_v55, 0.0  ;;  %v706_v1 = vmax.f32 %v521_v56, 0.0  ;;  %v3007_v43 = vld [vmem:[%s3285_s4 + $0x8] sm:$0xff] }
 0x20a   :  { %v481_v57 = vpop.f32.mrf.mxu0  ;;  %v524_v58 = vpop.f32.mrf.mxu1  ;;  %1811 = vmatmul.mubr.bf16.vlgmr.msra.gmra.mxu0 %v731_v49  ;;  %1852 = vmatmul.mubr.bf16.vlgmr.msra.gmra.mxu1 %v733_v50  ;;  %v2520_v45 = vld [vmem:[%s3282_s5 + $0x108] sm:$0xff]   ;;  %v480_v46 = vadd.f32 %v2918_v51, %v131_v41  ;;  %v2522_v49 = vld [vmem:[%s3282_s5 + $0x140] sm:$0xff]   ;;  %v523_v50 = vadd.f32 %v2920_v52, %v139_v42  ;;  %v159_v51 = vrot.slane %v3007_v43, %v126_v5 }
 0x20b   :  { %v482_v59 = vadd.f32 %v481_v57, %v135_v36  ;;  %v525_v60 = vadd.f32 %v524_v58, %v143_v37  ;;  %2330 = vmatpush3.bf16.msra.mxu0 %v2496_v47  ;;  %2352 = vmatpush3.bf16.msra.mxu1 %v2497_v48  ;;  %v2516_v37 = vld [vmem:[%s3282_s5 + $0x110] sm:$0xff]   ;;  %v151_v47 = vrot.slane %v3007_v43, %v118_v4  ;;  %v2521_v8 = vld [vmem:[%s3282_s5 + $0x188] sm:$0xff]   ;;  %v2523_v4 = vld [vmem:[%s3282_s5 + $0x1c0] sm:$0xff]  }
 0x20c   :  { %2331 = vmatprep.subr.bf16.mxu0 %v2498_v53  ;;  %2353 = vmatprep.subr.bf16.mxu1 %v2499_v54  ;;  %v2952_v17 = vpop.f32.mrf.mxu0  ;;  %v2957_v21 = vpop.f32.mrf.mxu1  ;;  %v476_v53 = vadd.f32 %v2902_v33, %v131_v41  ;;  %v519_v55 = vadd.f32 %v2904_v34, %v139_v42  ;;  %v2524_v52 = vld [vmem:[%s3282_s5 + $0x100] sm:$0xff]   ;;  %v719_v57 = vmax.f32 %v480_v46, 0.0  ;;  %v2526_v33 = vld [vmem:[%s3282_s5 + $0x278] sm:$0xff]   ;;  %v2546_v46 = vld [vmem:[%s3282_s5 + $0x250] sm:$0xff]  }
 0x20d   :  { %v720_v2 = vmax.f32 %v482_v59, 0.0  ;;  %v722_v9 = vmax.f32 %v525_v60, 0.0  ;;  %v2525_v5 = vld [vmem:[%s3282_s5 + $0x180] sm:$0xff]   ;;  %v721_v59 = vmax.f32 %v523_v50, 0.0  ;;  %v2527_v60 = vld [vmem:[%s3282_s5 + $0x2f8] sm:$0xff]   ;;  %v2549_v50 = vld [vmem:[%s3282_s5 + $0x290] sm:$0xff]  }
 0x20e   :  { %v563_v25 = vpop.f32.mrf.mxu0  ;;  %v606_v27 = vpop.f32.mrf.mxu1  ;;  %v2544_v42 = vld [vmem:[%s3282_s5 + $0x218] sm:$0xff]  }
 0x20f   :  { %v736_v11 = vpack.c.bf16 %v720_v2, %v704_v0  ;;  %v738_v12 = vpack.c.bf16 %v722_v9, %v706_v1  ;;  %2332 = vmatpush3.bf16.msra.mxu0 %v2500_v61  ;;  %2354 = vmatpush3.bf16.msra.mxu1 %v2501_v62  ;;  %v564_v58 = vadd.f32 %v563_v25, %v151_v47  ;;  %v703_v61 = vmax.f32 %v476_v53, 0.0  ;;  %v2528_v1 = vld [vmem:[%s3282_s5 + $0x238] sm:$0xff]   ;;  %v2536_v25 = vld [vmem:[%s3282_s5 + $0x228] sm:$0xff]  }
 0x210   :  { %2333 = vmatprep.subr.bf16.mxu0 %v2502_v63  ;;  %2355 = vmatprep.subr.bf16.mxu1 %v2503_v10  ;;  %v2982_v36 = vpop.f32.mrf.mxu0  ;;  %v2987_v35 = vpop.f32.mrf.mxu1  ;;  %v607_v34 = vadd.f32 %v606_v27, %v159_v51  ;;  %v705_v63 = vmax.f32 %v519_v55, 0.0  ;;  %v2529_v10 = vld [vmem:[%s3282_s5 + $0x2b8] sm:$0xff]   ;;  %v2538_v27 = vld [vmem:[%s3282_s5 + $0x260] sm:$0xff]   ;;  %v147_v53 = vrot.slane %v3007_v43, %v114_v6  ;;  %v2553_v6 = vld [vmem:[%s3282_s5 + $0x288] sm:$0xff]  }
 0x211   :  { %1892 = vmatprep.mubr.bf16.mxu0 %v736_v11  ;;  %1933 = vmatprep.mubr.bf16.mxu1 %v738_v12  ;;  %v735_v2 = vpack.c.bf16 %v719_v57, %v703_v61  ;;  %v708_v9 = vmax.f32 %v564_v58, 0.0  ;;  %v167_v57 = vrot.slane %v3007_v43, %v134_v19  ;;  %v2555_v19 = vld [vmem:[%s3282_s5 + $0x2c0] sm:$0xff]  }
 0x212   :  { %v567_v44 = vpop.f32.mrf.mxu0  ;;  %v610_v48 = vpop.f32.mrf.mxu1  ;;  %v737_v11 = vpack.c.bf16 %v721_v59, %v705_v63  ;;  %v710_v12 = vmax.f32 %v607_v34, 0.0 }
 0x213   :  { %2334 = vmatpush3.bf16.msra.mxu0 %v2504_v13  ;;  %2356 = vmatpush3.bf16.msra.mxu1 %v2505_v14  ;;  %v568_v54 = vadd.f32 %v567_v44, %v151_v47  ;;  %v611_v56 = vadd.f32 %v610_v48, %v159_v51  ;;  %v2530_v13 = vld [vmem:[%s3282_s5 + $0x270] sm:$0xff]   ;;  %v2550_v51 = vld [vmem:[%s3282_s5 + $0x248] sm:$0xff]  }
 0x214   :  { %2335 = vmatprep.subr.bf16.mxu0 %v2506_v15  ;;  %2357 = vmatprep.subr.bf16.mxu1 %v2507_v16  ;;  %v2531_v15 = vld [vmem:[%s3282_s5 + $0x2f0] sm:$0xff]  }
 0x215   :  { %v724_v62 = vmax.f32 %v568_v54, 0.0  ;;  %v726_v0 = vmax.f32 %v611_v56, 0.0  ;;  %v2547_v47 = vld [vmem:[%s3282_s5 + $0x2d0] sm:$0xff]   ;;  %v155_v54 = vrot.slane %v3007_v43, %v122_v7  ;;  %v2552_v56 = vld [vmem:[%s3282_s5 + $0x208] sm:$0xff]   ;;  %v2554_v7 = vld [vmem:[%s3282_s5 + $0x240] sm:$0xff]  }
 0x217   :  { %2336 = vmatpush3.bf16.msra.mxu0 %v2508_v18  ;;  %2358 = vmatpush3.bf16.msra.mxu1 %v2509_v22  ;;  %v740_v14 = vpack.c.bf16 %v724_v62, %v708_v9  ;;  %v742_v16 = vpack.c.bf16 %v726_v0, %v710_v12  ;;  %v2532_v18 = vld [vmem:[%s3282_s5 + $0x230] sm:$0xff]   ;;  %v605_v34 = vadd.f32 %v2957_v21, %v155_v54  ;;  %v2559_v0 = vld [vmem:[%s3282_s5 + $0x3f8] sm:$0xff]  }
 0x218   :  { %2337 = vmatprep.subr.bf16.mxu0 %v2510_v23  ;;  %2359 = vmatprep.subr.bf16.mxu1 %v2511_v24  ;;  %v2533_v22 = vld [vmem:[%s3282_s5 + $0x2b0] sm:$0xff]   ;;  %v2534_v23 = vld [vmem:[%s3282_s5 + $0x268] sm:$0xff]  }
 0x219   :  { %v2535_v24 = vld [vmem:[%s3282_s5 + $0x2e8] sm:$0xff]   ;;  %v709_v9 = vmax.f32 %v605_v34, 0.0 }
 0x21b   :  { %2338 = vmatpush3.bf16.msra.mxu0 %v2512_v26  ;;  %2360 = vmatpush3.bf16.msra.mxu1 %v2513_v28  ;;  %v2537_v26 = vld [vmem:[%s3282_s5 + $0x2a8] sm:$0xff]   ;;  %v2539_v28 = vld [vmem:[%s3282_s5 + $0x2e0] sm:$0xff]  }
 0x21c   :  { %2339 = vmatprep.subr.bf16.mxu0 %v2514_v29  ;;  %2361 = vmatprep.subr.bf16.mxu1 %v2515_v30  ;;  %v3079_v29 = vpop.f32.mrf.mxu0  ;;  %v2540_v30 = vld [vmem:[%s3282_s5 + $0x220] sm:$0xff]  }
 0x21e   :  { %v649_v41 = vpop.f32.mrf.mxu0 }
 0x21f   :  { %2340 = vmatpush3.bf16.msra.mxu0 %v2516_v37  ;;  %2362 = vmatpush3.bf16.msra.mxu1 %v2517_v38  ;;  %v3084_v37 = vpop.f32.mrf.mxu1  ;;  %v2541_v38 = vld [vmem:[%s3282_s5 + $0x2a0] sm:$0xff]   ;;  %v650_v62 = vadd.f32 %v649_v41, %v167_v57 }
 0x220   :  { %2341 = vmatprep.subr.bf16.mxu0 %v2518_v39  ;;  %2363 = vmatprep.subr.bf16.mxu1 %v2519_v40  ;;  %v2542_v39 = vld [vmem:[%s3282_s5 + $0x258] sm:$0xff]   ;;  %v3107_v48 = vpop.f32.mrf.mxu0  ;;  %v2572_v41 = vld [vmem:[%s3282_s5 + $0x320] sm:$0xff]  }
 0x221   :  { %v2543_v40 = vld [vmem:[%s3282_s5 + $0x2d8] sm:$0xff]   ;;  %v692_v44 = vpop.f32.mrf.mxu1 }
 0x222   :  { %v653_v55 = vpop.f32.mrf.mxu0 }
 0x223   :  { %2342 = vmatpush3.bf16.msra.mxu0 %v2520_v45  ;;  %2364 = vmatpush3.bf16.msra.mxu1 %v2521_v8  ;;  %v2545_v45 = vld [vmem:[%s3282_s5 + $0x298] sm:$0xff]   ;;  %v2548_v8 = vld [vmem:[%s3282_s5 + $0x210] sm:$0xff]   ;;  %v654_v59 = vadd.f32 %v653_v55, %v167_v57  ;;  %v163_v55 = vrot.slane %v3007_v43, %v130_v31  ;;  %v2586_v31 = vld [vmem:[%s3282_s5 + $0x340] sm:$0xff]  }
 0x224   :  { %2343 = vmatprep.subr.bf16.mxu0 %v2522_v49  ;;  %2365 = vmatprep.subr.bf16.mxu1 %v2523_v4  ;;  %v3112_v49 = vpop.f32.mrf.mxu1  ;;  %v2551_v4 = vld [vmem:[%s3282_s5 + $0x2c8] sm:$0xff]  }
 0x225   :  { %v652_v57 = vadd.f32 %v3107_v48, %v163_v55 }
 0x226   :  { %v696_v58 = vpop.f32.mrf.mxu1 }
 0x227   :  { %2344 = vmatpush3.bf16.msra.mxu0 %v2524_v52  ;;  %2366 = vmatpush3.bf16.msra.mxu1 %v2525_v5  ;;  %v566_v52 = vadd.f32 %v2982_v36, %v147_v53  ;;  %v609_v5 = vadd.f32 %v2987_v35, %v155_v54  ;;  %v175_v36 = vrot.slane %v3007_v43, %v142_v20  ;;  %v2556_v35 = vld [vmem:[%s3282_s5 + $0x200] sm:$0xff]   ;;  %v2583_v54 = vld [vmem:[%s3282_s5 + $0x3c8] sm:$0xff]  }
 0x228   :  { %2373 = vmatprep.subr.bf16.mxu0 %v2526_v33  ;;  %2395 = vmatprep.subr.bf16.mxu1 %v2527_v60  ;;  %v562_v33 = vadd.f32 %v2952_v17, %v147_v53  ;;  %v2557_v20 = vld [vmem:[%s3282_s5 + $0x280] sm:$0xff]   ;;  %v2558_v17 = vld [vmem:[%s3282_s5 + $0x378] sm:$0xff]   ;;  %v2582_v53 = vld [vmem:[%s3282_s5 + $0x348] sm:$0xff]  }
 0x229   :  { %v697_v60 = vadd.f32 %v696_v58, %v175_v36  ;;  %v723_v61 = vmax.f32 %v566_v52, 0.0  ;;  %v725_v63 = vmax.f32 %v609_v5, 0.0  ;;  %v693_v21 = vadd.f32 %v692_v44, %v175_v36  ;;  %v2574_v44 = vld [vmem:[%s3282_s5 + $0x358] sm:$0xff]   ;;  %v2584_v52 = vld [vmem:[%s3282_s5 + $0x308] sm:$0xff]  }
 0x22a   :  { %1893 = vmatmul.mubr.bf16.vlgmr.msra.gmra.mxu0 %v735_v2  ;;  %1934 = vmatmul.mubr.bf16.vlgmr.msra.gmra.mxu1 %v737_v11  ;;  %v728_v2 = vmax.f32 %v654_v59, 0.0  ;;  %v2560_v11 = vld [vmem:[%s3282_s5 + $0x338] sm:$0xff]   ;;  %v2585_v58 = vld [vmem:[%s3282_s5 + $0x388] sm:$0xff]  }
 0x22b   :  { %2374 = vmatpush3.bf16.msra.mxu0 %v2528_v1  ;;  %1974 = vmatprep.mubr.bf16.mxu0 %v740_v14  ;;  %v707_v1 = vmax.f32 %v562_v33, 0.0  ;;  %v2561_v14 = vld [vmem:[%s3282_s5 + $0x3b8] sm:$0xff]  }
 0x22c   :  { %2396 = vmatpush3.bf16.msra.mxu1 %v2529_v10  ;;  %2015 = vmatprep.mubr.bf16.mxu1 %v742_v16  ;;  %v730_v10 = vmax.f32 %v697_v60, 0.0  ;;  %v714_v16 = vmax.f32 %v693_v21, 0.0 }
 0x22d   :  { %2375 = vmatprep.subr.bf16.mxu0 %v2530_v13  ;;  %2397 = vmatprep.subr.bf16.mxu1 %v2531_v15  ;;  %v739_v12 = vpack.c.bf16 %v723_v61, %v707_v1  ;;  %v712_v13 = vmax.f32 %v650_v62, 0.0  ;;  %v741_v15 = vpack.c.bf16 %v725_v63, %v709_v9 }
 0x22f   :  { %2376 = vmatpush3.bf16.msra.mxu0 %v2532_v18  ;;  %v2562_v18 = vld [vmem:[%s3282_s5 + $0x370] sm:$0xff]  }
 0x230   :  { %2398 = vmatpush3.bf16.msra.mxu1 %v2533_v22  ;;  %2377 = vmatprep.subr.bf16.mxu0 %v2534_v23  ;;  %v744_v22 = vpack.c.bf16 %v728_v2, %v712_v13  ;;  %v2563_v23 = vld [vmem:[%s3282_s5 + $0x3f0] sm:$0xff]  }
 0x231   :  { %2399 = vmatprep.subr.bf16.mxu1 %v2535_v24  ;;  %v746_v24 = vpack.c.bf16 %v730_v10, %v714_v16 }
 0x233   :  { %2378 = vmatpush3.bf16.msra.mxu0 %v2536_v25  ;;  %v2564_v25 = vld [vmem:[%s3282_s5 + $0x330] sm:$0xff]  }
 0x234   :  { %2400 = vmatpush3.bf16.msra.mxu1 %v2537_v26  ;;  %2379 = vmatprep.subr.bf16.mxu0 %v2538_v27  ;;  %v2565_v26 = vld [vmem:[%s3282_s5 + $0x3b0] sm:$0xff]   ;;  %v2566_v27 = vld [vmem:[%s3282_s5 + $0x368] sm:$0xff]  }
 0x235   :  { %2401 = vmatprep.subr.bf16.mxu1 %v2539_v28  ;;  %v2567_v28 = vld [vmem:[%s3282_s5 + $0x3e8] sm:$0xff]  }
 0x237   :  { %2380 = vmatpush3.bf16.msra.mxu0 %v2540_v30  ;;  %v2568_v30 = vld [vmem:[%s3282_s5 + $0x328] sm:$0xff]  }
 0x238   :  { %2402 = vmatpush3.bf16.msra.mxu1 %v2541_v38  ;;  %2381 = vmatprep.subr.bf16.mxu0 %v2542_v39  ;;  %v2569_v38 = vld [vmem:[%s3282_s5 + $0x3a8] sm:$0xff]   ;;  %v2570_v39 = vld [vmem:[%s3282_s5 + $0x360] sm:$0xff]  }
 0x239   :  { %2403 = vmatprep.subr.bf16.mxu1 %v2543_v40  ;;  %v2571_v40 = vld [vmem:[%s3282_s5 + $0x3e0] sm:$0xff]  }
 0x23b   :  { %2382 = vmatpush3.bf16.msra.mxu0 %v2544_v42  ;;  %v2573_v42 = vld [vmem:[%s3282_s5 + $0x3a0] sm:$0xff]  }
 0x23c   :  { %2404 = vmatpush3.bf16.msra.mxu1 %v2545_v45  ;;  %2383 = vmatprep.subr.bf16.mxu0 %v2546_v46  ;;  %v2575_v45 = vld [vmem:[%s3282_s5 + $0x3d8] sm:$0xff]  }
 0x23d   :  { %2405 = vmatprep.subr.bf16.mxu1 %v2547_v47  ;;  %v2576_v46 = vld [vmem:[%s3282_s5 + $0x318] sm:$0xff]  }
 0x23e   :  { %v2577_v47 = vld [vmem:[%s3282_s5 + $0x398] sm:$0xff]  }
 0x23f   :  { %2384 = vmatpush3.bf16.msra.mxu0 %v2548_v8  ;;  %v2578_v8 = vld [vmem:[%s3282_s5 + $0x350] sm:$0xff]  }
 0x240   :  { %2406 = vmatpush3.bf16.msra.mxu1 %v2549_v50  ;;  %2385 = vmatprep.subr.bf16.mxu0 %v2550_v51  ;;  %v2579_v50 = vld [vmem:[%s3282_s5 + $0x3d0] sm:$0xff]  }
 0x241   :  { %2407 = vmatprep.subr.bf16.mxu1 %v2551_v4  ;;  %v2580_v51 = vld [vmem:[%s3282_s5 + $0x310] sm:$0xff]  }
 0x242   :  { %v2581_v4 = vld [vmem:[%s3282_s5 + $0x390] sm:$0xff]  }
 0x243   :  { %2386 = vmatpush3.bf16.msra.mxu0 %v2552_v56  ;;  %v171_v56 = vrot.slane %v3007_v43, %v138_v32  ;;  %v2587_v32 = vld [vmem:[%s3282_s5 + $0x3c0] sm:$0xff]   ;;  %v648_v43 = vadd.f32 %v3079_v29, %v163_v55 }
 0x244   :  { %2408 = vmatpush3.bf16.msra.mxu1 %v2553_v6  ;;  %2387 = vmatprep.subr.bf16.mxu0 %v2554_v7  ;;  %v2588_v6 = vld [vmem:[%s3282_s5 + $0x300] sm:$0xff]   ;;  %v727_v7 = vmax.f32 %v652_v57, 0.0 }
 0x245   :  { %2409 = vmatprep.subr.bf16.mxu1 %v2555_v19  ;;  %v695_v3 = vadd.f32 %v3112_v49, %v171_v56  ;;  %v691_v48 = vadd.f32 %v3084_v37, %v171_v56  ;;  %v2589_v49 = vld [vmem:[%s3282_s5 + $0x380] sm:$0xff]   ;;  %v711_v36 = vmax.f32 %v648_v43, 0.0 }
 0x247   :  { %2388 = vmatpush3.bf16.msra.mxu0 %v2556_v35  ;;  %v729_v5 = vmax.f32 %v695_v3, 0.0  ;;  %v713_v19 = vmax.f32 %v691_v48, 0.0  ;;  %v743_v29 = vpack.c.bf16 %v727_v7, %v711_v36 }
 0x248   :  { %2410 = vmatpush3.bf16.msra.mxu1 %v2557_v20  ;;  %2417 = vmatprep.subr.bf16.mxu0 %v2558_v17 }
 0x249   :  { %2439 = vmatprep.subr.bf16.mxu1 %v2559_v0  ;;  %v745_v37 = vpack.c.bf16 %v729_v5, %v713_v19 }
 0x24a   :  { %1975 = vmatmul.mubr.bf16.vlgmr.msra.gmra.mxu0 %v739_v12 }
 0x24b   :  { %2016 = vmatmul.mubr.bf16.vlgmr.msra.gmra.mxu1 %v741_v15  ;;  %2418 = vmatpush3.bf16.msra.mxu0 %v2560_v11  ;;  %v2156_v11 = vld [vmem:[%s3286_s6] ss:$0 sm:$0xff] }
 0x24c   :  { %2056 = vmatprep.mubr.bf16.mxu0 %v744_v22  ;;  %2440 = vmatpush3.bf16.msra.mxu1 %v2561_v14 }
 0x24d   :  { %2097 = vmatprep.mubr.bf16.mxu1 %v746_v24  ;;  %2419 = vmatprep.subr.bf16.mxu0 %v2562_v18 }
 0x24e   :  { %2441 = vmatprep.subr.bf16.mxu1 %v2563_v23 }
 0x24f   :  { %2420 = vmatpush3.bf16.msra.mxu0 %v2564_v25 }
 0x250   :  { %2442 = vmatpush3.bf16.msra.mxu1 %v2565_v26  ;;  %2421 = vmatprep.subr.bf16.mxu0 %v2566_v27 }
 0x251   :  { %2443 = vmatprep.subr.bf16.mxu1 %v2567_v28 }
 0x253   :  { %2422 = vmatpush3.bf16.msra.mxu0 %v2568_v30 }
 0x254   :  { %2444 = vmatpush3.bf16.msra.mxu1 %v2569_v38  ;;  %2423 = vmatprep.subr.bf16.mxu0 %v2570_v39 }
 0x255   :  { %2445 = vmatprep.subr.bf16.mxu1 %v2571_v40 }
 0x257   :  { %2424 = vmatpush3.bf16.msra.mxu0 %v2572_v41 }
 0x258   :  { %2446 = vmatpush3.bf16.msra.mxu1 %v2573_v42  ;;  %2425 = vmatprep.subr.bf16.mxu0 %v2574_v44 }
 0x259   :  { %2447 = vmatprep.subr.bf16.mxu1 %v2575_v45 }
 0x25b   :  { %2426 = vmatpush3.bf16.msra.mxu0 %v2576_v46 }
 0x25c   :  { %2448 = vmatpush3.bf16.msra.mxu1 %v2577_v47  ;;  %2427 = vmatprep.subr.bf16.mxu0 %v2578_v8 }
 0x25d   :  { %2449 = vmatprep.subr.bf16.mxu1 %v2579_v50 }
 0x25f   :  { %2428 = vmatpush3.bf16.msra.mxu0 %v2580_v51 }
 0x260   :  { %2450 = vmatpush3.bf16.msra.mxu1 %v2581_v4  ;;  %2429 = vmatprep.subr.bf16.mxu0 %v2582_v53 }
 0x261   :  { %2451 = vmatprep.subr.bf16.mxu1 %v2583_v54 }
 0x263   :  { %2430 = vmatpush3.bf16.msra.mxu0 %v2584_v52 }
 0x264   :  { %2452 = vmatpush3.bf16.msra.mxu1 %v2585_v58  ;;  %2431 = vmatprep.subr.bf16.mxu0 %v2586_v31 }
 0x265   :  { %2453 = vmatprep.subr.bf16.mxu1 %v2587_v32 }
 0x267   :  { %2432 = vmatpush3.bf16.msra.mxu0 %v2588_v6 }
 0x268   :  { %2454 = vmatpush3.bf16.msra.mxu1 %v2589_v49 }
 0x26a   :  { %2057 = vmatmul.mubr.bf16.vlgmr.msra.gmra.mxu0 %v743_v29  ;;  %v2594_v29 = vld [vmem:[%s3280_s0] sm:$0xff] }
 0x26b   :  { %2098 = vmatmul.mubr.bf16.vlgmr.msra.gmra.mxu1 %v745_v37 }
 0x2ca   :  { %v2301_v33 = vpop.f32.mrf.mxu0  ;;  %v2323_v59 = vpop.f32.mrf.mxu1 }
 0x2cc   :  { %v2302_v34 = vpop.f32.mrf.mxu0  ;;  %v2324_v60 = vpop.f32.mrf.mxu1 }
 0x2cd   :  { %v2303_v10 = vadd.f32 %v2302_v34, %v2301_v33  ;;  %v2325_v22 = vadd.f32 %v2324_v60, %v2323_v59  ;;  %v2595_v60 = vld [vmem:[%s3280_s0 + $0x8] sm:$0xff] }
 0x2ce   :  { %v2304_v35 = vpop.f32.mrf.mxu0  ;;  %v2326_v61 = vpop.f32.mrf.mxu1 }
 0x2cf   :  { %v1813_v14 = vadd.f32 %v2303_v10, %v2156_v11 }
 0x2d0   :  { %v2305_v62 = vpop.f32.mrf.mxu0  ;;  %v2327_v17 = vpop.f32.mrf.mxu1 }
 0x2d1   :  { %v2306_v15 = vadd.f32 %v2305_v62, %v2304_v35  ;;  %v1854_v24 = vadd.f32 %v2325_v22, %v1813_v14  ;;  %v2328_v28 = vadd.f32 %v2327_v17, %v2326_v61 }
 0x2d3   :  { %v1816_v25 = vadd.f32 %v2306_v15, %v2156_v11 }
 0x2d5   :  { %v1857_v39 = vadd.f32 %v2328_v28, %v1816_v25 }
 0x2ea   :  { %v2345_v20 = vpop.f32.mrf.mxu0  ;;  %v2367_v63 = vpop.f32.mrf.mxu1 }
 0x2ec   :  { %v2346_v21 = vpop.f32.mrf.mxu0  ;;  %v2368_v0 = vpop.f32.mrf.mxu1 }
 0x2ed   :  { %v2347_v23 = vadd.f32 %v2346_v21, %v2345_v20  ;;  %v2369_v40 = vadd.f32 %v2368_v0, %v2367_v63 }
 0x2ee   :  { %v2348_v1 = vpop.f32.mrf.mxu0  ;;  %v2370_v2 = vpop.f32.mrf.mxu1 }
 0x2ef   :  { %v1895_v30 = vadd.f32 %v2347_v23, %v1854_v24 }
 0x2f0   :  { %v2349_v9 = vpop.f32.mrf.mxu0  ;;  %v2371_v13 = vpop.f32.mrf.mxu1 }
 0x2f1   :  { %v2350_v38 = vadd.f32 %v2349_v9, %v2348_v1  ;;  %v1936_v45 = vadd.f32 %v2369_v40, %v1895_v30  ;;  %v2372_v47 = vadd.f32 %v2371_v13, %v2370_v2 }
 0x2f3   :  { %v1898_v46 = vadd.f32 %v2350_v38, %v1857_v39 }
 0x2f5   :  { %v1939_v53 = vadd.f32 %v2372_v47, %v1898_v46 }
 0x30a   :  { %v2389_v12 = vpop.f32.mrf.mxu0 }
 0x30b   :  { %v2411_v16 = vpop.f32.mrf.mxu1 }
 0x30c   :  { %v2390_v18 = vpop.f32.mrf.mxu0 }
 0x30d   :  { %v2412_v26 = vpop.f32.mrf.mxu1  ;;  %v2391_v41 = vadd.f32 %v2390_v18, %v2389_v12 }
 0x30e   :  { %v2392_v27 = vpop.f32.mrf.mxu0  ;;  %v2413_v54 = vadd.f32 %v2412_v26, %v2411_v16 }
 0x30f   :  { %v2414_v42 = vpop.f32.mrf.mxu1  ;;  %v1977_v8 = vadd.f32 %v2391_v41, %v1936_v45 }
 0x310   :  { %v2393_v44 = vpop.f32.mrf.mxu0 }
 0x311   :  { %v2394_v50 = vadd.f32 %v2393_v44, %v2392_v27  ;;  %v2415_v51 = vpop.f32.mrf.mxu1  ;;  %v2018_v52 = vadd.f32 %v2413_v54, %v1977_v8 }
 0x312   :  { %v2416_v32 = vadd.f32 %v2415_v51, %v2414_v42 }
 0x313   :  { %v1980_v57 = vadd.f32 %v2394_v50, %v1939_v53 }
 0x315   :  { %v2021_v49 = vadd.f32 %v2416_v32, %v1980_v57 }
 0x32a   :  { %v2433_v4 = vpop.f32.mrf.mxu0 }
 0x32b   :  { %v2455_v55 = vpop.f32.mrf.mxu1 }
 0x32c   :  { %v2434_v56 = vpop.f32.mrf.mxu0 }
 0x32d   :  { %v2435_v58 = vadd.f32 %v2434_v56, %v2433_v4  ;;  %v2456_v31 = vpop.f32.mrf.mxu1 }
 0x32e   :  { %v2436_v3 = vpop.f32.mrf.mxu0  ;;  %v2457_v48 = vadd.f32 %v2456_v31, %v2455_v55 }
 0x32f   :  { %v2059_v43 = vadd.f32 %v2435_v58, %v2018_v52  ;;  %v2458_v6 = vpop.f32.mrf.mxu1 }
 0x330   :  { %v2437_v7 = vpop.f32.mrf.mxu0 }
 0x331   :  { %v2100_v5 = vadd.f32 %v2457_v48, %v2059_v43  ;;  %v2438_v36 = vadd.f32 %v2437_v7, %v2436_v3  ;;  %v2459_v19 = vpop.f32.mrf.mxu1 }
 0x332   :  { %v2460_v59 = vadd.f32 %v2459_v19, %v2458_v6 }
 0x333   :  { %v2106_v37 = vadd.f32 %v2594_v29, %v2100_v5  ;;  %v2062_v33 = vadd.f32 %v2438_v36, %v2021_v49 }
 0x335   :  { %2108 = vst.msk [vmem:[%s3287_s7] sm:$0xff] %vm31_vm0, %v2106_v37  ;;  %v2103_v34 = vadd.f32 %v2460_v59, %v2062_v33 }
 0x337   :  { %v2107_v35 = vadd.f32 %v2595_v60, %v2103_v34 }
 0x339   :  { %2109 = vst.msk [vmem:[%s3287_s7 + $0x8] sm:$0xff] %vm31_vm0, %v2107_v35 }

</bundles_post_ra>
